<compile_context>
chip_gen: v5e
topology: v5e:2x2
jax: 0.10.0
libtpu: 0.0.40
codegen_flags: <defaults>
</compile_context>

<pallas_src>
import functools

import jax
import jax.numpy as jnp
from jax.experimental import pallas as pl
from jax.experimental.pallas import tpu as pltpu

EPS = 1e-5          # PyTorch BatchNorm2d default eps
LANE = 128          # TPU lane width; channel axis of the dense buffer is padded to this


# ---------------------------------------------------------------- kernel -----
def _dense_block_kernel(x_ref, gamma_ref, beta_ref, w_ref, b_ref, o_ref, xp_ref):
    """One grid step == one conv_block: BN(train) + ReLU + 3x3 SAME conv + concat.

    x_ref     : (N, H, W, C)       initial dense buffer (channels [0:cin0] valid)
    gamma_ref : (1, C)             BN weight of layer l, zero beyond cin_l
    beta_ref  : (1, C)             BN bias  of layer l, zero beyond cin_l
    w_ref     : (9, C, C) bf16     per-tap weights; cols [cin_l:cin_l+cout] hold the conv
    b_ref     : (1, C)             conv bias at cols [cin_l:cin_l+cout], else zero
    o_ref     : (N, H, W, C)       dense buffer, VMEM-resident across the layer grid
    xp_ref    : (N, H+2, W+2, C)   VMEM scratch holding the zero-padded activation
    """
    n, h, w, c = o_ref.shape
    r = n * h * w
    inv_r = 1.0 / r

    @pl.when(pl.program_id(0) == 0)
    def _init():
        # Seed the resident dense buffer from the (zero-padded) input once, and zero
        # the padded scratch once: its halo stays zero for every layer; only the
        # interior is rewritten below.
        o_ref[...] = x_ref[...]
        xp_ref[...] = jnp.zeros(xp_ref.shape, xp_ref.dtype)

    buf = o_ref[...]                                   # (N,H,W,C) resident dense buffer
    x2d = buf.reshape(r, c)

    # ---- training-mode BatchNorm, one-pass stats, folded to scale/shift; ReLU ----
    s1 = jnp.sum(x2d, axis=0, keepdims=True)           # (1, C)
    s2 = jnp.sum(x2d * x2d, axis=0, keepdims=True)     # (1, C)
    mean = s1 * inv_r
    var = jnp.maximum(s2 * inv_r - mean * mean, 0.0)   # biased var; clamp cancellation
    scale = gamma_ref[...] * jax.lax.rsqrt(var + EPS)  # zero for lanes >= cin_l
    shift = beta_ref[...] - mean * scale
    act = jnp.maximum(x2d * scale + shift, 0.0)        # (R, C) f32; zero beyond cin_l

    # ---- SAME padding: interior-only store into the pre-zeroed VMEM scratch ------
    xp_ref[:, 1:h + 1, 1:w + 1, :] = act.reshape(n, h, w, c)

    # ---- 3x3 conv: 9 per-tap MXU matmuls accumulated in f32 (no im2col slab) -----
    y = None
    for kh in range(3):
        for kw in range(3):
            tap = xp_ref[:, kh:kh + h, kw:kw + w, :].reshape(r, c).astype(jnp.bfloat16)
            p = jnp.dot(tap, w_ref[kh * 3 + kw], preferred_element_type=jnp.float32)
            y = p if y is None else y + p

    # ---- dense concat as a plain add (exact by the zero-padding invariant) -------
    o_ref[...] = (x2d + y + b_ref[...]).reshape(n, h, w, c)


# --------------------------------------------------------------- wrapper -----
@functools.partial(jax.jit, static_argnames=("c_total",))
def dense_block_forward(x_nchw, gammas, betas, weights, biases, *, c_total):
    """DenseBlock.forward: per block Y = Conv(ReLU(BN(X))); X = cat([X, Y], channel)."""
    n, cin0, h, w = x_nchw.shape
    num_layers, _, c_buf = gammas.shape
    r = n * h * w

    x = jnp.transpose(x_nchw, (0, 2, 3, 1)).astype(jnp.float32)          # NCHW -> NHWC
    x_buf = jnp.zeros((n, h, w, c_buf), jnp.float32).at[..., :cin0].set(x)

    cost = pl.CostEstimate(
        flops=num_layers * (2 * r * 9 * c_buf * c_buf + 12 * r * c_buf),
        transcendentals=num_layers * c_buf,
        bytes_accessed=(2 * 4 * r * c_buf                       # buffer in + out (once)
                        + 2 * num_layers * 9 * c_buf * c_buf    # bf16 weights
                        + 3 * 4 * num_layers * c_buf),
    )

    out_buf = pl.pallas_call(
        _dense_block_kernel,
        out_shape=jax.ShapeDtypeStruct((n, h, w, c_buf), jnp.float32),
        grid=(num_layers,),
        in_specs=[
            pl.BlockSpec((n, h, w, c_buf), lambda l: (0, 0, 0, 0)),      # fetched once
            pl.BlockSpec((None, 1, c_buf), lambda l: (l, 0, 0)),
            pl.BlockSpec((None, 1, c_buf), lambda l: (l, 0, 0)),
            pl.BlockSpec((None, 9, c_buf, c_buf), lambda l: (l, 0, 0, 0)),
            pl.BlockSpec((None, 1, c_buf), lambda l: (l, 0, 0)),
        ],
        out_specs=pl.BlockSpec((n, h, w, c_buf), lambda l: (0, 0, 0, 0)),  # resident
        scratch_shapes=[pltpu.VMEM((n, h + 2, w + 2, c_buf), jnp.float32)],
        input_output_aliases={0: 0},
        compiler_params=pltpu.CompilerParams(dimension_semantics=("arbitrary",)),
        cost_estimate=cost,
    )(x_buf, gammas, betas, weights, biases)

    return jnp.transpose(out_buf[..., :c_total], (0, 3, 1, 2))           # NHWC -> NCHW


def prepare_stacked_params(params, cin0, c_buf):
    """Pad, pre-place and stack per-layer params ONCE (hoisted out of the forward).

    Layer-l conv output columns are pre-placed at [cin_l, cin_l+cout) so the matmul
    result lands directly at its dense-concat offset; everything outside stays exactly
    zero (the kernel's add-concat relies on this invariant).
    """
    num_layers = len(params)
    gammas = jnp.zeros((num_layers, 1, c_buf), jnp.float32)
    betas = jnp.zeros((num_layers, 1, c_buf), jnp.float32)
    weights = jnp.zeros((num_layers, 9, c_buf, c_buf), jnp.float32)
    biases = jnp.zeros((num_layers, 1, c_buf), jnp.float32)
    cin = cin0
    for i, (gamma, beta, w_hwio, b) in enumerate(params):
        cout = w_hwio.shape[-1]
        gammas = gammas.at[i, 0, :cin].set(gamma)
        betas = betas.at[i, 0, :cin].set(beta)
        weights = weights.at[i, :, :cin, cin:cin + cout].set(w_hwio.reshape(9, cin, cout))
        biases = biases.at[i, 0, cin:cin + cout].set(b)
        cin += cout
    # bf16 weights: halves weight DMA traffic and feeds the MXU at full rate.
    return gammas, betas, weights.astype(jnp.bfloat16), biases


# ------------------------------------------------------------ param setup ----
def init_params(key, num_convs=2, input_channels=3, num_channels=10):
    params = []
    for i in range(num_convs):
        cin = input_channels + num_channels * i
        key, kw, kb = jax.random.split(key, 3)
        gamma = jnp.ones((cin,), jnp.float32)                   # PyTorch BN affine default
        beta = jnp.zeros((cin,), jnp.float32)
        bound = 1.0 / float(jnp.sqrt(cin * 9))
        wgt = jax.random.uniform(kw, (3, 3, cin, num_channels), jnp.float32, -bound, bound)
        b = jax.random.uniform(kb, (num_channels,), jnp.float32, -bound, bound)
        params.append((gamma, beta, wgt, b))
    return params


# --------------------------------------------------------------- reference ---
def ref_forward(x_nchw, params):
    """Pure-JAX reference. Conv operands cast to bf16 (f32 accumulation) to match the
    kernel's MXU dtype (per review note); BN / ReLU / concat stay in f32."""
    x = jnp.transpose(x_nchw, (0, 2, 3, 1)).astype(jnp.float32)
    for gamma, beta, wgt, b in params:
        mean = jnp.mean(x, axis=(0, 1, 2), keepdims=True)
        var = jnp.mean((x - mean) ** 2, axis=(0, 1, 2), keepdims=True)
        a = jnp.maximum((x - mean) / jnp.sqrt(var + EPS) * gamma + beta, 0.0)
        y = jax.lax.conv_general_dilated(
            a.astype(jnp.bfloat16), wgt.astype(jnp.bfloat16),
            window_strides=(1, 1), padding="SAME",
            dimension_numbers=("NHWC", "HWIO", "NHWC"),
            preferred_element_type=jnp.float32) + b
        x = jnp.concatenate([x, y], axis=-1)
    return jnp.transpose(x, (0, 3, 1, 2))


# -------------------------------------------------------------------- main ---
if __name__ == "__main__":
    key = jax.random.PRNGKey(0)
    key, kx = jax.random.split(key)

    # matches: blk = DenseBlock(2, 3, 10); x = torch.rand(4, 3, 8, 8)
    x = jax.random.uniform(kx, (4, 3, 8, 8), jnp.float32)
    params = init_params(key, num_convs=2, input_channels=3, num_channels=10)

    cin0 = 3
    c_total = cin0 + 10 * len(params)
    c_buf = LANE * (-(-c_total // LANE))                        # channels padded to 128

    # Hoisted out of the forward: done once, reused by every jitted call.
    gammas, betas, weights, biases = prepare_stacked_params(params, cin0, c_buf)

    y = jax.block_until_ready(
        dense_block_forward(x, gammas, betas, weights, biases, c_total=c_total))
    assert y.shape == (4, c_total, 8, 8), y.shape

    y_ref = jax.block_until_ready(ref_forward(x, params))
    max_err = float(jnp.max(jnp.abs(y - y_ref)))
    # bf16 conv operands in both kernel and reference; tolerance covers the rare
    # one-ulp bf16 rounding divergences between the two implementations.
    assert max_err < 2e-2, max_err

    print("KERNEL_OK")
</pallas_src>

<mosaic_0001>
module attributes {stable_mosaic.version = 11 : i64} {
  func.func @_dense_block_kernel(%arg0: i32, %arg1: memref<4x8x8x128xf32, #tpu.memory_space<vmem>>, %arg2: memref<1x1x128xf32, #tpu.memory_space<vmem>>, %arg3: memref<1x1x128xf32, #tpu.memory_space<vmem>>, %arg4: memref<1x9x128x128xbf16, #tpu.memory_space<vmem>>, %arg5: memref<1x1x128xf32, #tpu.memory_space<vmem>>, %arg6: memref<4x8x8x128xf32, #tpu.memory_space<vmem>>, %arg7: memref<4x10x10x128xf32, #tpu.memory_space<vmem>>) attributes {dimension_semantics = [#tpu.dimension_semantics<arbitrary>], iteration_bounds = array<i64: 2>, scalar_prefetch = 0 : i64, scratch_operands = 1 : i64, tpu.core_type = #tpu.core_type<tc>, window_params = [{pipeline_mode = #tpu.pipeline_mode<synchronous>, transform_indices = @transform_0, window_bounds = array<i64: 4, 8, 8, 128>}, {transform_indices = @transform_1, window_bounds = array<i64: 1, 1, 128>}, {transform_indices = @transform_2, window_bounds = array<i64: 1, 1, 128>}, {transform_indices = @transform_3, window_bounds = array<i64: 1, 9, 128, 128>}, {transform_indices = @transform_4, window_bounds = array<i64: 1, 1, 128>}, {pipeline_mode = #tpu.pipeline_mode<synchronous>, transform_indices = @transform_5, window_bounds = array<i64: 4, 8, 8, 128>}]} {
    %c0_i32 = arith.constant 0 : i32
    %0 = arith.cmpi eq, %arg0, %c0_i32 : i32
    %1 = arith.extui %0 : i1 to i32
    %c0_i32_0 = arith.constant 0 : i32
    %2 = arith.cmpi ne, %1, %c0_i32_0 : i32
    scf.if %2 {
      %c0_100 = arith.constant 0 : index
      %c0_101 = arith.constant 0 : index
      %c0_102 = arith.constant 0 : index
      %c0_103 = arith.constant 0 : index
      %105 = vector.load %arg1[%c0_100, %c0_101, %c0_102, %c0_103] : memref<4x8x8x128xf32, #tpu.memory_space<vmem>>, vector<4x8x8x128xf32>
      %c0_104 = arith.constant 0 : index
      %c0_105 = arith.constant 0 : index
      %c0_106 = arith.constant 0 : index
      %c0_107 = arith.constant 0 : index
      %106 = vector.load %arg6[%c0_104, %c0_105, %c0_106, %c0_107] : memref<4x8x8x128xf32, #tpu.memory_space<vmem>>, vector<4x8x8x128xf32>
      tpu.vector_store %arg6[%c0_104, %c0_105, %c0_106, %c0_107], %105 {strides = array<i32>} : memref<4x8x8x128xf32, #tpu.memory_space<vmem>>, vector<4x8x8x128xf32>,
      %cst_108 = arith.constant 0.000000e+00 : f32
      %107 = vector.broadcast %cst_108 : f32 to vector<4x10x10x128xf32>
      %c0_109 = arith.constant 0 : index
      %c0_110 = arith.constant 0 : index
      %c0_111 = arith.constant 0 : index
      %c0_112 = arith.constant 0 : index
      %108 = vector.load %arg7[%c0_109, %c0_110, %c0_111, %c0_112] : memref<4x10x10x128xf32, #tpu.memory_space<vmem>>, vector<4x10x10x128xf32>
      tpu.vector_store %arg7[%c0_109, %c0_110, %c0_111, %c0_112], %107 {strides = array<i32>} : memref<4x10x10x128xf32, #tpu.memory_space<vmem>>, vector<4x10x10x128xf32>,
    } else {
    }
    %c0 = arith.constant 0 : index
    %c0_1 = arith.constant 0 : index
    %c0_2 = arith.constant 0 : index
    %c0_3 = arith.constant 0 : index
    %3 = vector.load %arg6[%c0, %c0_1, %c0_2, %c0_3] : memref<4x8x8x128xf32, #tpu.memory_space<vmem>>, vector<4x8x8x128xf32>
    %4 = vector.shape_cast %3 : vector<4x8x8x128xf32> to vector<256x128xf32>
    %cst = arith.constant dense<0.000000e+00> : vector<128xf32>
    %5 = vector.multi_reduction <add>, %4, %cst [0] : vector<256x128xf32> to vector<128xf32>
    %6 = vector.shape_cast %5 : vector<128xf32> to vector<1x128xf32>
    %7 = arith.mulf %4, %4 : vector<256x128xf32>
    %cst_4 = arith.constant dense<0.000000e+00> : vector<128xf32>
    %8 = vector.multi_reduction <add>, %7, %cst_4 [0] : vector<256x128xf32> to vector<128xf32>
    %9 = vector.shape_cast %8 : vector<128xf32> to vector<1x128xf32>
    %cst_5 = arith.constant 3.906250e-03 : f32
    %10 = vector.broadcast %cst_5 : f32 to vector<1x128xf32>
    %11 = arith.mulf %6, %10 : vector<1x128xf32>
    %cst_6 = arith.constant 3.906250e-03 : f32
    %12 = vector.broadcast %cst_6 : f32 to vector<1x128xf32>
    %13 = arith.mulf %9, %12 : vector<1x128xf32>
    %14 = arith.mulf %11, %11 : vector<1x128xf32>
    %15 = arith.subf %13, %14 : vector<1x128xf32>
    %cst_7 = arith.constant 0.000000e+00 : f32
    %16 = vector.broadcast %cst_7 : f32 to vector<1x128xf32>
    %17 = arith.maximumf %15, %16 : vector<1x128xf32>
    %c0_8 = arith.constant 0 : index
    %c0_9 = arith.constant 0 : index
    %c0_10 = arith.constant 0 : index
    %18 = vector.load %arg2[%c0_8, %c0_9, %c0_10] : memref<1x1x128xf32, #tpu.memory_space<vmem>>, vector<1x1x128xf32>
    %19 = vector.shape_cast %18 : vector<1x1x128xf32> to vector<1x128xf32>
    %cst_11 = arith.constant 9.99999974E-6 : f32
    %20 = vector.broadcast %cst_11 : f32 to vector<1x128xf32>
    %21 = arith.addf %17, %20 : vector<1x128xf32>
    %22 = math.rsqrt %21 : vector<1x128xf32>
    %23 = arith.mulf %19, %22 : vector<1x128xf32>
    %c0_12 = arith.constant 0 : index
    %c0_13 = arith.constant 0 : index
    %c0_14 = arith.constant 0 : index
    %24 = vector.load %arg3[%c0_12, %c0_13, %c0_14] : memref<1x1x128xf32, #tpu.memory_space<vmem>>, vector<1x1x128xf32>
    %25 = vector.shape_cast %24 : vector<1x1x128xf32> to vector<1x128xf32>
    %26 = arith.mulf %11, %23 : vector<1x128xf32>
    %27 = arith.subf %25, %26 : vector<1x128xf32>
    %28 = vector.broadcast %23 : vector<1x128xf32> to vector<256x128xf32>
    %29 = arith.mulf %4, %28 : vector<256x128xf32>
    %30 = vector.broadcast %27 : vector<1x128xf32> to vector<256x128xf32>
    %31 = arith.addf %29, %30 : vector<256x128xf32>
    %cst_15 = arith.constant 0.000000e+00 : f32
    %32 = vector.broadcast %cst_15 : f32 to vector<256x128xf32>
    %33 = arith.maximumf %31, %32 : vector<256x128xf32>
    %34 = vector.shape_cast %33 : vector<256x128xf32> to vector<4x8x8x128xf32>
    %c0_16 = arith.constant 0 : index
    %c1 = arith.constant 1 : index
    %c1_17 = arith.constant 1 : index
    %c0_18 = arith.constant 0 : index
    %35 = vector.load %arg7[%c0_16, %c1, %c1_17, %c0_18] : memref<4x10x10x128xf32, #tpu.memory_space<vmem>>, vector<4x8x8x128xf32>
    tpu.vector_store %arg7[%c0_16, %c1, %c1_17, %c0_18], %34 {strides = array<i32>} : memref<4x10x10x128xf32, #tpu.memory_space<vmem>>, vector<4x8x8x128xf32>,
    %c0_19 = arith.constant 0 : index
    %c0_20 = arith.constant 0 : index
    %c0_21 = arith.constant 0 : index
    %c0_22 = arith.constant 0 : index
    %36 = vector.load %arg7[%c0_19, %c0_20, %c0_21, %c0_22] : memref<4x10x10x128xf32, #tpu.memory_space<vmem>>, vector<4x8x8x128xf32>
    %37 = vector.shape_cast %36 : vector<4x8x8x128xf32> to vector<256x128xf32>
    %38 = arith.truncf %37 : vector<256x128xf32> to vector<256x128xbf16>
    %c0_23 = arith.constant 0 : index
    %c0_24 = arith.constant 0 : index
    %c0_25 = arith.constant 0 : index
    %c0_26 = arith.constant 0 : index
    %39 = vector.load %arg4[%c0_23, %c0_24, %c0_25, %c0_26] : memref<1x9x128x128xbf16, #tpu.memory_space<vmem>>, vector<1x1x128x128xbf16>
    %40 = vector.shape_cast %39 : vector<1x1x128x128xbf16> to vector<128x128xbf16>
    %cst_27 = arith.constant dense<0.000000e+00> : vector<256x128xf32>
    %41 = tpu.matmul %38, %40, %cst_27 {dimension_numbers = #tpu.dot_dimension_numbers<[1], [0], [0], [1], [0, 0, 1, 1], [], []>} : vector<256x128xbf16>, vector<128x128xbf16>, vector<256x128xf32> -> vector<256x128xf32>
    %c0_28 = arith.constant 0 : index
    %c0_29 = arith.constant 0 : index
    %c1_30 = arith.constant 1 : index
    %c0_31 = arith.constant 0 : index
    %42 = vector.load %arg7[%c0_28, %c0_29, %c1_30, %c0_31] : memref<4x10x10x128xf32, #tpu.memory_space<vmem>>, vector<4x8x8x128xf32>
    %43 = vector.shape_cast %42 : vector<4x8x8x128xf32> to vector<256x128xf32>
    %44 = arith.truncf %43 : vector<256x128xf32> to vector<256x128xbf16>
    %c0_32 = arith.constant 0 : index
    %c1_33 = arith.constant 1 : index
    %c0_34 = arith.constant 0 : index
    %c0_35 = arith.constant 0 : index
    %45 = vector.load %arg4[%c0_32, %c1_33, %c0_34, %c0_35] : memref<1x9x128x128xbf16, #tpu.memory_space<vmem>>, vector<1x1x128x128xbf16>
    %46 = vector.shape_cast %45 : vector<1x1x128x128xbf16> to vector<128x128xbf16>
    %cst_36 = arith.constant dense<0.000000e+00> : vector<256x128xf32>
    %47 = tpu.matmul %44, %46, %cst_36 {dimension_numbers = #tpu.dot_dimension_numbers<[1], [0], [0], [1], [0, 0, 1, 1], [], []>} : vector<256x128xbf16>, vector<128x128xbf16>, vector<256x128xf32> -> vector<256x128xf32>
    %48 = arith.addf %41, %47 : vector<256x128xf32>
    %c0_37 = arith.constant 0 : index
    %c0_38 = arith.constant 0 : index
    %c2 = arith.constant 2 : index
    %c0_39 = arith.constant 0 : index
    %49 = vector.load %arg7[%c0_37, %c0_38, %c2, %c0_39] : memref<4x10x10x128xf32, #tpu.memory_space<vmem>>, vector<4x8x8x128xf32>
    %50 = vector.shape_cast %49 : vector<4x8x8x128xf32> to vector<256x128xf32>
    %51 = arith.truncf %50 : vector<256x128xf32> to vector<256x128xbf16>
    %c0_40 = arith.constant 0 : index
    %c2_41 = arith.constant 2 : index
    %c0_42 = arith.constant 0 : index
    %c0_43 = arith.constant 0 : index
    %52 = vector.load %arg4[%c0_40, %c2_41, %c0_42, %c0_43] : memref<1x9x128x128xbf16, #tpu.memory_space<vmem>>, vector<1x1x128x128xbf16>
    %53 = vector.shape_cast %52 : vector<1x1x128x128xbf16> to vector<128x128xbf16>
    %cst_44 = arith.constant dense<0.000000e+00> : vector<256x128xf32>
    %54 = tpu.matmul %51, %53, %cst_44 {dimension_numbers = #tpu.dot_dimension_numbers<[1], [0], [0], [1], [0, 0, 1, 1], [], []>} : vector<256x128xbf16>, vector<128x128xbf16>, vector<256x128xf32> -> vector<256x128xf32>
    %55 = arith.addf %48, %54 : vector<256x128xf32>
    %c0_45 = arith.constant 0 : index
    %c1_46 = arith.constant 1 : index
    %c0_47 = arith.constant 0 : index
    %c0_48 = arith.constant 0 : index
    %56 = vector.load %arg7[%c0_45, %c1_46, %c0_47, %c0_48] : memref<4x10x10x128xf32, #tpu.memory_space<vmem>>, vector<4x8x8x128xf32>
    %57 = vector.shape_cast %56 : vector<4x8x8x128xf32> to vector<256x128xf32>
    %58 = arith.truncf %57 : vector<256x128xf32> to vector<256x128xbf16>
    %c0_49 = arith.constant 0 : index
    %c3 = arith.constant 3 : index
    %c0_50 = arith.constant 0 : index
    %c0_51 = arith.constant 0 : index
    %59 = vector.load %arg4[%c0_49, %c3, %c0_50, %c0_51] : memref<1x9x128x128xbf16, #tpu.memory_space<vmem>>, vector<1x1x128x128xbf16>
    %60 = vector.shape_cast %59 : vector<1x1x128x128xbf16> to vector<128x128xbf16>
    %cst_52 = arith.constant dense<0.000000e+00> : vector<256x128xf32>
    %61 = tpu.matmul %58, %60, %cst_52 {dimension_numbers = #tpu.dot_dimension_numbers<[1], [0], [0], [1], [0, 0, 1, 1], [], []>} : vector<256x128xbf16>, vector<128x128xbf16>, vector<256x128xf32> -> vector<256x128xf32>
    %62 = arith.addf %55, %61 : vector<256x128xf32>
    %c0_53 = arith.constant 0 : index
    %c1_54 = arith.constant 1 : index
    %c1_55 = arith.constant 1 : index
    %c0_56 = arith.constant 0 : index
    %63 = vector.load %arg7[%c0_53, %c1_54, %c1_55, %c0_56] : memref<4x10x10x128xf32, #tpu.memory_space<vmem>>, vector<4x8x8x128xf32>
    %64 = vector.shape_cast %63 : vector<4x8x8x128xf32> to vector<256x128xf32>
    %65 = arith.truncf %64 : vector<256x128xf32> to vector<256x128xbf16>
    %c0_57 = arith.constant 0 : index
    %c4 = arith.constant 4 : index
    %c0_58 = arith.constant 0 : index
    %c0_59 = arith.constant 0 : index
    %66 = vector.load %arg4[%c0_57, %c4, %c0_58, %c0_59] : memref<1x9x128x128xbf16, #tpu.memory_space<vmem>>, vector<1x1x128x128xbf16>
    %67 = vector.shape_cast %66 : vector<1x1x128x128xbf16> to vector<128x128xbf16>
    %cst_60 = arith.constant dense<0.000000e+00> : vector<256x128xf32>
    %68 = tpu.matmul %65, %67, %cst_60 {dimension_numbers = #tpu.dot_dimension_numbers<[1], [0], [0], [1], [0, 0, 1, 1], [], []>} : vector<256x128xbf16>, vector<128x128xbf16>, vector<256x128xf32> -> vector<256x128xf32>
    %69 = arith.addf %62, %68 : vector<256x128xf32>
    %c0_61 = arith.constant 0 : index
    %c1_62 = arith.constant 1 : index
    %c2_63 = arith.constant 2 : index
    %c0_64 = arith.constant 0 : index
    %70 = vector.load %arg7[%c0_61, %c1_62, %c2_63, %c0_64] : memref<4x10x10x128xf32, #tpu.memory_space<vmem>>, vector<4x8x8x128xf32>
    %71 = vector.shape_cast %70 : vector<4x8x8x128xf32> to vector<256x128xf32>
    %72 = arith.truncf %71 : vector<256x128xf32> to vector<256x128xbf16>
    %c0_65 = arith.constant 0 : index
    %c5 = arith.constant 5 : index
    %c0_66 = arith.constant 0 : index
    %c0_67 = arith.constant 0 : index
    %73 = vector.load %arg4[%c0_65, %c5, %c0_66, %c0_67] : memref<1x9x128x128xbf16, #tpu.memory_space<vmem>>, vector<1x1x128x128xbf16>
    %74 = vector.shape_cast %73 : vector<1x1x128x128xbf16> to vector<128x128xbf16>
    %cst_68 = arith.constant dense<0.000000e+00> : vector<256x128xf32>
    %75 = tpu.matmul %72, %74, %cst_68 {dimension_numbers = #tpu.dot_dimension_numbers<[1], [0], [0], [1], [0, 0, 1, 1], [], []>} : vector<256x128xbf16>, vector<128x128xbf16>, vector<256x128xf32> -> vector<256x128xf32>
    %76 = arith.addf %69, %75 : vector<256x128xf32>
    %c0_69 = arith.constant 0 : index
    %c2_70 = arith.constant 2 : index
    %c0_71 = arith.constant 0 : index
    %c0_72 = arith.constant 0 : index
    %77 = vector.load %arg7[%c0_69, %c2_70, %c0_71, %c0_72] : memref<4x10x10x128xf32, #tpu.memory_space<vmem>>, vector<4x8x8x128xf32>
    %78 = vector.shape_cast %77 : vector<4x8x8x128xf32> to vector<256x128xf32>
    %79 = arith.truncf %78 : vector<256x128xf32> to vector<256x128xbf16>
    %c0_73 = arith.constant 0 : index
    %c6 = arith.constant 6 : index
    %c0_74 = arith.constant 0 : index
    %c0_75 = arith.constant 0 : index
    %80 = vector.load %arg4[%c0_73, %c6, %c0_74, %c0_75] : memref<1x9x128x128xbf16, #tpu.memory_space<vmem>>, vector<1x1x128x128xbf16>
    %81 = vector.shape_cast %80 : vector<1x1x128x128xbf16> to vector<128x128xbf16>
    %cst_76 = arith.constant dense<0.000000e+00> : vector<256x128xf32>
    %82 = tpu.matmul %79, %81, %cst_76 {dimension_numbers = #tpu.dot_dimension_numbers<[1], [0], [0], [1], [0, 0, 1, 1], [], []>} : vector<256x128xbf16>, vector<128x128xbf16>, vector<256x128xf32> -> vector<256x128xf32>
    %83 = arith.addf %76, %82 : vector<256x128xf32>
    %c0_77 = arith.constant 0 : index
    %c2_78 = arith.constant 2 : index
    %c1_79 = arith.constant 1 : index
    %c0_80 = arith.constant 0 : index
    %84 = vector.load %arg7[%c0_77, %c2_78, %c1_79, %c0_80] : memref<4x10x10x128xf32, #tpu.memory_space<vmem>>, vector<4x8x8x128xf32>
    %85 = vector.shape_cast %84 : vector<4x8x8x128xf32> to vector<256x128xf32>
    %86 = arith.truncf %85 : vector<256x128xf32> to vector<256x128xbf16>
    %c0_81 = arith.constant 0 : index
    %c7 = arith.constant 7 : index
    %c0_82 = arith.constant 0 : index
    %c0_83 = arith.constant 0 : index
    %87 = vector.load %arg4[%c0_81, %c7, %c0_82, %c0_83] : memref<1x9x128x128xbf16, #tpu.memory_space<vmem>>, vector<1x1x128x128xbf16>
    %88 = vector.shape_cast %87 : vector<1x1x128x128xbf16> to vector<128x128xbf16>
    %cst_84 = arith.constant dense<0.000000e+00> : vector<256x128xf32>
    %89 = tpu.matmul %86, %88, %cst_84 {dimension_numbers = #tpu.dot_dimension_numbers<[1], [0], [0], [1], [0, 0, 1, 1], [], []>} : vector<256x128xbf16>, vector<128x128xbf16>, vector<256x128xf32> -> vector<256x128xf32>
    %90 = arith.addf %83, %89 : vector<256x128xf32>
    %c0_85 = arith.constant 0 : index
    %c2_86 = arith.constant 2 : index
    %c2_87 = arith.constant 2 : index
    %c0_88 = arith.constant 0 : index
    %91 = vector.load %arg7[%c0_85, %c2_86, %c2_87, %c0_88] : memref<4x10x10x128xf32, #tpu.memory_space<vmem>>, vector<4x8x8x128xf32>
    %92 = vector.shape_cast %91 : vector<4x8x8x128xf32> to vector<256x128xf32>
    %93 = arith.truncf %92 : vector<256x128xf32> to vector<256x128xbf16>
    %c0_89 = arith.constant 0 : index
    %c8 = arith.constant 8 : index
    %c0_90 = arith.constant 0 : index
    %c0_91 = arith.constant 0 : index
    %94 = vector.load %arg4[%c0_89, %c8, %c0_90, %c0_91] : memref<1x9x128x128xbf16, #tpu.memory_space<vmem>>, vector<1x1x128x128xbf16>
    %95 = vector.shape_cast %94 : vector<1x1x128x128xbf16> to vector<128x128xbf16>
    %cst_92 = arith.constant dense<0.000000e+00> : vector<256x128xf32>
    %96 = tpu.matmul %93, %95, %cst_92 {dimension_numbers = #tpu.dot_dimension_numbers<[1], [0], [0], [1], [0, 0, 1, 1], [], []>} : vector<256x128xbf16>, vector<128x128xbf16>, vector<256x128xf32> -> vector<256x128xf32>
    %97 = arith.addf %90, %96 : vector<256x128xf32>
    %98 = arith.addf %4, %97 : vector<256x128xf32>
    %c0_93 = arith.constant 0 : index
    %c0_94 = arith.constant 0 : index
    %c0_95 = arith.constant 0 : index
    %99 = vector.load %arg5[%c0_93, %c0_94, %c0_95] : memref<1x1x128xf32, #tpu.memory_space<vmem>>, vector<1x1x128xf32>
    %100 = vector.shape_cast %99 : vector<1x1x128xf32> to vector<1x128xf32>
    %101 = vector.broadcast %100 : vector<1x128xf32> to vector<256x128xf32>
    %102 = arith.addf %98, %101 : vector<256x128xf32>
    %103 = vector.shape_cast %102 : vector<256x128xf32> to vector<4x8x8x128xf32>
    %c0_96 = arith.constant 0 : index
    %c0_97 = arith.constant 0 : index
    %c0_98 = arith.constant 0 : index
    %c0_99 = arith.constant 0 : index
    %104 = vector.load %arg6[%c0_96, %c0_97, %c0_98, %c0_99] : memref<4x8x8x128xf32, #tpu.memory_space<vmem>>, vector<4x8x8x128xf32>
    tpu.vector_store %arg6[%c0_96, %c0_97, %c0_98, %c0_99], %103 {strides = array<i32>} : memref<4x8x8x128xf32, #tpu.memory_space<vmem>>, vector<4x8x8x128xf32>,
    return
  }
  func.func @transform_0(%arg0: i32) -> (i32, i32, i32, i32) {
    %c0_i32 = arith.constant 0 : i32
    %c0_i32_0 = arith.constant 0 : i32
    %c0_i32_1 = arith.constant 0 : i32
    %c0_i32_2 = arith.constant 0 : i32
    %c0_i32_3 = arith.constant 0 : i32
    return %c0_i32, %c0_i32_0, %c0_i32_1, %c0_i32_2 : i32, i32, i32, i32
  }
  func.func @transform_1(%arg0: i32) -> (i32, i32, i32) {
    %c0_i32 = arith.constant 0 : i32
    %c0_i32_0 = arith.constant 0 : i32
    %c0_i32_1 = arith.constant 0 : i32
    return %arg0, %c0_i32, %c0_i32_0 : i32, i32, i32
  }
  func.func @transform_2(%arg0: i32) -> (i32, i32, i32) {
    %c0_i32 = arith.constant 0 : i32
    %c0_i32_0 = arith.constant 0 : i32
    %c0_i32_1 = arith.constant 0 : i32
    return %arg0, %c0_i32, %c0_i32_0 : i32, i32, i32
  }
  func.func @transform_3(%arg0: i32) -> (i32, i32, i32, i32) {
    %c0_i32 = arith.constant 0 : i32
    %c0_i32_0 = arith.constant 0 : i32
    %c0_i32_1 = arith.constant 0 : i32
    %c0_i32_2 = arith.constant 0 : i32
    return %arg0, %c0_i32, %c0_i32_0, %c0_i32_1 : i32, i32, i32, i32
  }
  func.func @transform_4(%arg0: i32) -> (i32, i32, i32) {
    %c0_i32 = arith.constant 0 : i32
    %c0_i32_0 = arith.constant 0 : i32
    %c0_i32_1 = arith.constant 0 : i32
    return %arg0, %c0_i32, %c0_i32_0 : i32, i32, i32
  }
  func.func @transform_5(%arg0: i32) -> (i32, i32, i32, i32) {
    %c0_i32 = arith.constant 0 : i32
    %c0_i32_0 = arith.constant 0 : i32
    %c0_i32_1 = arith.constant 0 : i32
    %c0_i32_2 = arith.constant 0 : i32
    %c0_i32_3 = arith.constant 0 : i32
    return %c0_i32, %c0_i32_0, %c0_i32_1, %c0_i32_2 : i32, i32, i32, i32
  }
}

</mosaic_0001>

<bundles_post_ra>
// kernel: dense_block_forward.1
= control target key start
LH: loop header
LB: loop body
LE: loop exit
PB: predicated region body
PF: predicated region fallthrough
CT: control target
= control target key end

     0   :  { %10 = vsyncpa [#allocation4], 0  ;;  %s5015_s0 = inlined_call_operand.vmem [shape: f32[4,8,8,128], index: 0, kind: input, shape index: {}, may-alias: {0,5}]   ;;  %s5016_s1 = inlined_call_operand.vmem [shape: f32[2,1,128], index: 1, kind: input, shape index: {}]   ;;  %s5017_s2 = inlined_call_operand.vmem [shape: f32[2,1,128], index: 2, kind: input, shape index: {}]   ;;  %s5018_s3 = inlined_call_operand.hbm [shape: bf16[2,9,128,128], index: 3, kind: input, shape index: {}]   ;;  %s5019_s4 = inlined_call_operand.vmem [shape: f32[2,1,128], index: 4, kind: input, shape index: {}]   ;;  %s5020_s5 = inlined_call_operand.vmem [shape: f32[4,8,8,128], index: 5, kind: output, shape index: {}, may-alias: {0,5}]  }
   0x1   :  { %12 = vsyncpa [#allocation4 + $0x1], 0  ;;  %s3624_s18 = smov 0   ;;  %s3626_s19 = smov 0  }
   0x2   :  { %s3628_s20 = smov 0   ;;  %s3630_s21 = smov 0  }
   0x3 LB: > { %s3643_s22 = sadd.s32 4294967295, %s3589_s21   ;;  %s3646_s23 = sadd.s32 1, %s3589_s21   ;;  %s3589_s21 = sphi %s3630_s21, %s5026_s21   ;;  %s3585_s20 = sphi %s3628_s20, %s5025_s20   ;;  %s3581_s19 = sphi %s3626_s19, %s5024_s19   ;;  %s3577_s18 = sphi %s3624_s18, %s5023_s18  }
   0x4   : > { %s95_s24 = ssub.s32 %s3589_s21, %s3646_s23  ;;  %s98_s25 = sadd.s32 1, %s3585_s20 }
   0x5   : > { %p96_p0 = scmp.eq.s32.totalorder %s95_s24, 0  ;;  %p105_p1 = scmp.ne.s32.totalorder %s3585_s20, %s3581_s19 }
   0x6   : > { %p106_p2 = scmp.eq.s32.totalorder %s3589_s21, 0  ;;  %p111_p3 = scmp.ne.s32.totalorder %s3581_s19, %s3577_s18 }
   0x7   : > { %s3656_s26 = scalar_select %p96_p0, %s3585_s20, %s98_s25  }
   0x8   : > { %p107_p4 = por %p106_p2, %p105_p1  ;;  %p112_p5 = scmp.eq.s32.totalorder %s3643_s22, 0 }
   0x9   : > { %p3453_p6 = scmp.lt.s32.totalorder %s3589_s21, 2  ;;  %s197_s28 = sand.u32 1, %s3585_s20  }
   0xa   : > { %p3660_p7 = por %p112_p5, %p111_p3  ;;  %s3444_s29 = smul.u32 576, %s197_s28 }
   0xb   : > { %s3445_s30 = smul.u32 576, %s3589_s21  ;;  %p3666_p8 = pnand %p3453_p6, %p107_p4 }
   0xc   : > { %s201_s10 = scalar_lea.vmem [#allocation3], %s3444_s29  ;;  %p2928_p9 = scmp.ge.s32.totalorder %s3589_s21, 1 }
   0xd   : > { %s206_s9 = scalar_lea.hbm %s5018_s3, %s3445_s30  ;;  %s209_s11 = sshll.u32 %s201_s10, 4  ;;  %s210_s11 = int_to_ptr.vmem [resolvable:$true] %s209_s11 }
   0xe   : > { %s207_s12 = sshll.u32 %s206_s9, 4  ;;  %s198_s13 = scalar_lea.sflag [#allocation4], %s197_s28  ;;  %s208_s12 = int_to_ptr.hbm [resolvable:$true] %s207_s12 }
   0xf   : > { %s3525_s14 = sshra.s32 %s208_s12, 4  ;;  %p3529_p11 = pneg %p3666_p8  ;;  %s3526_s14 = int_to_ptr.hbm [resolvable:$true] %s3525_s14 }
  0x10   : > { %s3527_s15 = scalar_lea.hbm %s3526_s14, 576  ;;  %s3532_s18 = scalar_lea.hbm %s5018_s3, 1152 }
  0x11   : > { %p3528_p10 = scmp.ne.s32.totalorder %s3526_s14, %s3527_s15  ;;  %p3533_p0 = scmp.lt.s32.totalorder %s3526_s14, %s5018_s3 }
  0x12   : > { %p3534_p1 = scmp.lt.s32.totalorder %s3532_s18, %s3527_s15 }
  0x13   : > { %p3530_p12 = pnand %p3529_p11, %p3528_p10 }
  0x14   : > { %p3535_p2 = por %p3534_p1, %p3533_p0 }
  0x15   : > { %p3531_p13 = pneg %p3530_p12 }
  0x17   : > { %p3536_p3 = pnand %p3535_p2, %p3531_p13 }
  0x19   : > { %3539 = shalt.err (!%p3536_p3)
}
  0x1a   : > { %s3591_s28 = smov 64   ;;  %s3592_s29 = smov 4  }
  0x1b   : > { %3452 = dma.hbm_to_vmem [thread:$0]  (!%p3666_p8), %s208_s12, 9216, %s210_s11, %s198_s13, %s3591_s28, %s3591_s28, %s3592_s29  }
  0x1c   : > { %p223_p4 = scmp.lt.s32.totalorder %s3589_s21, 3 }
  0x1e   : > { %p224_p5 = pnand %p2928_p9, %p223_p4 }
  0x1f   : > { %s229_s30 = sand.u32 (!%p224_p5), 1, %s3581_s19  }
  0x20   : > { %227 = sbr.rel (%p224_p5) target bundleno = 1111 (0x457), region = 40  ;;  %s230_s8 = scalar_lea.sflag (!%p224_p5), [#allocation4], %s229_s30 }
  0x21   : > { %s3446_s7 = smul.u32 (!%p224_p5), 576, %s229_s30 }
  0x23   : > { %s3688_s9 = scalar_lea.vmem (!%p224_p5), [#allocation3], %s3446_s7 }
  0x25   : > { %3572 = dma.done.wait (%p3660_p7), %s230_s8, 9216  }
  0x26   : > { %3574 = vsyncadd (%p3660_p7), %s230_s8, 4294958080  ;;  %p265_p6 = scmp.lt.s32.totalorder %s3643_s22, 1  ;;  %p2929_p7 = scmp.ne.s32.totalorder %s3643_s22, 0 }
  0x28   : > { %s3696_s6 = scalar_select %p265_p6, %s3643_s22, 1 }
  0x29   : > { %277 = sbr.rel (%p2929_p7) target bundleno = 282 (0x11a), region = 48 }
  0x2a   : > { %s267_s11 = scalar_lea.vmem %s5016_s1, %s3696_s6  ;;  %s270_s14 = scalar_lea.vmem %s5017_s2, %s3696_s6 }
  0x2b   : > { %s273_s27 = scalar_lea.vmem %s5019_s4, %s3696_s6 }
  0x2e   : > { %v278_v0 = vld [vmem:[%s5015_s0] sm:$0xff]  ;;  %v279_v1 = vld [vmem:[%s5015_s0 + $0x8] sm:$0xff]  ;;  %v280_v2 = vld [vmem:[%s5015_s0 + $0x10] sm:$0xff]  ;;  %v3593_v32 = vmov 0.0  }
  0x2f   : > { %310 = vst [vmem:[%s5020_s5] sm:$0xff] %v278_v0 }
  0x30   : > { %342 = vst [vmem:[#allocation2] sm:$0xff] %v3593_v32 }
  0x31   : > { %343 = vst [vmem:[#allocation2 + $0x8] sm:$0x3] %v3593_v32 }
  0x32   : > { %344 = vst [vmem:[#allocation2 + $0x10] sm:$0xff] %v3593_v32 }
  0x33   : > { %345 = vst [vmem:[#allocation2 + $0x18] sm:$0x3] %v3593_v32 }
  0x34   : > { %346 = vst [vmem:[#allocation2 + $0x20] sm:$0xff] %v3593_v32 }
  0x35   : > { %347 = vst [vmem:[#allocation2 + $0x28] sm:$0x3] %v3593_v32 }
  0x36   : > { %v281_v3 = vld [vmem:[%s5015_s0 + $0x18] sm:$0xff]  ;;  %348 = vst [vmem:[#allocation2 + $0x30] sm:$0xff] %v3593_v32 }
  0x37   : > { %311 = vst [vmem:[%s5020_s5 + $0x8] sm:$0xff] %v279_v1 }
  0x38   : > { %349 = vst [vmem:[#allocation2 + $0x38] sm:$0x3] %v3593_v32 }
  0x39   : > { %350 = vst [vmem:[#allocation2 + $0x40] sm:$0xff] %v3593_v32 }
  0x3a   : > { %351 = vst [vmem:[#allocation2 + $0x48] sm:$0x3] %v3593_v32 }
  0x3b   : > { %352 = vst [vmem:[#allocation2 + $0x50] sm:$0xff] %v3593_v32 }
  0x3c   : > { %353 = vst [vmem:[#allocation2 + $0x58] sm:$0x3] %v3593_v32 }
  0x3d   : > { %354 = vst [vmem:[#allocation2 + $0x60] sm:$0xff] %v3593_v32 }
  0x3e   : > { %v282_v4 = vld [vmem:[%s5015_s0 + $0x20] sm:$0xff]  ;;  %355 = vst [vmem:[#allocation2 + $0x68] sm:$0x3] %v3593_v32 }
  0x3f   : > { %312 = vst [vmem:[%s5020_s5 + $0x10] sm:$0xff] %v280_v2 }
  0x40   : > { %356 = vst [vmem:[#allocation2 + $0x70] sm:$0xff] %v3593_v32 }
  0x41   : > { %357 = vst [vmem:[#allocation2 + $0x78] sm:$0x3] %v3593_v32 }
  0x42   : > { %358 = vst [vmem:[#allocation2 + $0x80] sm:$0xff] %v3593_v32 }
  0x43   : > { %359 = vst [vmem:[#allocation2 + $0x88] sm:$0x3] %v3593_v32 }
  0x44   : > { %360 = vst [vmem:[#allocation2 + $0x90] sm:$0xff] %v3593_v32 }
  0x45   : > { %361 = vst [vmem:[#allocation2 + $0x98] sm:$0x3] %v3593_v32 }
  0x46   : > { %v283_v5 = vld [vmem:[%s5015_s0 + $0x28] sm:$0xff]  ;;  %362 = vst [vmem:[#allocation2 + $0xa0] sm:$0xff] %v3593_v32 }
  0x47   : > { %313 = vst [vmem:[%s5020_s5 + $0x18] sm:$0xff] %v281_v3 }
  0x48   : > { %363 = vst [vmem:[#allocation2 + $0xa8] sm:$0x3] %v3593_v32 }
  0x49   : > { %364 = vst [vmem:[#allocation2 + $0xb0] sm:$0xff] %v3593_v32 }
  0x4a   : > { %365 = vst [vmem:[#allocation2 + $0xb8] sm:$0x3] %v3593_v32 }
  0x4b   : > { %366 = vst [vmem:[#allocation2 + $0xc0] sm:$0xff] %v3593_v32 }
  0x4c   : > { %367 = vst [vmem:[#allocation2 + $0xc8] sm:$0x3] %v3593_v32 }
  0x4d   : > { %368 = vst [vmem:[#allocation2 + $0xd0] sm:$0xff] %v3593_v32 }
  0x4e   : > { %v284_v6 = vld [vmem:[%s5015_s0 + $0x30] sm:$0xff]  ;;  %369 = vst [vmem:[#allocation2 + $0xd8] sm:$0x3] %v3593_v32 }
  0x4f   : > { %314 = vst [vmem:[%s5020_s5 + $0x20] sm:$0xff] %v282_v4 }
  0x50   : > { %370 = vst [vmem:[#allocation2 + $0xe0] sm:$0xff] %v3593_v32 }
  0x51   : > { %371 = vst [vmem:[#allocation2 + $0xe8] sm:$0x3] %v3593_v32 }
  0x52   : > { %372 = vst [vmem:[#allocation2 + $0xf0] sm:$0xff] %v3593_v32 }
  0x53   : > { %373 = vst [vmem:[#allocation2 + $0xf8] sm:$0x3] %v3593_v32 }
  0x54   : > { %374 = vst [vmem:[#allocation2 + $0x100] sm:$0xff] %v3593_v32 }
  0x55   : > { %375 = vst [vmem:[#allocation2 + $0x108] sm:$0x3] %v3593_v32 }
  0x56   : > { %v285_v7 = vld [vmem:[%s5015_s0 + $0x38] sm:$0xff]  ;;  %376 = vst [vmem:[#allocation2 + $0x110] sm:$0xff] %v3593_v32 }
  0x57   : > { %315 = vst [vmem:[%s5020_s5 + $0x28] sm:$0xff] %v283_v5 }
  0x58   : > { %377 = vst [vmem:[#allocation2 + $0x118] sm:$0x3] %v3593_v32 }
  0x59   : > { %378 = vst [vmem:[#allocation2 + $0x120] sm:$0xff] %v3593_v32 }
  0x5a   : > { %379 = vst [vmem:[#allocation2 + $0x128] sm:$0x3] %v3593_v32 }
  0x5b   : > { %380 = vst [vmem:[#allocation2 + $0x130] sm:$0xff] %v3593_v32 }
  0x5c   : > { %381 = vst [vmem:[#allocation2 + $0x138] sm:$0x3] %v3593_v32 }
  0x5d   : > { %382 = vst [vmem:[#allocation2 + $0x140] sm:$0xff] %v3593_v32 }
  0x5e   : > { %v286_v8 = vld [vmem:[%s5015_s0 + $0x40] sm:$0xff]  ;;  %383 = vst [vmem:[#allocation2 + $0x148] sm:$0x3] %v3593_v32 }
  0x5f   : > { %316 = vst [vmem:[%s5020_s5 + $0x30] sm:$0xff] %v284_v6 }
  0x60   : > { %384 = vst [vmem:[#allocation2 + $0x150] sm:$0xff] %v3593_v32 }
  0x61   : > { %385 = vst [vmem:[#allocation2 + $0x158] sm:$0x3] %v3593_v32 }
  0x62   : > { %386 = vst [vmem:[#allocation2 + $0x160] sm:$0xff] %v3593_v32 }
  0x63   : > { %387 = vst [vmem:[#allocation2 + $0x168] sm:$0x3] %v3593_v32 }
  0x64   : > { %388 = vst [vmem:[#allocation2 + $0x170] sm:$0xff] %v3593_v32 }
  0x65   : > { %389 = vst [vmem:[#allocation2 + $0x178] sm:$0x3] %v3593_v32 }
  0x66   : > { %v287_v9 = vld [vmem:[%s5015_s0 + $0x48] sm:$0xff]  ;;  %390 = vst [vmem:[#allocation2 + $0x180] sm:$0xff] %v3593_v32 }
  0x67   : > { %317 = vst [vmem:[%s5020_s5 + $0x38] sm:$0xff] %v285_v7 }
  0x68   : > { %391 = vst [vmem:[#allocation2 + $0x188] sm:$0x3] %v3593_v32 }
  0x69   : > { %392 = vst [vmem:[#allocation2 + $0x190] sm:$0xff] %v3593_v32 }
  0x6a   : > { %393 = vst [vmem:[#allocation2 + $0x198] sm:$0x3] %v3593_v32 }
  0x6b   : > { %394 = vst [vmem:[#allocation2 + $0x1a0] sm:$0xff] %v3593_v32 }
  0x6c   : > { %395 = vst [vmem:[#allocation2 + $0x1a8] sm:$0x3] %v3593_v32 }
  0x6d   : > { %396 = vst [vmem:[#allocation2 + $0x1b0] sm:$0xff] %v3593_v32 }
  0x6e   : > { %v288_v10 = vld [vmem:[%s5015_s0 + $0x50] sm:$0xff]  ;;  %397 = vst [vmem:[#allocation2 + $0x1b8] sm:$0x3] %v3593_v32 }
  0x6f   : > { %318 = vst [vmem:[%s5020_s5 + $0x40] sm:$0xff] %v286_v8 }
  0x70   : > { %398 = vst [vmem:[#allocation2 + $0x1c0] sm:$0xff] %v3593_v32 }
  0x71   : > { %399 = vst [vmem:[#allocation2 + $0x1c8] sm:$0x3] %v3593_v32 }
  0x72   : > { %400 = vst [vmem:[#allocation2 + $0x1d0] sm:$0xff] %v3593_v32 }
  0x73   : > { %401 = vst [vmem:[#allocation2 + $0x1d8] sm:$0x3] %v3593_v32 }
  0x74   : > { %402 = vst [vmem:[#allocation2 + $0x1e0] sm:$0xff] %v3593_v32 }
  0x75   : > { %403 = vst [vmem:[#allocation2 + $0x1e8] sm:$0x3] %v3593_v32 }
  0x76   : > { %v289_v11 = vld [vmem:[%s5015_s0 + $0x58] sm:$0xff]  ;;  %404 = vst [vmem:[#allocation2 + $0x1f0] sm:$0xff] %v3593_v32 }
  0x77   : > { %319 = vst [vmem:[%s5020_s5 + $0x48] sm:$0xff] %v287_v9 }
  0x78   : > { %405 = vst [vmem:[#allocation2 + $0x1f8] sm:$0x3] %v3593_v32 }
  0x79   : > { %406 = vst [vmem:[#allocation2 + $0x200] sm:$0xff] %v3593_v32 }
  0x7a   : > { %407 = vst [vmem:[#allocation2 + $0x208] sm:$0x3] %v3593_v32 }
  0x7b   : > { %408 = vst [vmem:[#allocation2 + $0x210] sm:$0xff] %v3593_v32 }
  0x7c   : > { %409 = vst [vmem:[#allocation2 + $0x218] sm:$0x3] %v3593_v32 }
  0x7d   : > { %410 = vst [vmem:[#allocation2 + $0x220] sm:$0xff] %v3593_v32 }
  0x7e   : > { %v290_v12 = vld [vmem:[%s5015_s0 + $0x60] sm:$0xff]  ;;  %411 = vst [vmem:[#allocation2 + $0x228] sm:$0x3] %v3593_v32 }
  0x7f   : > { %320 = vst [vmem:[%s5020_s5 + $0x50] sm:$0xff] %v288_v10 }
  0x80   : > { %412 = vst [vmem:[#allocation2 + $0x230] sm:$0xff] %v3593_v32 }
  0x81   : > { %413 = vst [vmem:[#allocation2 + $0x238] sm:$0x3] %v3593_v32 }
  0x82   : > { %414 = vst [vmem:[#allocation2 + $0x240] sm:$0xff] %v3593_v32 }
  0x83   : > { %415 = vst [vmem:[#allocation2 + $0x248] sm:$0x3] %v3593_v32 }
  0x84   : > { %416 = vst [vmem:[#allocation2 + $0x250] sm:$0xff] %v3593_v32 }
  0x85   : > { %417 = vst [vmem:[#allocation2 + $0x258] sm:$0x3] %v3593_v32 }
  0x86   : > { %v291_v13 = vld [vmem:[%s5015_s0 + $0x68] sm:$0xff]  ;;  %418 = vst [vmem:[#allocation2 + $0x260] sm:$0xff] %v3593_v32 }
  0x87   : > { %321 = vst [vmem:[%s5020_s5 + $0x58] sm:$0xff] %v289_v11 }
  0x88   : > { %419 = vst [vmem:[#allocation2 + $0x268] sm:$0x3] %v3593_v32 }
  0x89   : > { %420 = vst [vmem:[#allocation2 + $0x270] sm:$0xff] %v3593_v32 }
  0x8a   : > { %421 = vst [vmem:[#allocation2 + $0x278] sm:$0x3] %v3593_v32 }
  0x8e   : > { %v292_v14 = vld [vmem:[%s5015_s0 + $0x70] sm:$0xff] }
  0x8f   : > { %322 = vst [vmem:[%s5020_s5 + $0x60] sm:$0xff] %v290_v12 }
  0x96   : > { %v293_v15 = vld [vmem:[%s5015_s0 + $0x78] sm:$0xff] }
  0x97   : > { %323 = vst [vmem:[%s5020_s5 + $0x68] sm:$0xff] %v291_v13 }
  0x9e   : > { %v294_v16 = vld [vmem:[%s5015_s0 + $0x80] sm:$0xff] }
  0x9f   : > { %324 = vst [vmem:[%s5020_s5 + $0x70] sm:$0xff] %v292_v14 }
  0xa6   : > { %v295_v17 = vld [vmem:[%s5015_s0 + $0x88] sm:$0xff] }
  0xa7   : > { %325 = vst [vmem:[%s5020_s5 + $0x78] sm:$0xff] %v293_v15 }
  0xae   : > { %v296_v18 = vld [vmem:[%s5015_s0 + $0x90] sm:$0xff] }
  0xaf   : > { %326 = vst [vmem:[%s5020_s5 + $0x80] sm:$0xff] %v294_v16 }
  0xb6   : > { %v297_v19 = vld [vmem:[%s5015_s0 + $0x98] sm:$0xff] }
  0xb7   : > { %327 = vst [vmem:[%s5020_s5 + $0x88] sm:$0xff] %v295_v17 }
  0xbe   : > { %v298_v20 = vld [vmem:[%s5015_s0 + $0xa0] sm:$0xff] }
  0xbf   : > { %328 = vst [vmem:[%s5020_s5 + $0x90] sm:$0xff] %v296_v18 }
  0xc6   : > { %v299_v21 = vld [vmem:[%s5015_s0 + $0xa8] sm:$0xff] }
  0xc7   : > { %329 = vst [vmem:[%s5020_s5 + $0x98] sm:$0xff] %v297_v19 }
  0xce   : > { %v300_v22 = vld [vmem:[%s5015_s0 + $0xb0] sm:$0xff] }
  0xcf   : > { %330 = vst [vmem:[%s5020_s5 + $0xa0] sm:$0xff] %v298_v20 }
  0xd6   : > { %v301_v23 = vld [vmem:[%s5015_s0 + $0xb8] sm:$0xff] }
  0xd7   : > { %331 = vst [vmem:[%s5020_s5 + $0xa8] sm:$0xff] %v299_v21 }
  0xde   : > { %v302_v24 = vld [vmem:[%s5015_s0 + $0xc0] sm:$0xff] }
  0xdf   : > { %332 = vst [vmem:[%s5020_s5 + $0xb0] sm:$0xff] %v300_v22 }
  0xe6   : > { %v303_v25 = vld [vmem:[%s5015_s0 + $0xc8] sm:$0xff] }
  0xe7   : > { %333 = vst [vmem:[%s5020_s5 + $0xb8] sm:$0xff] %v301_v23 }
  0xee   : > { %v304_v26 = vld [vmem:[%s5015_s0 + $0xd0] sm:$0xff] }
  0xef   : > { %334 = vst [vmem:[%s5020_s5 + $0xc0] sm:$0xff] %v302_v24 }
  0xf6   : > { %v305_v27 = vld [vmem:[%s5015_s0 + $0xd8] sm:$0xff] }
  0xf7   : > { %335 = vst [vmem:[%s5020_s5 + $0xc8] sm:$0xff] %v303_v25 }
  0xfe   : > { %v306_v28 = vld [vmem:[%s5015_s0 + $0xe0] sm:$0xff] }
  0xff   : > { %336 = vst [vmem:[%s5020_s5 + $0xd0] sm:$0xff] %v304_v26 }
 0x106   : > { %v307_v29 = vld [vmem:[%s5015_s0 + $0xe8] sm:$0xff] }
 0x107   : > { %337 = vst [vmem:[%s5020_s5 + $0xd8] sm:$0xff] %v305_v27 }
 0x10e   : > { %v308_v30 = vld [vmem:[%s5015_s0 + $0xf0] sm:$0xff] }
 0x10f   : > { %338 = vst [vmem:[%s5020_s5 + $0xe0] sm:$0xff] %v306_v28 }
 0x116   : > { %v309_v31 = vld [vmem:[%s5015_s0 + $0xf8] sm:$0xff] }
 0x117   : > { %339 = vst [vmem:[%s5020_s5 + $0xe8] sm:$0xff] %v307_v29 }
 0x118   : > { %340 = vst [vmem:[%s5020_s5 + $0xf0] sm:$0xff] %v308_v30 }
 0x119   : > { %341 = vst [vmem:[%s5020_s5 + $0xf8] sm:$0xff] %v309_v31 }
 0x11a PF: > { %v3363_v33 = vld [vmem:[%s3688_s9 + $0x78] sm:$0xff]  ;;  %v3362_v34 = vld [vmem:[%s3688_s9 + $0x70] sm:$0xff]  ;;  %v3988_v35 = vld [vmem:[%s5020_s5] sm:$0xff] }
 0x11b   : > { %3420 = vmatpush.bf16.msra.mxu1 %v3363_v33  ;;  %3421 = vmatpush.bf16.msra.mxu2 %v3363_v33  ;;  %v3993_v36 = vld [vmem:[%s5020_s5 + $0x8] sm:$0xff]  ;;  %v3998_v37 = vld [vmem:[%s5020_s5 + $0x10] sm:$0xff]  ;;  %v4005_v39 = vld [vmem:[%s5020_s5 + $0x18] sm:$0xff]  ;;  %v491_v43 = vmul.f32 %v3988_v35, %v3988_v35 }
 0x11c   : > { %3422 = vmatpush.bf16.msra.mxu3 %v3363_v33  ;;  %893 = vmatpush.bf16.msra.mxu0 %v3363_v33  ;;  %v454_v38 = vadd.f32 %v3993_v36, %v3988_v35  ;;  %v3361_v40 = vld [vmem:[%s3688_s9 + $0x68] sm:$0xff]  ;;  %v4012_v42 = vld [vmem:[%s5020_s5 + $0x20] sm:$0xff]  ;;  %v492_v44 = vmul.f32 %v3993_v36, %v3993_v36  ;;  %v493_v47 = vmul.f32 %v3998_v37, %v3998_v37  ;;  %v4031_v50 = vld [vmem:[%s5020_s5 + $0x30] sm:$0xff] }
 0x11d   : > { %v4022_v46 = vld [vmem:[%s5020_s5 + $0x28] sm:$0xff]  ;;  %v3360_v48 = vld [vmem:[%s3688_s9 + $0x60] sm:$0xff]  ;;  %v494_v51 = vmul.f32 %v4005_v39, %v4005_v39  ;;  %v4039_v54 = vld [vmem:[%s5020_s5 + $0x38] sm:$0xff]  ;;  %v495_v55 = vmul.f32 %v4012_v42, %v4012_v42  ;;  %v497_v0 = vmul.f32 %v4031_v50, %v4031_v50 }
 0x11e   : > { %v455_v41 = vadd.f32 %v454_v38, %v3998_v37  ;;  %v523_v52 = vadd.f32 %v492_v44, %v491_v43  ;;  %v3359_v57 = vld [vmem:[%s3688_s9 + $0x58] sm:$0xff]  ;;  %v4048_v59 = vld [vmem:[%s5020_s5 + $0x40] sm:$0xff]  ;;  %v496_v60 = vmul.f32 %v4022_v46, %v4022_v46  ;;  %v4056_v63 = vld [vmem:[%s5020_s5 + $0x48] sm:$0xff]  ;;  %v498_v5 = vmul.f32 %v4039_v54, %v4039_v54 }
 0x11f   : > { %3423 = vmatpush.bf16.msra.mxu1 %v3362_v34  ;;  %3424 = vmatpush.bf16.msra.mxu2 %v3362_v34  ;;  %v3358_v2 = vld [vmem:[%s3688_s9 + $0x50] sm:$0xff]  ;;  %v4073_v8 = vld [vmem:[%s5020_s5 + $0x58] sm:$0xff]  ;;  %v499_v9 = vmul.f32 %v4048_v59, %v4048_v59  ;;  %v3357_v11 = vld [vmem:[%s3688_s9 + $0x48] sm:$0xff]  ;;  %v500_v14 = vmul.f32 %v4056_v63, %v4056_v63 }
 0x120   : > { %3425 = vmatpush.bf16.msra.mxu3 %v3362_v34  ;;  %894 = vmatpush.bf16.msra.mxu0 %v3362_v34  ;;  %v456_v45 = vadd.f32 %v455_v41, %v4005_v39  ;;  %v524_v56 = vadd.f32 %v523_v52, %v493_v47  ;;  %v4065_v4 = vld [vmem:[%s5020_s5 + $0x50] sm:$0xff]  ;;  %v4082_v13 = vld [vmem:[%s5020_s5 + $0x60] sm:$0xff]  ;;  %v4090_v17 = vld [vmem:[%s5020_s5 + $0x68] sm:$0xff]  ;;  %v502_v23 = vmul.f32 %v4073_v8, %v4073_v8 }
 0x121   : > { %v501_v18 = vmul.f32 %v4065_v4, %v4065_v4  ;;  %v3356_v20 = vld [vmem:[%s3688_s9 + $0x40] sm:$0xff]  ;;  %v4099_v22 = vld [vmem:[%s5020_s5 + $0x70] sm:$0xff]  ;;  %v4107_v26 = vld [vmem:[%s5020_s5 + $0x78] sm:$0xff]  ;;  %v503_v27 = vmul.f32 %v4082_v13, %v4082_v13  ;;  %v504_v31 = vmul.f32 %v4090_v17, %v4090_v17 }
 0x122   : > { %v457_v49 = vadd.f32 %v456_v45, %v4012_v42  ;;  %v525_v61 = vadd.f32 %v524_v56, %v494_v51  ;;  %v4115_v30 = vld [vmem:[%s5020_s5 + $0x80] sm:$0xff]  ;;  %v4123_v34 = vld [vmem:[%s5020_s5 + $0x88] sm:$0xff]  ;;  %v505_v38 = vmul.f32 %v4099_v22, %v4099_v22  ;;  %v4131_v43 = vld [vmem:[%s5020_s5 + $0x90] sm:$0xff]  ;;  %v506_v44 = vmul.f32 %v4107_v26, %v4107_v26 }
 0x123   : > { %3426 = vmatpush.bf16.msra.mxu1 %v3361_v40  ;;  %3427 = vmatpush.bf16.msra.mxu2 %v3361_v40 }
 0x124   : > { %3428 = vmatpush.bf16.msra.mxu3 %v3361_v40  ;;  %895 = vmatpush.bf16.msra.mxu0 %v3361_v40  ;;  %v458_v53 = vadd.f32 %v457_v49, %v4022_v46  ;;  %v526_v1 = vadd.f32 %v525_v61, %v495_v55  ;;  %v507_v49 = vmul.f32 %v4115_v30, %v4115_v30 }
 0x125   : > { %v508_v55 = vmul.f32 %v4123_v34, %v4123_v34 }
 0x126   : > { %v459_v58 = vadd.f32 %v458_v53, %v4031_v50  ;;  %v527_v6 = vadd.f32 %v526_v1, %v496_v60  ;;  %v4147_v53 = vld [vmem:[%s5020_s5 + $0xa0] sm:$0xff]  ;;  %v509_v60 = vmul.f32 %v4131_v43, %v4131_v43 }
 0x127   : > { %3429 = vmatpush.bf16.msra.mxu1 %v3360_v48  ;;  %3430 = vmatpush.bf16.msra.mxu2 %v3360_v48 }
 0x128   : > { %3431 = vmatpush.bf16.msra.mxu3 %v3360_v48  ;;  %896 = vmatpush.bf16.msra.mxu0 %v3360_v48  ;;  %v460_v62 = vadd.f32 %v459_v58, %v4039_v54  ;;  %v528_v10 = vadd.f32 %v527_v6, %v497_v0  ;;  %v4139_v48 = vld [vmem:[%s5020_s5 + $0x98] sm:$0xff]  ;;  %v4155_v58 = vld [vmem:[%s5020_s5 + $0xa8] sm:$0xff]  ;;  %v4163_v0 = vld [vmem:[%s5020_s5 + $0xb0] sm:$0xff]  ;;  %v511_v6 = vmul.f32 %v4147_v53, %v4147_v53 }
 0x129   : > { %v510_v1 = vmul.f32 %v4139_v48, %v4139_v48 }
 0x12a   : > { %v461_v3 = vadd.f32 %v460_v62, %v4048_v59  ;;  %v529_v15 = vadd.f32 %v528_v10, %v498_v5  ;;  %v4171_v5 = vld [vmem:[%s5020_s5 + $0xb8] sm:$0xff]  ;;  %v4179_v10 = vld [vmem:[%s5020_s5 + $0xc0] sm:$0xff] }
 0x12b   : > { %3432 = vmatpush.bf16.msra.mxu1 %v3359_v57  ;;  %3433 = vmatpush.bf16.msra.mxu2 %v3359_v57 }
 0x12c   : > { %3434 = vmatpush.bf16.msra.mxu3 %v3359_v57  ;;  %897 = vmatpush.bf16.msra.mxu0 %v3359_v57  ;;  %v462_v7 = vadd.f32 %v461_v3, %v4056_v63  ;;  %v530_v19 = vadd.f32 %v529_v15, %v499_v9  ;;  %v4187_v15 = vld [vmem:[%s5020_s5 + $0xc8] sm:$0xff] }
 0x12e   : > { %v463_v12 = vadd.f32 %v462_v7, %v4065_v4  ;;  %v531_v24 = vadd.f32 %v530_v19, %v500_v14 }
 0x12f   : > { %3435 = vmatpush.bf16.msra.mxu1 %v3358_v2  ;;  %3436 = vmatpush.bf16.msra.mxu2 %v3358_v2 }
 0x130   : > { %3437 = vmatpush.bf16.msra.mxu3 %v3358_v2  ;;  %898 = vmatpush.bf16.msra.mxu0 %v3358_v2  ;;  %v464_v16 = vadd.f32 %v463_v12, %v4073_v8  ;;  %v532_v28 = vadd.f32 %v531_v24, %v501_v18 }
 0x132   : > { %v465_v21 = vadd.f32 %v464_v16, %v4082_v13  ;;  %v533_v32 = vadd.f32 %v532_v28, %v502_v23  ;;  %v513_v16 = vmul.f32 %v4163_v0, %v4163_v0 }
 0x133   : > { %3438 = vmatpush.bf16.msra.mxu1 %v3357_v11  ;;  %3439 = vmatpush.bf16.msra.mxu2 %v3357_v11 }
 0x134   : > { %3440 = vmatpush.bf16.msra.mxu3 %v3357_v11  ;;  %899 = vmatpush.bf16.msra.mxu0 %v3357_v11  ;;  %v466_v25 = vadd.f32 %v465_v21, %v4090_v17  ;;  %v534_v40 = vadd.f32 %v533_v32, %v503_v27  ;;  %v512_v11 = vmul.f32 %v4155_v58, %v4155_v58 }
 0x135   : > { %v514_v21 = vmul.f32 %v4171_v5, %v4171_v5  ;;  %v515_v27 = vmul.f32 %v4179_v10, %v4179_v10  ;;  %v516_v32 = vmul.f32 %v4187_v15, %v4187_v15 }
 0x136   : > { %v467_v29 = vadd.f32 %v466_v25, %v4099_v22  ;;  %v535_v45 = vadd.f32 %v534_v40, %v504_v31  ;;  %v4203_v25 = vld [vmem:[%s5020_s5 + $0xd8] sm:$0xff]  ;;  %v4211_v31 = vld [vmem:[%s5020_s5 + $0xe0] sm:$0xff]  ;;  %v4219_v40 = vld [vmem:[%s5020_s5 + $0xe8] sm:$0xff] }
 0x137   : > { %3441 = vmatpush.bf16.msra.mxu1 %v3356_v20  ;;  %3442 = vmatpush.bf16.msra.mxu2 %v3356_v20 }
 0x138   : > { %3443 = vmatpush.bf16.msra.mxu3 %v3356_v20  ;;  %900 = vmatpush.bf16.msra.mxu0 %v3356_v20  ;;  %v468_v33 = vadd.f32 %v467_v29, %v4107_v26  ;;  %v536_v51 = vadd.f32 %v535_v45, %v505_v38  ;;  %v4195_v20 = vld [vmem:[%s5020_s5 + $0xd0] sm:$0xff] }
 0x13a   : > { %v469_v41 = vadd.f32 %v468_v33, %v4115_v30  ;;  %v537_v56 = vadd.f32 %v536_v51, %v506_v44 }
 0x13c   : > { %v470_v47 = vadd.f32 %v469_v41, %v4123_v34  ;;  %v538_v61 = vadd.f32 %v537_v56, %v507_v49  ;;  %v517_v41 = vmul.f32 %v4195_v20, %v4195_v20  ;;  %v518_v49 = vmul.f32 %v4203_v25, %v4203_v25 }
 0x13d   : > { %v519_v56 = vmul.f32 %v4211_v31, %v4211_v31 }
 0x13e   : > { %v471_v52 = vadd.f32 %v470_v47, %v4131_v43  ;;  %v539_v2 = vadd.f32 %v538_v61, %v508_v55  ;;  %v4227_v47 = vld [vmem:[%s5020_s5 + $0xf0] sm:$0xff]  ;;  %v453_v55 = vld [vmem:[%s5020_s5 + $0xf8] sm:$0xff]  ;;  %v520_v61 = vmul.f32 %v4219_v40, %v4219_v40 }
 0x140   : > { %v472_v57 = vadd.f32 %v471_v52, %v4139_v48  ;;  %v540_v7 = vadd.f32 %v539_v2, %v509_v60  ;;  %v521_v2 = vmul.f32 %v4227_v47, %v4227_v47 }
 0x142   : > { %v473_v62 = vadd.f32 %v472_v57, %v4147_v53  ;;  %v541_v12 = vadd.f32 %v540_v7, %v510_v1  ;;  %v522_v7 = vmul.f32 %v453_v55, %v453_v55 }
 0x144   : > { %v474_v3 = vadd.f32 %v473_v62, %v4155_v58  ;;  %v542_v18 = vadd.f32 %v541_v12, %v511_v6 }
 0x146   : > { %v475_v9 = vadd.f32 %v474_v3, %v4163_v0  ;;  %v543_v23 = vadd.f32 %v542_v18, %v512_v11 }
 0x148   : > { %v476_v14 = vadd.f32 %v475_v9, %v4171_v5  ;;  %v544_v28 = vadd.f32 %v543_v23, %v513_v16 }
 0x14a   : > { %v477_v19 = vadd.f32 %v476_v14, %v4179_v10  ;;  %v545_v33 = vadd.f32 %v544_v28, %v514_v21 }
 0x14c   : > { %v478_v24 = vadd.f32 %v477_v19, %v4187_v15  ;;  %v546_v44 = vadd.f32 %v545_v33, %v515_v27 }
 0x14e   : > { %v479_v29 = vadd.f32 %v478_v24, %v4195_v20  ;;  %v547_v51 = vadd.f32 %v546_v44, %v516_v32 }
 0x150   : > { %v480_v38 = vadd.f32 %v479_v29, %v4203_v25  ;;  %v548_v57 = vadd.f32 %v547_v51, %v517_v41  ;;  %v3371_v51 = vld [vmem:[%s3688_s9 + $0xb8] sm:$0xff] }
 0x151   : > { %1232 = vmatpush.bf16.msrb.mxu2 %v3371_v51 }
 0x152   : > { %v481_v45 = vadd.f32 %v480_v38, %v4211_v31  ;;  %v549_v62 = vadd.f32 %v548_v57, %v518_v49  ;;  %v3370_v57 = vld [vmem:[%s3688_s9 + $0xb0] sm:$0xff] }
 0x154   : > { %v482_v52 = vadd.f32 %v481_v45, %v4219_v40  ;;  %v550_v3 = vadd.f32 %v549_v62, %v519_v56  ;;  %v3387_v56 = vld [vmem:[%s3688_s9 + $0x138] sm:$0xff] }
 0x155   : > { %1700 = vmatpush.bf16.msrb.mxu0 %v3387_v56  ;;  %1233 = vmatpush.bf16.msrb.mxu2 %v3370_v57  ;;  %v796_v56 = vld [vmem:[#allocation2 + $0x141] sm:$0xff] }
 0x156   : > { %v483_v60 = vadd.f32 %v482_v52, %v4227_v47  ;;  %v551_v9 = vadd.f32 %v550_v3, %v520_v61  ;;  %v3379_v52 = vld [vmem:[%s3688_s9 + $0xf8] sm:$0xff]  ;;  %v3354_v61 = vld [vmem:[%s3688_s9 + $0x30] sm:$0xff]  ;;  %v804_v57 = vld [vmem:[#allocation2 + $0x1e1] sm:$0xff] }
 0x157   : > { %1466 = vmatpush.bf16.msrb.mxu3 %v3379_v52  ;;  %v788_v52 = vld [vmem:[#allocation2 + $0xa1] sm:$0xff] }
 0x158   : > { %v484_v1 = vadd.f32 %v483_v60, %v453_v55  ;;  %v552_v12 = vadd.f32 %v551_v9, %v521_v2  ;;  %v3355_v55 = vld [vmem:[%s3688_s9 + $0x38] sm:$0xff]  ;;  %v3378_v60 = vld [vmem:[%s3688_s9 + $0xf0] sm:$0xff] }
 0x159   : > { %1030 = vmatpush.bf16.msrb.mxu1 %v3355_v55 }
 0x15a   : > { %v485_v6 = vrot.slane %v484_v1, 4  ;;  %v553_v16 = vadd.f32 %v552_v12, %v522_v7  ;;  %v565_v7 = vld [vmem:[%s267_s11] sm:$0x1]  ;;  %v3369_v12 = vld [vmem:[%s3688_s9 + $0xa8] sm:$0xff] }
 0x15b   : > { %1467 = vmatpush.bf16.msrb.mxu3 %v3378_v60  ;;  %1234 = vmatpush.bf16.msrb.mxu2 %v3369_v12  ;;  %v780_v60 = vld [vmem:[#allocation2 + $0x1] sm:$0xff] }
 0x15c   : > { %v486_v11 = vadd.f32 %v485_v6, %v484_v1  ;;  %v554_v19 = vrot.slane %v553_v16, 4 }
 0x15d   : > { %1031 = vmatpush.bf16.msrb.mxu1 %v3354_v61 }
 0x15e   : > { %v487_v14 = vrot.slane %v486_v11, 2  ;;  %v555_v23 = vadd.f32 %v554_v19, %v553_v16  ;;  %v3386_v16 = vld [vmem:[%s3688_s9 + $0x130] sm:$0xff]  ;;  %v3353_v19 = vld [vmem:[%s3688_s9 + $0x28] sm:$0xff] }
 0x15f   : > { %1701 = vmatpush.bf16.msrb.mxu0 %v3386_v16 }
 0x160   : > { %v488_v18 = vadd.f32 %v487_v14, %v486_v11  ;;  %v556_v27 = vrot.slane %v555_v23, 2  ;;  %v3377_v14 = vld [vmem:[%s3688_s9 + $0xe8] sm:$0xff] }
 0x161   : > { %1468 = vmatpush.bf16.msrb.mxu3 %v3377_v14  ;;  %1032 = vmatpush.bf16.msrb.mxu1 %v3353_v19 }
 0x162   : > { %v489_v21 = vrot.slane %v488_v18, 1  ;;  %v557_v28 = vadd.f32 %v556_v27, %v555_v23  ;;  %v3368_v23 = vld [vmem:[%s3688_s9 + $0xa0] sm:$0xff] }
 0x163   : > { %1235 = vmatpush.bf16.msrb.mxu2 %v3368_v23 }
 0x164   : > { %v490_v24 = vadd.f32 %v489_v21, %v488_v18  ;;  %v558_v32 = vrot.slane %v557_v28, 1  ;;  %v578_v21 = vld [vmem:[%s270_s14] sm:$0x1] }
 0x166   : > { %v560_v29 = vmul.f32 0.00390625, %v490_v24  ;;  %v559_v33 = vadd.f32 %v558_v32, %v557_v28  ;;  %v3376_v28 = vld [vmem:[%s3688_s9 + $0xe0] sm:$0xff]  ;;  %v3385_v32 = vld [vmem:[%s3688_s9 + $0x128] sm:$0xff] }
 0x167   : > { %1469 = vmatpush.bf16.msrb.mxu3 %v3376_v28  ;;  %1702 = vmatpush.bf16.msrb.mxu0 %v3385_v32  ;;  %v3375_v28 = vld [vmem:[%s3688_s9 + $0xd8] sm:$0xff] }
 0x168   : > { %v562_v38 = vmul.f32 %v560_v29, %v560_v29  ;;  %v561_v41 = vmul.f32 0.00390625, %v559_v33  ;;  %v3352_v33 = vld [vmem:[%s3688_s9 + $0x20] sm:$0xff] }
 0x169   : > { %1033 = vmatpush.bf16.msrb.mxu1 %v3352_v33 }
 0x16a   : > { %v563_v44 = vsub.f32 %v561_v41, %v562_v38 }
 0x16b   : > { %1470 = vmatpush.bf16.msrb.mxu3 %v3375_v28 }
 0x16c   : > { %v564_v45 = vmax.f32 %v563_v44, 0.0 }
 0x16e   : > { %v566_v49 = vadd.f32 1e-05, %v564_v45 }
 0x170   : > { %3490 = vrsqrt.f32 %v566_v49  ;;  %vm573_vm0 = vweird.f32 %v566_v49 }
 0x176   : > { %v3491_v62 = vpop.eup %3490 }
 0x177   : > { %v568_v1 = vmul.f32 %v3491_v62, %v566_v49  ;;  %vm574_vm1 = vweird.f32 %v3491_v62 }
 0x178   : > { %vm575_vm2 = vmor %vm573_vm0, %vm574_vm1 }
 0x179   : > { %v569_v2 = vmul.f32 %v3491_v62, %v568_v1 }
 0x17b   : > { %v570_v3 = vmul.f32 0.5, %v569_v2 }
 0x17d   : > { %v571_v6 = vsub.f32 1.5, %v570_v3 }
 0x17f   : > { %v572_v9 = vmul.f32 %v3491_v62, %v571_v6 }
 0x181   : > { %v576_v11 = vsel %vm575_vm2, %v3491_v62, %v572_v9 }
 0x182   : > { %v577_v18 = vmul.f32 %v576_v11, %v565_v7 }
 0x184   : > { %v579_v24 = vmul.f32 %v577_v18, %v560_v29  ;;  %v4264_v27 = vperm.slane %v577_v18, 0 }
 0x186   : > { %v580_v38 = vsub.f32 %v578_v21, %v579_v24  ;;  %v592_v41 = vmul.f32 %v4264_v27, %v4048_v59  ;;  %v600_v44 = vmul.f32 %v4264_v27, %v4115_v30  ;;  %v608_v45 = vmul.f32 %v4264_v27, %v4179_v10  ;;  %v3367_v24 = vld [vmem:[%s3688_s9 + $0x98] sm:$0xff] }
 0x187   : > { %v584_v29 = vmul.f32 %v4264_v27, %v3988_v35  ;;  %v593_v49 = vmul.f32 %v4264_v27, %v4056_v63  ;;  %v594_v59 = vmul.f32 %v4264_v27, %v4065_v4  ;;  %v601_v30 = vmul.f32 %v4264_v27, %v4123_v34  ;;  %1236 = vmatpush.bf16.msrb.mxu2 %v3367_v24 }
 0x188   : > { %v4279_v51 = vperm.slane %v580_v38, 0  ;;  %v602_v4 = vmul.f32 %v4264_v27, %v4131_v43  ;;  %v609_v34 = vmul.f32 %v4264_v27, %v4187_v15  ;;  %v610_v9 = vmul.f32 %v4264_v27, %v4195_v20  ;;  %v3384_v38 = vld [vmem:[%s3688_s9 + $0x120] sm:$0xff] }
 0x189   : > { %v585_v11 = vmul.f32 %v4264_v27, %v3993_v36  ;;  %v586_v20 = vmul.f32 %v4264_v27, %v3998_v37  ;;  %v595_v19 = vmul.f32 %v4264_v27, %v4073_v8  ;;  %v596_v23 = vmul.f32 %v4264_v27, %v4082_v13  ;;  %1703 = vmatpush.bf16.msrb.mxu0 %v3384_v38  ;;  %v3373_v38 = vld [vmem:[%s3688_s9 + $0xc8] sm:$0xff] }
 0x18a   : > { %v627_v10 = vadd.f32 %v4279_v51, %v592_v41  ;;  %v635_v35 = vadd.f32 %v4279_v51, %v600_v44  ;;  %v643_v55 = vadd.f32 %v4279_v51, %v608_v45  ;;  %v619_v63 = vadd.f32 %v4279_v51, %v584_v29  ;;  %v3351_v41 = vld [vmem:[%s3688_s9 + $0x18] sm:$0xff]  ;;  %v3366_v29 = vld [vmem:[%s3688_s9 + $0x90] sm:$0xff] }
 0x18b   : > { %v628_v61 = vadd.f32 %v4279_v51, %v593_v49  ;;  %v629_v6 = vadd.f32 %v4279_v51, %v594_v59  ;;  %v636_v7 = vadd.f32 %v4279_v51, %v601_v30  ;;  %v4308_v16 = vadd.f32 %v4279_v51, %v602_v4  ;;  %1034 = vmatpush.bf16.msrb.mxu1 %v3351_v41  ;;  %v3382_v41 = vld [vmem:[%s3688_s9 + $0x110] sm:$0xff] }
 0x18c   : > { %v4294_v62 = vmax.f32 %v627_v10, 0.0  ;;  %v667_v1 = vmax.f32 %v635_v35, 0.0  ;;  %v675_v2 = vmax.f32 %v643_v55, 0.0  ;;  %v4296_v3 = vmax.f32 %v619_v63, 0.0  ;;  %1237 = vmatpush.bf16.msrb.mxu2 %v3366_v29 }
 0x18d   : > { %v4312_v36 = vmax.f32 %v628_v61, 0.0  ;;  %v4315_v18 = vadd.f32 %v4279_v51, %v609_v34  ;;  %v4320_v21 = vmax.f32 %v629_v6, 0.0  ;;  %v645_v37 = vadd.f32 %v4279_v51, %v610_v9 }
 0x18e   : > { %692 = vst [vmem:[#allocation2 + $0xb1] sm:$0xff] %v4294_v62  ;;  %v816_v43 = vpack.c.bf16 %v4294_v62, %v788_v52  ;;  %v820_v15 = vpack.c.bf16 %v667_v1, %v796_v56  ;;  %v824_v12 = vpack.c.bf16 %v675_v2, %v804_v57  ;;  %v812_v14 = vpack.c.bf16 %v4296_v3, %v780_v60  ;;  %v3374_v52 = vld [vmem:[%s3688_s9 + $0xd0] sm:$0xff] }
 0x18f   : > { %700 = vst [vmem:[#allocation2 + $0x151] sm:$0xff] %v667_v1  ;;  %v4328_v32 = vmax.f32 %v636_v7, 0.0  ;;  %v620_v8 = vadd.f32 %v4279_v51, %v585_v11  ;;  %v603_v33 = vmul.f32 %v4264_v27, %v4139_v48  ;;  %v669_v44 = vmax.f32 %v4308_v16, 0.0  ;;  %v3350_v56 = vld [vmem:[%s3688_s9 + $0x10] sm:$0xff]  ;;  %1471 = vmatpush.bf16.msrb.mxu3 %v3374_v52 }
 0x190   : > { %921 = vmatmul.bf16.vlgmr.msra.gmra.mxu1 %v816_v43  ;;  %941 = vmatmul.bf16.vlgmr.msra.gmra.mxu2 %v820_v15  ;;  %708 = vst [vmem:[#allocation2 + $0x1f1] sm:$0xff] %v675_v2  ;;  %v621_v13 = vadd.f32 %v4279_v51, %v586_v20  ;;  %v604_v45 = vmul.f32 %v4264_v27, %v4147_v53  ;;  %v676_v49 = vmax.f32 %v4315_v18, 0.0  ;;  %v677_v30 = vmax.f32 %v645_v37, 0.0 }
 0x191   : > { %961 = vmatmul.bf16.vlgmr.msra.gmra.mxu3 %v824_v12  ;;  %684 = vst [vmem:[#allocation2 + $0x11] sm:$0xff] %v4296_v3  ;;  %901 = vmatmul.bf16.vlgmr.msra.gmra.mxu0 %v812_v14  ;;  %v630_v48 = vadd.f32 %v4279_v51, %v595_v19  ;;  %v611_v59 = vmul.f32 %v4264_v27, %v4203_v25  ;;  %v4350_v35 = vmax.f32 %v620_v8, 0.0  ;;  %v3383_v25 = vld [vmem:[%s3688_s9 + $0x118] sm:$0xff] }
 0x192   : > { %693 = vst [vmem:[#allocation2 + $0xc1] sm:$0xff] %v4312_v36  ;;  %v631_v10 = vadd.f32 %v4279_v51, %v596_v23  ;;  %v612_v53 = vmul.f32 %v4264_v27, %v4211_v31  ;;  %v638_v55 = vadd.f32 %v4279_v51, %v603_v33  ;;  %v587_v63 = vmul.f32 %v4264_v27, %v4005_v39 }
 0x193   : > { %694 = vst [vmem:[#allocation2 + $0xd1] sm:$0xff] %v4320_v21  ;;  %v4357_v57 = vmax.f32 %v621_v13, 0.0  ;;  %v639_v60 = vadd.f32 %v4279_v51, %v604_v45  ;;  %v588_v31 = vmul.f32 %v4264_v27, %v4012_v42  ;;  %v4363_v61 = vmax.f32 %v630_v48, 0.0  ;;  %1704 = vmatpush.bf16.msrb.mxu0 %v3383_v25  ;;  %1035 = vmatpush.bf16.msrb.mxu1 %v3350_v56  ;;  %v3349_v45 = vld [vmem:[%s3688_s9 + $0x8] sm:$0xff]  ;;  %v3364_v48 = vld [vmem:[%s3688_s9 + $0x80] sm:$0xff] }
 0x194   : > { %701 = vst [vmem:[#allocation2 + $0x161] sm:$0xff] %v4328_v32  ;;  %v4366_v4 = vadd.f32 %v4279_v51, %v611_v59  ;;  %v597_v39 = vmul.f32 %v4264_v27, %v4090_v17  ;;  %v817_v34 = vpack.c.bf16 %v4320_v21, %v4312_v36  ;;  %v4373_v1 = vmax.f32 %v631_v10, 0.0  ;;  %1472 = vmatpush.bf16.msrb.mxu3 %v3373_v38  ;;  %v3372_v59 = vld [vmem:[%s3688_s9 + $0xc0] sm:$0xff]  ;;  %v3381_v10 = vld [vmem:[%s3688_s9 + $0x108] sm:$0xff] }
 0x195   : > { %702 = vst [vmem:[#allocation2 + $0x171] sm:$0xff] %v669_v44  ;;  %v4376_v42 = vadd.f32 %v4279_v51, %v612_v53  ;;  %v598_v2 = vmul.f32 %v4264_v27, %v4099_v22  ;;  %v4381_v6 = vmax.f32 %v638_v55, 0.0  ;;  %v622_v17 = vadd.f32 %v4279_v51, %v587_v63  ;;  %v3348_v53 = vld [vmem:[%s3688_s9] sm:$0xff] }
 0x196   : > { %709 = vst [vmem:[#allocation2 + $0x201] sm:$0xff] %v676_v49  ;;  %v605_v7 = vmul.f32 %v4264_v27, %v4155_v58  ;;  %v821_v9 = vpack.c.bf16 %v669_v44, %v4328_v32  ;;  %v4388_v11 = vmax.f32 %v639_v60, 0.0  ;;  %v623_v43 = vadd.f32 %v4279_v51, %v588_v31  ;;  %v3380_v25 = vld [vmem:[%s3688_s9 + $0x100] sm:$0xff] }
 0x197   : > { %710 = vst [vmem:[#allocation2 + $0x211] sm:$0xff] %v677_v30  ;;  %v606_v22 = vmul.f32 %v4264_v27, %v4163_v0  ;;  %v825_v15 = vpack.c.bf16 %v677_v30, %v676_v49  ;;  %v678_v12 = vmax.f32 %v4366_v4, 0.0  ;;  %v632_v14 = vadd.f32 %v4279_v51, %v597_v39  ;;  %1705 = vmatpush.bf16.msrb.mxu0 %v3382_v41  ;;  %v3403_v39 = vld [vmem:[%s3688_s9 + $0x1b8] sm:$0xff] }
 0x198   : > { %685 = vst [vmem:[#allocation2 + $0x21] sm:$0xff] %v4350_v35  ;;  %v613_v58 = vmul.f32 %v4264_v27, %v4219_v40  ;;  %v813_v16 = vpack.c.bf16 %v4357_v57, %v4350_v35  ;;  %v679_v20 = vmax.f32 %v4376_v42, 0.0  ;;  %v633_v18 = vadd.f32 %v4279_v51, %v598_v2  ;;  %1036 = vmatpush.bf16.msrb.mxu1 %v3349_v45  ;;  %v3395_v42 = vld [vmem:[%s3688_s9 + $0x178] sm:$0xff] }
 0x199   : > { %686 = vst [vmem:[#allocation2 + $0x31] sm:$0xff] %v4357_v57  ;;  %v614_v0 = vmul.f32 %v4264_v27, %v4227_v47  ;;  %v4405_v19 = vmax.f32 %v622_v17, 0.0  ;;  %v640_v37 = vadd.f32 %v4279_v51, %v605_v7  ;;  %v589_v40 = vmul.f32 %v4264_v27, %v4022_v46  ;;  %1473 = vmatpush.bf16.msrb.mxu3 %v3372_v59  ;;  %v3419_v2 = vld [vmem:[%s3688_s9 + $0x238] sm:$0xff] }
 0x19a   : > { %695 = vst [vmem:[#allocation2 + $0xe1] sm:$0xff] %v4363_v61  ;;  %v4410_v23 = vmax.f32 %v623_v43, 0.0  ;;  %v641_v24 = vadd.f32 %v4279_v51, %v606_v22  ;;  %v590_v28 = vmul.f32 %v4264_v27, %v4031_v50  ;;  %v4416_v47 = vmax.f32 %v632_v14, 0.0  ;;  %v3365_v50 = vld [vmem:[%s3688_s9 + $0x88] sm:$0xff] }
 0x19b   : > { %696 = vst [vmem:[#allocation2 + $0xf1] sm:$0xff] %v4373_v1  ;;  %v648_v8 = vadd.f32 %v4279_v51, %v613_v58  ;;  %v4420_v46 = vmax.f32 %v633_v18, 0.0  ;;  %v649_v33 = vadd.f32 %v4279_v51, %v614_v0  ;;  %v4427_v44 = vmax.f32 %v640_v37, 0.0  ;;  %1238 = vmatpush.bf16.msrb.mxu2 %v3365_v50  ;;  %1706 = vmatpush.bf16.msrb.mxu0 %v3381_v10  ;;  %v1119_v14 = vld [vmem:[#allocation2 + $0x2] sm:$0xff]  ;;  %v1120_v58 = vld [vmem:[#allocation2 + $0x12] sm:$0xff] }
 0x19c   : > { %703 = vst [vmem:[#allocation2 + $0x181] sm:$0xff] %v4381_v6  ;;  %v624_v13 = vadd.f32 %v4279_v51, %v589_v40  ;;  %v4432_v29 = vmax.f32 %v641_v24, 0.0  ;;  %v625_v49 = vadd.f32 %v4279_v51, %v590_v28  ;;  %1037 = vmatpush.bf16.msrb.mxu1 %v3348_v53  ;;  %v818_v56 = vpack.c.bf16 %v4373_v1, %v4363_v61  ;;  %v3402_v40 = vld [vmem:[%s3688_s9 + $0x1b0] sm:$0xff] }
 0x19d   : > { %704 = vst [vmem:[#allocation2 + $0x191] sm:$0xff] %v4388_v11  ;;  %v680_v30 = vmax.f32 %v648_v8, 0.0  ;;  %v681_v52 = vmax.f32 %v649_v33, 0.0  ;;  %v822_v60 = vpack.c.bf16 %v4388_v11, %v4381_v6  ;;  %v826_v31 = vpack.c.bf16 %v679_v20, %v678_v12  ;;  %v3394_v24 = vld [vmem:[%s3688_s9 + $0x170] sm:$0xff] }
 0x19e   : > { %711 = vst [vmem:[#allocation2 + $0x221] sm:$0xff] %v678_v12  ;;  %v4441_v55 = vmax.f32 %v624_v13, 0.0  ;;  %v4443_v63 = vmax.f32 %v625_v49, 0.0  ;;  %v814_v4 = vpack.c.bf16 %v4410_v23, %v4405_v19  ;;  %v819_v17 = vpack.c.bf16 %v4420_v46, %v4416_v47  ;;  %v717_v12 = vld [vmem:[#allocation2 + $0x10] sm:$0xff] }
 0x19f   : > { %712 = vst [vmem:[#allocation2 + $0x231] sm:$0xff] %v679_v20  ;;  %1239 = vmatpush.bf16.msrb.mxu2 %v3364_v48  ;;  %1707 = vmatpush.bf16.msrb.mxu0 %v3380_v25  ;;  %v823_v7 = vpack.c.bf16 %v4432_v29, %v4427_v44  ;;  %v1620_v22 = vpack.c.bf16 %v4405_v19, %v4357_v57  ;;  %v3418_v8 = vld [vmem:[%s3688_s9 + $0x230] sm:$0xff]  ;;  %v4477_v50 = vld [vmem:[#allocation2 + $0x22] sm:$0xff] }
 0x1a0   : > { %926 = vmatmul.bf16.gmra.mxu1 %v817_v34  ;;  %946 = vmatmul.bf16.gmra.mxu2 %v821_v9  ;;  %687 = vst [vmem:[#allocation2 + $0x41] sm:$0xff] %v4405_v19  ;;  %v3411_v34 = vld [vmem:[%s3688_s9 + $0x1f8] sm:$0xff]  ;;  %v827_v9 = vpack.c.bf16 %v681_v52, %v680_v30  ;;  %v815_v43 = vpack.c.bf16 %v4443_v63, %v4441_v55  ;;  %v3410_v19 = vld [vmem:[%s3688_s9 + $0x1f0] sm:$0xff]  ;;  %v3393_v25 = vld [vmem:[%s3688_s9 + $0x168] sm:$0xff] }
 0x1a1   : > { %966 = vmatmul.bf16.gmra.mxu3 %v825_v15  ;;  %906 = vmatmul.bf16.gmra.mxu0 %v813_v16  ;;  %688 = vst [vmem:[#allocation2 + $0x51] sm:$0xff] %v4410_v23  ;;  %v716_v15 = vld [vmem:[#allocation2] sm:$0xff]  ;;  %v1151_v18 = vpack.c.bf16 %v1120_v58, %v1119_v14  ;;  %v1619_v37 = vpack.c.bf16 %v4350_v35, %v4296_v3  ;;  %v719_v35 = vld [vmem:[#allocation2 + $0x30] sm:$0xff] }
 0x1a2   : > { %697 = vst [vmem:[#allocation2 + $0x101] sm:$0xff] %v4416_v47  ;;  %2403 = vmatpush.bf16.msra.mxu3 %v3411_v34  ;;  %1934 = vmatpush.bf16.msra.mxu1 %v3395_v42  ;;  %v1354_v16 = vld [vmem:[#allocation2 + $0x20] sm:$0xff]  ;;  %v748_v20 = vpack.c.bf16 %v717_v12, %v716_v15  ;;  %v1621_v57 = vpack.c.bf16 %v4441_v55, %v4410_v23  ;;  %v1122_v38 = vld [vmem:[#allocation2 + $0x32] sm:$0xff] }
 0x1a3   : > { %698 = vst [vmem:[#allocation2 + $0x111] sm:$0xff] %v4420_v46  ;;  %2169 = vmatpush.bf16.msra.mxu2 %v3403_v39  ;;  %2637 = vmatpush.bf16.msra.mxu0 %v3419_v2  ;;  %v1385_v0 = vpack.c.bf16 %v1354_v16, %v717_v12  ;;  %v591_v28 = vmul.f32 %v4264_v27, %v4039_v54  ;;  %v1362_v15 = vld [vmem:[#allocation2 + $0xc0] sm:$0xff] }
 0x1a4   : > { %705 = vst [vmem:[#allocation2 + $0x1a1] sm:$0xff] %v4427_v44  ;;  %v749_v23 = vpack.c.bf16 %v719_v35, %v1354_v16  ;;  %v1152_v13 = vpack.c.bf16 %v1122_v38, %v4477_v50 }
 0x1a5   : > { %706 = vst [vmem:[#allocation2 + $0x1b1] sm:$0xff] %v4432_v29  ;;  %v626_v33 = vadd.f32 %v4279_v51, %v591_v28 }
 0x1a6   : > { %713 = vst [vmem:[#allocation2 + $0x241] sm:$0xff] %v680_v30  ;;  %2404 = vmatpush.bf16.msra.mxu3 %v3410_v19  ;;  %1935 = vmatpush.bf16.msra.mxu1 %v3394_v24 }
 0x1a7   : > { %714 = vst [vmem:[#allocation2 + $0x251] sm:$0xff] %v681_v52  ;;  %2170 = vmatpush.bf16.msra.mxu2 %v3402_v40  ;;  %2638 = vmatpush.bf16.msra.mxu0 %v3418_v8  ;;  %v658_v3 = vmax.f32 %v626_v33, 0.0  ;;  %v1356_v41 = vld [vmem:[#allocation2 + $0x40] sm:$0xff]  ;;  %v3401_v52 = vld [vmem:[%s3688_s9 + $0x1a8] sm:$0xff] }
 0x1a8   : > { %689 = vst [vmem:[#allocation2 + $0x61] sm:$0xff] %v4441_v55  ;;  %v1386_v45 = vpack.c.bf16 %v1356_v41, %v719_v35  ;;  %v721_v54 = vld [vmem:[#allocation2 + $0x50] sm:$0xff]  ;;  %v1123_v49 = vld [vmem:[#allocation2 + $0x42] sm:$0xff] }
 0x1a9   : > { %690 = vst [vmem:[#allocation2 + $0x71] sm:$0xff] %v4443_v63  ;;  %v1124_v48 = vld [vmem:[#allocation2 + $0x52] sm:$0xff]  ;;  %v750_v30 = vpack.c.bf16 %v721_v54, %v1356_v41  ;;  %v3409_v55 = vld [vmem:[%s3688_s9 + $0x1e8] sm:$0xff]  ;;  %v3416_v8 = vld [vmem:[%s3688_s9 + $0x220] sm:$0xff] }
 0x1aa   : > { %691 = vst [vmem:[#allocation2 + $0x81] sm:$0xff] %v658_v3  ;;  %v1153_v10 = vpack.c.bf16 %v1124_v48, %v1123_v49  ;;  %2405 = vmatpush.bf16.msra.mxu3 %v3409_v55  ;;  %1936 = vmatpush.bf16.msra.mxu1 %v3393_v25  ;;  %v1129_v33 = vld [vmem:[#allocation2 + $0xc2] sm:$0xff]  ;;  %v1624_v49 = vpack.c.bf16 %v4363_v61, %v4320_v21  ;;  %v1132_v25 = vld [vmem:[#allocation2 + $0xf2] sm:$0xff] }
 0x1ab   : > { %2171 = vmatpush.bf16.msra.mxu2 %v3401_v52  ;;  %v1364_v35 = vld [vmem:[#allocation2 + $0xe0] sm:$0xff]  ;;  %v729_v52 = vld [vmem:[#allocation2 + $0xf0] sm:$0xff] }
 0x1ac   : > { %v1131_v55 = vld [vmem:[#allocation2 + $0xe2] sm:$0xff] }
 0x1ad   : > { %v1366_v21 = vld [vmem:[#allocation2 + $0x100] sm:$0xff] }
 0x1af   : > { %v1358_v59 = vld [vmem:[#allocation2 + $0x60] sm:$0xff] }
 0x1b0   : > { %931 = vmatmul.bf16.gmra.mxu1 %v818_v56  ;;  %951 = vmatmul.bf16.gmra.mxu2 %v822_v60  ;;  %v1387_v53 = vpack.c.bf16 %v1358_v59, %v721_v54  ;;  %v3417_v56 = vld [vmem:[%s3688_s9 + $0x228] sm:$0xff]  ;;  %v723_v60 = vld [vmem:[#allocation2 + $0x70] sm:$0xff] }
 0x1b1   : > { %971 = vmatmul.bf16.gmra.mxu3 %v826_v31  ;;  %911 = vmatmul.bf16.gmra.mxu0 %v814_v4  ;;  %v1125_v31 = vld [vmem:[#allocation2 + $0x62] sm:$0xff]  ;;  %v1126_v4 = vld [vmem:[#allocation2 + $0x72] sm:$0xff]  ;;  %v751_v34 = vpack.c.bf16 %v723_v60, %v1358_v59 }
 0x1b2   : > { %2639 = vmatpush.bf16.msra.mxu0 %v3417_v56  ;;  %v1360_v39 = vld [vmem:[#allocation2 + $0x80] sm:$0xff]  ;;  %v1154_v42 = vpack.c.bf16 %v1126_v4, %v1125_v31  ;;  %v1157_v31 = vpack.c.bf16 %v1132_v25, %v1131_v55  ;;  %v1136_v55 = vld [vmem:[#allocation2 + $0x152] sm:$0xff] }
 0x1b3   : > { %v1388_v2 = vpack.c.bf16 %v1360_v39, %v723_v60  ;;  %v754_v60 = vpack.c.bf16 %v729_v52, %v1364_v35  ;;  %v1391_v39 = vpack.c.bf16 %v1366_v21, %v729_v52  ;;  %v1135_v52 = vld [vmem:[#allocation2 + $0x142] sm:$0xff] }
 0x1b6   : > { %2640 = vmatpush.bf16.msra.mxu0 %v3416_v8 }
 0x1c0   : > { %936 = vmatmul.bf16.gmra.mxu1 %v819_v17  ;;  %956 = vmatmul.bf16.gmra.mxu2 %v823_v7  ;;  %v1622_v17 = vpack.c.bf16 %v658_v3, %v4443_v63  ;;  %v724_v7 = vld [vmem:[#allocation2 + $0xa0] sm:$0xff]  ;;  %v1623_v63 = vpack.c.bf16 %v4312_v36, %v4294_v62  ;;  %v1130_v3 = vld [vmem:[#allocation2 + $0xd2] sm:$0xff] }
 0x1c1   : > { %976 = vmatmul.bf16.gmra.mxu3 %v827_v9  ;;  %916 = vmatmul.bf16.gmra.mxu0 %v815_v43  ;;  %v725_v9 = vld [vmem:[#allocation2 + $0xb0] sm:$0xff]  ;;  %v1127_v43 = vld [vmem:[#allocation2 + $0xa2] sm:$0xff] }
 0x1c2   : > { %v752_v12 = vpack.c.bf16 %v725_v9, %v724_v7  ;;  %v1389_v16 = vpack.c.bf16 %v1362_v15, %v725_v9  ;;  %v3392_v36 = vld [vmem:[%s3688_s9 + $0x160] sm:$0xff] }
 0x1c3   : > { %1937 = vmatpush.bf16.msra.mxu1 %v3392_v36 }
 0x1d0   : > { %1038 = vmatmul.bf16.vlgmr.msrb.gmra.mxu1 %v748_v20  ;;  %1240 = vmatmul.bf16.vlgmr.msrb.gmra.mxu2 %v1151_v18  ;;  %v3400_v18 = vld [vmem:[%s3688_s9 + $0x1a0] sm:$0xff] }
 0x1d1   : > { %1474 = vmatmul.bf16.vlgmr.msrb.gmra.mxu3 %v1385_v0  ;;  %1708 = vmatmul.bf16.vlgmr.msrb.gmra.mxu0 %v1619_v37  ;;  %v3408_v0 = vld [vmem:[%s3688_s9 + $0x1e0] sm:$0xff]  ;;  %v599_v37 = vmul.f32 %v4264_v27, %v4107_v26  ;;  %v727_v26 = vld [vmem:[#allocation2 + $0xd0] sm:$0xff] }
 0x1d2   : > { %2172 = vmatpush.bf16.msra.mxu2 %v3400_v18  ;;  %2406 = vmatpush.bf16.msra.mxu3 %v3408_v0  ;;  %v1390_v54 = vpack.c.bf16 %v1364_v35, %v727_v26 }
 0x1e0   : > { %1043 = vmatmul.bf16.gmra.mxu1 %v749_v23  ;;  %1245 = vmatmul.bf16.gmra.mxu2 %v1152_v13  ;;  %v753_v23 = vpack.c.bf16 %v727_v26, %v1362_v15  ;;  %v1156_v13 = vpack.c.bf16 %v1130_v3, %v1129_v33  ;;  %v3391_v15 = vld [vmem:[%s3688_s9 + $0x158] sm:$0xff] }
 0x1e1   : > { %1479 = vmatmul.bf16.gmra.mxu3 %v1386_v45  ;;  %1713 = vmatmul.bf16.gmra.mxu0 %v1620_v22  ;;  %v1128_v22 = vld [vmem:[#allocation2 + $0xb2] sm:$0xff] }
 0x1e2   : > { %v1155_v14 = vpack.c.bf16 %v1128_v22, %v1127_v43  ;;  %1938 = vmatpush.bf16.msra.mxu1 %v3391_v15  ;;  %v3398_v15 = vld [vmem:[%s3688_s9 + $0x190] sm:$0xff] }
 0x1f0   : > { %1048 = vmatmul.bf16.gmra.mxu1 %v750_v30  ;;  %1250 = vmatmul.bf16.gmra.mxu2 %v1153_v10 }
 0x1f1   : > { %1484 = vmatmul.bf16.gmra.mxu3 %v1387_v53  ;;  %1718 = vmatmul.bf16.gmra.mxu0 %v1621_v57  ;;  %v4498_v57 = vadd.f32 %v4279_v51, %v599_v37 }
 0x1f3   : > { %v666_v24 = vmax.f32 %v4498_v57, 0.0  ;;  %v1603_v57 = vld [vmem:[#allocation2 + $0x151] sm:$0xff] }
 0x1f5   : > { %699 = vst [vmem:[#allocation2 + $0x121] sm:$0xff] %v666_v24  ;;  %v1626_v26 = vpack.c.bf16 %v666_v24, %v4420_v46  ;;  %v1370_v46 = vld [vmem:[#allocation2 + $0x160] sm:$0xff] }
 0x200   : > { %1053 = vmatmul.bf16.gmra.mxu1 %v751_v34  ;;  %1255 = vmatmul.bf16.gmra.mxu2 %v1154_v42  ;;  %v1625_v34 = vpack.c.bf16 %v4416_v47, %v4373_v1  ;;  %v3415_v1 = vld [vmem:[%s3688_s9 + $0x218] sm:$0xff]  ;;  %v731_v47 = vld [vmem:[#allocation2 + $0x110] sm:$0xff] }
 0x201   : > { %1489 = vmatmul.bf16.gmra.mxu3 %v1388_v2  ;;  %1723 = vmatmul.bf16.gmra.mxu0 %v1622_v17  ;;  %v3399_v2 = vld [vmem:[%s3688_s9 + $0x198] sm:$0xff]  ;;  %v755_v0 = vpack.c.bf16 %v731_v47, %v1366_v21 }
 0x202   : > { %v3407_v17 = vld [vmem:[%s3688_s9 + $0x1d8] sm:$0xff]  ;;  %2173 = vmatpush.bf16.msra.mxu2 %v3399_v2  ;;  %2641 = vmatpush.bf16.msra.mxu0 %v3415_v1  ;;  %v3406_v1 = vld [vmem:[%s3688_s9 + $0x1d0] sm:$0xff] }
 0x203   : > { %2407 = vmatpush.bf16.msra.mxu3 %v3407_v17 }
 0x206   : > { %2174 = vmatpush.bf16.msra.mxu2 %v3398_v15 }
 0x207   : > { %2408 = vmatpush.bf16.msra.mxu3 %v3406_v1 }
 0x20d   : > { %v4485_v58 = vpop.f32.mrf.mxu1 }
 0x20e   : > { %v4489_v20 = vpop.f32.mrf.mxu0 }
 0x210   : > { %1058 = vmatmul.bf16.gmra.mxu1 %v752_v12  ;;  %1260 = vmatmul.bf16.gmra.mxu2 %v1155_v14  ;;  %v1133_v12 = vld [vmem:[#allocation2 + $0x102] sm:$0xff]  ;;  %v1134_v14 = vld [vmem:[#allocation2 + $0x112] sm:$0xff] }
 0x211   : > { %1494 = vmatmul.bf16.gmra.mxu3 %v1389_v16  ;;  %1728 = vmatmul.bf16.gmra.mxu0 %v1623_v63  ;;  %v1368_v16 = vld [vmem:[#allocation2 + $0x120] sm:$0xff]  ;;  %v1158_v37 = vpack.c.bf16 %v1134_v14, %v1133_v12 }
 0x212   : > { %v1392_v8 = vpack.c.bf16 %v1368_v16, %v731_v47  ;;  %v607_v47 = vmul.f32 %v4264_v27, %v4171_v5 }
 0x213   : > { %v4495_v40 = vpop.f32.mrf.mxu2 }
 0x214   : > { %v4500_v62 = vpop.f32.mrf.mxu3  ;;  %v4581_v14 = vadd.f32 %v4279_v51, %v607_v47 }
 0x215   : > { %v4503_v19 = vpop.f32.mrf.mxu1 }
 0x216   : > { %v4506_v28 = vpop.f32.mrf.mxu0 }
 0x21b   : > { %v4511_v38 = vpop.f32.mrf.mxu2 }
 0x21c   : > { %v4513_v41 = vpop.f32.mrf.mxu3 }
 0x21d   : > { %v4515_v45 = vpop.f32.mrf.mxu1 }
 0x21e   : > { %v4519_v48 = vpop.f32.mrf.mxu0 }
 0x220   : > { %1063 = vmatmul.bf16.gmra.mxu1 %v753_v23  ;;  %1265 = vmatmul.bf16.gmra.mxu2 %v1156_v13 }
 0x221   : > { %1499 = vmatmul.bf16.gmra.mxu3 %v1390_v54  ;;  %1733 = vmatmul.bf16.gmra.mxu0 %v1624_v49  ;;  %v732_v54 = vld [vmem:[#allocation2 + $0x140] sm:$0xff]  ;;  %v733_v49 = vld [vmem:[#allocation2 + $0x150] sm:$0xff] }
 0x222   : > { %v756_v21 = vpack.c.bf16 %v733_v49, %v732_v54  ;;  %v3390_v54 = vld [vmem:[%s3688_s9 + $0x150] sm:$0xff] }
 0x223   : > { %v4521_v59 = vpop.f32.mrf.mxu2  ;;  %1939 = vmatpush.bf16.msra.mxu1 %v3390_v54 }
 0x224   : > { %v4523_v30 = vpop.f32.mrf.mxu3 }
 0x225   : > { %v4525_v10 = vpop.f32.mrf.mxu1 }
 0x226   : > { %v4527_v53 = vpop.f32.mrf.mxu0 }
 0x22b   : > { %v4529_v61 = vpop.f32.mrf.mxu2 }
 0x22c   : > { %v4531_v56 = vpop.f32.mrf.mxu3 }
 0x22d   : > { %v4533_v4 = vpop.f32.mrf.mxu1 }
 0x22e   : > { %v4537_v42 = vpop.f32.mrf.mxu0 }
 0x230   : > { %1068 = vmatmul.bf16.gmra.mxu1 %v754_v60  ;;  %1270 = vmatmul.bf16.gmra.mxu2 %v1157_v31  ;;  %v1159_v60 = vpack.c.bf16 %v1136_v55, %v1135_v52  ;;  %v4591_v52 = vld [vmem:[#allocation2 + $0x170] sm:$0xff]  ;;  %v4593_v55 = vld [vmem:[#allocation2 + $0x162] sm:$0xff] }
 0x231   : > { %1504 = vmatmul.bf16.gmra.mxu3 %v1391_v39  ;;  %1738 = vmatmul.bf16.gmra.mxu0 %v1625_v34  ;;  %v1393_v39 = vpack.c.bf16 %v1370_v46, %v733_v49  ;;  %v1627_v34 = vpack.c.bf16 %v4328_v32, %v1603_v57  ;;  %v3414_v49 = vld [vmem:[%s3688_s9 + $0x210] sm:$0xff] }
 0x232   : > { %2642 = vmatpush.bf16.msra.mxu0 %v3414_v49  ;;  %v1138_v57 = vld [vmem:[#allocation2 + $0x172] sm:$0xff] }
 0x233   : > { %v4541_v7 = vpop.f32.mrf.mxu2 }
 0x234   : > { %v4543_v9 = vpop.f32.mrf.mxu3 }
 0x235   : > { %v4545_v43 = vpop.f32.mrf.mxu1 }
 0x236   : > { %v4547_v22 = vpop.f32.mrf.mxu0 }
 0x23b   : > { %v4551_v63 = vpop.f32.mrf.mxu2 }
 0x23c   : > { %v4553_v18 = vpop.f32.mrf.mxu3 }
 0x23d   : > { %v4555_v36 = vpop.f32.mrf.mxu1 }
 0x23e   : > { %v4560_v33 = vpop.f32.mrf.mxu0 }
 0x240   : > { %1073 = vmatmul.bf16.gmra.mxu1 %v755_v0  ;;  %1275 = vmatmul.bf16.gmra.mxu2 %v1158_v37  ;;  %v674_v0 = vmax.f32 %v4581_v14, 0.0  ;;  %v740_v14 = vld [vmem:[#allocation2 + $0x1e0] sm:$0xff] }
 0x241   : > { %1509 = vmatmul.bf16.gmra.mxu3 %v1392_v8  ;;  %1743 = vmatmul.bf16.gmra.mxu0 %v1626_v26 }
 0x242   : > { %707 = vst [vmem:[#allocation2 + $0x1c1] sm:$0xff] %v674_v0 }
 0x243   : > { %v4562_v3 = vpop.f32.mrf.mxu2 }
 0x244   : > { %v4564_v35 = vpop.f32.mrf.mxu3 }
 0x245   : > { %v4566_v23 = vpop.f32.mrf.mxu1 }
 0x246   : > { %v4568_v13 = vpop.f32.mrf.mxu0 }
 0x24b   : > { %v4570_v24 = vpop.f32.mrf.mxu2 }
 0x24c   : > { %v4572_v25 = vpop.f32.mrf.mxu3 }
 0x24d   : > { %v1039_v31 = vpop.f32.mrf.mxu1 }
 0x24e   : > { %v1040_v2 = vadd.f32 %v1039_v31, %v4489_v20  ;;  %v1709_v17 = vpop.f32.mrf.mxu0 }
 0x250   : > { %1078 = vmatmul.bf16.gmra.mxu1 %v756_v21  ;;  %1280 = vmatmul.bf16.gmra.mxu2 %v1159_v60  ;;  %v1372_v21 = vld [vmem:[#allocation2 + $0x180] sm:$0xff]  ;;  %v4595_v60 = vld [vmem:[#allocation2 + $0x171] sm:$0xff] }
 0x251   : > { %1514 = vmatmul.bf16.gmra.mxu3 %v1393_v39  ;;  %1748 = vmatmul.bf16.gmra.mxu0 %v1627_v34  ;;  %v757_v34 = vpack.c.bf16 %v4591_v52, %v1370_v46  ;;  %v1394_v1 = vpack.c.bf16 %v1372_v21, %v4591_v52 }
 0x253   : > { %v1241_v12 = vpop.f32.mrf.mxu2 }
 0x254   : > { %v1321_v32 = vadd.f32 %v1241_v12, %v1040_v2  ;;  %v1475_v20 = vpop.f32.mrf.mxu3  ;;  %v1160_v2 = vpack.c.bf16 %v1138_v57, %v4593_v55 }
 0x255   : > { %v1041_v16 = vpop.f32.mrf.mxu1 }
 0x256   : > { %v1555_v37 = vadd.f32 %v1475_v20, %v1321_v32  ;;  %v1042_v8 = vadd.f32 %v1041_v16, %v4506_v28  ;;  %v1711_v26 = vpop.f32.mrf.mxu0 }
 0x258   : > { %v4589_v5 = vadd.f32 %v1709_v17, %v1555_v37  ;;  %v1628_v17 = vpack.c.bf16 %v4381_v6, %v4595_v60  ;;  %v737_v6 = vld [vmem:[#allocation2 + $0x190] sm:$0xff] }
 0x25b   : > { %v1243_v31 = vpop.f32.mrf.mxu2 }
 0x25c   : > { %v1322_v28 = vadd.f32 %v1243_v31, %v1042_v8  ;;  %v1477_v39 = vpop.f32.mrf.mxu3 }
 0x25d   : > { %v1044_v15 = vpop.f32.mrf.mxu1 }
 0x25e   : > { %v1556_v47 = vadd.f32 %v1477_v39, %v1322_v28  ;;  %v1045_v12 = vadd.f32 %v1044_v15, %v4519_v48  ;;  %v1714_v32 = vpop.f32.mrf.mxu0  ;;  %v1139_v28 = vld [vmem:[#allocation2 + $0x182] sm:$0xff]  ;;  %v1140_v48 = vld [vmem:[#allocation2 + $0x192] sm:$0xff]  ;;  %v758_v15 = vpack.c.bf16 %v737_v6, %v1372_v21 }
 0x25f   : > { %v1374_v39 = vld [vmem:[#allocation2 + $0x1a0] sm:$0xff]  ;;  %v3405_v21 = vld [vmem:[%s3688_s9 + $0x1c8] sm:$0xff] }
 0x260   : > { %1083 = vmatmul.bf16.gmra.mxu1 %v757_v34  ;;  %1285 = vmatmul.bf16.gmra.mxu2 %v1160_v2  ;;  %v4603_v20 = vadd.f32 %v1711_v26, %v1556_v47  ;;  %v1395_v47 = vpack.c.bf16 %v1374_v39, %v737_v6 }
 0x261   : > { %1519 = vmatmul.bf16.gmra.mxu3 %v1394_v1  ;;  %1753 = vmatmul.bf16.gmra.mxu0 %v1628_v17  ;;  %v1161_v1 = vpack.c.bf16 %v1140_v48, %v1139_v28  ;;  %v3389_v28 = vld [vmem:[%s3688_s9 + $0x148] sm:$0xff] }
 0x262   : > { %2409 = vmatpush.bf16.msra.mxu3 %v3405_v21  ;;  %v3413_v48 = vld [vmem:[%s3688_s9 + $0x208] sm:$0xff]  ;;  %1940 = vmatpush.bf16.msra.mxu1 %v3389_v28 }
 0x263   : > { %v1246_v16 = vpop.f32.mrf.mxu2  ;;  %2643 = vmatpush.bf16.msra.mxu0 %v3413_v48 }
 0x264   : > { %v1323_v46 = vadd.f32 %v1246_v16, %v1045_v12  ;;  %v1480_v37 = vpop.f32.mrf.mxu3  ;;  %v1629_v12 = vpack.c.bf16 %v4427_v44, %v4388_v11 }
 0x265   : > { %v1046_v8 = vpop.f32.mrf.mxu1 }
 0x266   : > { %v1557_v54 = vadd.f32 %v1480_v37, %v1323_v46  ;;  %v1047_v49 = vadd.f32 %v1046_v8, %v4527_v53  ;;  %v1716_v57 = vpop.f32.mrf.mxu0  ;;  %v3397_v37 = vld [vmem:[%s3688_s9 + $0x188] sm:$0xff] }
 0x267   : > { %2175 = vmatpush.bf16.msra.mxu2 %v3397_v37  ;;  %v1630_v37 = vpack.c.bf16 %v674_v0, %v4432_v29  ;;  %v741_v0 = vld [vmem:[#allocation2 + $0x1f0] sm:$0xff] }
 0x268   : > { %v4606_v31 = vadd.f32 %v1714_v32, %v1557_v54 }
 0x26b   : > { %v1248_v34 = vpop.f32.mrf.mxu2 }
 0x26c   : > { %v1324_v26 = vadd.f32 %v1248_v34, %v1047_v49  ;;  %v1482_v2 = vpop.f32.mrf.mxu3  ;;  %v739_v34 = vld [vmem:[#allocation2 + $0x1b0] sm:$0xff] }
 0x26d   : > { %v1049_v17 = vpop.f32.mrf.mxu1 }
 0x26e   : > { %v1558_v53 = vadd.f32 %v1482_v2, %v1324_v26  ;;  %v1050_v32 = vadd.f32 %v1049_v17, %v4537_v42  ;;  %v1719_v16 = vpop.f32.mrf.mxu0  ;;  %v4620_v26 = vld [vmem:[#allocation2 + $0x1a2] sm:$0xff]  ;;  %v1142_v2 = vld [vmem:[#allocation2 + $0x1b2] sm:$0xff] }
 0x270   : > { %1088 = vmatmul.bf16.gmra.mxu1 %v758_v15  ;;  %1290 = vmatmul.bf16.gmra.mxu2 %v1161_v1  ;;  %v4611_v46 = vadd.f32 %v1716_v57, %v1558_v53  ;;  %v1376_v15 = vld [vmem:[#allocation2 + $0x1c0] sm:$0xff]  ;;  %v1162_v53 = vpack.c.bf16 %v1142_v2, %v4620_v26 }
 0x271   : > { %1524 = vmatmul.bf16.gmra.mxu3 %v1395_v47  ;;  %1758 = vmatmul.bf16.gmra.mxu0 %v1629_v12  ;;  %v759_v12 = vpack.c.bf16 %v739_v34, %v1374_v39  ;;  %v1378_v2 = vld [vmem:[#allocation2 + $0x200] sm:$0xff] }
 0x273   : > { %v1251_v8 = vpop.f32.mrf.mxu2 }
 0x274   : > { %v1325_v54 = vadd.f32 %v1251_v8, %v1050_v32  ;;  %v1485_v49 = vpop.f32.mrf.mxu3 }
 0x275   : > { %v1051_v11 = vpop.f32.mrf.mxu1 }
 0x276   : > { %v1559_v44 = vadd.f32 %v1485_v49, %v1325_v54  ;;  %v1052_v42 = vadd.f32 %v1051_v11, %v4547_v22  ;;  %v1721_v6 = vpop.f32.mrf.mxu0  ;;  %v1396_v22 = vpack.c.bf16 %v1376_v15, %v739_v34  ;;  %v1144_v34 = vld [vmem:[#allocation2 + $0x1f2] sm:$0xff] }
 0x277   : > { %v1611_v15 = vld [vmem:[#allocation2 + $0x1f1] sm:$0xff] }
 0x278   : > { %v4618_v57 = vadd.f32 %v1719_v16, %v1559_v44 }
 0x27b   : > { %v1253_v1 = vpop.f32.mrf.mxu2 }
 0x27c   : > { %v1326_v17 = vadd.f32 %v1253_v1, %v1052_v42  ;;  %v1487_v47 = vpop.f32.mrf.mxu3 }
 0x27d   : > { %v1054_v32 = vpop.f32.mrf.mxu1 }
 0x27e   : > { %v1560_v21 = vadd.f32 %v1487_v47, %v1326_v17  ;;  %v1055_v16 = vadd.f32 %v1054_v32, %v4560_v33  ;;  %v1724_v8 = vpop.f32.mrf.mxu0  ;;  %v1143_v33 = vld [vmem:[#allocation2 + $0x1e2] sm:$0xff] }
 0x280   : > { %1093 = vmatmul.bf16.gmra.mxu1 %v759_v12  ;;  %1295 = vmatmul.bf16.gmra.mxu2 %v1162_v53  ;;  %v4627_v54 = vadd.f32 %v1721_v6, %v1560_v21  ;;  %v1612_v6 = vld [vmem:[#allocation2 + $0x201] sm:$0xff]  ;;  %v760_v12 = vpack.c.bf16 %v741_v0, %v740_v14  ;;  %v1163_v53 = vpack.c.bf16 %v1144_v34, %v1143_v33 }
 0x281   : > { %1529 = vmatmul.bf16.gmra.mxu3 %v1396_v22  ;;  %1763 = vmatmul.bf16.gmra.mxu0 %v1630_v37  ;;  %v1397_v22 = vpack.c.bf16 %v1378_v2, %v741_v0 }
 0x283   : > { %v1256_v49 = vpop.f32.mrf.mxu2 }
 0x284   : > { %v1327_v39 = vadd.f32 %v1256_v49, %v1055_v16  ;;  %v1490_v11 = vpop.f32.mrf.mxu3  ;;  %v3404_v49 = vld [vmem:[%s3688_s9 + $0x1c0] sm:$0xff] }
 0x285   : > { %v1056_v44 = vpop.f32.mrf.mxu1  ;;  %2410 = vmatpush.bf16.msra.mxu3 %v3404_v49 }
 0x286   : > { %v1561_v42 = vadd.f32 %v1490_v11, %v1327_v39  ;;  %v1057_v28 = vadd.f32 %v1056_v44, %v4568_v13  ;;  %v1726_v48 = vpop.f32.mrf.mxu0  ;;  %v1631_v13 = vpack.c.bf16 %v1612_v6, %v1611_v15  ;;  %v3492_v39 = vld [vmem:[%s5020_s5 + $0xf8] sm:$0xff]  ;;  %v3388_v6 = vld [vmem:[%s3688_s9 + $0x140] sm:$0xff] }
 0x287   : > { %v615_v11 = vmul.f32 %v3492_v39, %v4264_v27  ;;  %1941 = vmatpush.bf16.msra.mxu1 %v3388_v6 }
 0x288   : > { %v4630_v29 = vadd.f32 %v1724_v8, %v1561_v42  ;;  %v3396_v8 = vld [vmem:[%s3688_s9 + $0x180] sm:$0xff] }
 0x289   : > { %2176 = vmatpush.bf16.msra.mxu2 %v3396_v8 }
 0x28b   : > { %v1258_v1 = vpop.f32.mrf.mxu2 }
 0x28c   : > { %v1328_v17 = vadd.f32 %v1258_v1, %v1057_v28  ;;  %v1492_v47 = vpop.f32.mrf.mxu3  ;;  %v4642_v28 = vadd.f32 %v4279_v51, %v615_v11  ;;  %v3412_v1 = vld [vmem:[%s3688_s9 + $0x200] sm:$0xff]  ;;  %v1146_v51 = vld [vmem:[#allocation2 + $0x212] sm:$0xff] }
 0x28d   : > { %v1059_v32 = vpop.f32.mrf.mxu1  ;;  %2644 = vmatpush.bf16.msra.mxu0 %v3412_v1 }
 0x28e   : > { %v1562_v37 = vadd.f32 %v1492_v47, %v1328_v17  ;;  %v1729_v21 = vpop.f32.mrf.mxu0  ;;  %v1060_v44 = vadd.f32 %v1059_v32, %v4485_v58  ;;  %v682_v33 = vmax.f32 %v4642_v28, 0.0  ;;  %v743_v58 = vld [vmem:[#allocation2 + $0x210] sm:$0xff]  ;;  %v4651_v17 = vld [vmem:[#allocation2 + $0x202] sm:$0xff] }
 0x28f   : > { %v1614_v32 = vld [vmem:[#allocation2 + $0x221] sm:$0xff]  ;;  %v761_v8 = vpack.c.bf16 %v743_v58, %v1378_v2  ;;  %v1164_v49 = vpack.c.bf16 %v1146_v51, %v4651_v17 }
 0x290   : > { %1098 = vmatmul.bf16.gmra.mxu1 %v760_v12  ;;  %1300 = vmatmul.bf16.gmra.mxu2 %v1163_v53  ;;  %v4632_v16 = vadd.f32 %v1726_v48, %v1562_v37  ;;  %715 = vst [vmem:[#allocation2 + $0x261] sm:$0xff] %v682_v33  ;;  %v1380_v12 = vld [vmem:[#allocation2 + $0x220] sm:$0xff]  ;;  %v4654_v53 = vld [vmem:[#allocation2 + $0x211] sm:$0xff] }
 0x291   : > { %1534 = vmatmul.bf16.gmra.mxu3 %v1397_v22  ;;  %1768 = vmatmul.bf16.gmra.mxu0 %v1631_v13  ;;  %v1398_v11 = vpack.c.bf16 %v1380_v12, %v743_v58  ;;  %v745_v58 = vld [vmem:[#allocation2 + $0x230] sm:$0xff]  ;;  %v2056_v28 = vld [vmem:[#allocation2 + $0x20] sm:$0xff] }
 0x293   : > { %v1261_v42 = vpop.f32.mrf.mxu2 }
 0x294   : > { %v1329_v48 = vadd.f32 %v1261_v42, %v1060_v44  ;;  %v1495_v14 = vpop.f32.mrf.mxu3 }
 0x295   : > { %v1061_v0 = vpop.f32.mrf.mxu1 }
 0x296   : > { %v1563_v34 = vadd.f32 %v1495_v14, %v1329_v48  ;;  %v1731_v15 = vpop.f32.mrf.mxu0  ;;  %v1062_v47 = vadd.f32 %v1061_v0, %v4503_v19 }
 0x298   : > { %v4649_v27 = vadd.f32 %v1729_v21, %v1563_v34  ;;  %v1632_v21 = vpack.c.bf16 %v1614_v32, %v4654_v53  ;;  %v1148_v32 = vld [vmem:[#allocation2 + $0x232] sm:$0xff] }
 0x29b   : > { %v1263_v22 = vpop.f32.mrf.mxu2 }
 0x29c   : > { %v1330_v13 = vadd.f32 %v1263_v22, %v1062_v47  ;;  %v1497_v37 = vpop.f32.mrf.mxu3  ;;  %v1147_v47 = vld [vmem:[#allocation2 + $0x222] sm:$0xff] }
 0x29d   : > { %v1064_v39 = vpop.f32.mrf.mxu1 }
 0x29e   : > { %v1564_v44 = vadd.f32 %v1497_v37, %v1330_v13  ;;  %v1734_v42 = vpop.f32.mrf.mxu0  ;;  %v1065_v19 = vadd.f32 %v1064_v39, %v4515_v45  ;;  %v1382_v13 = vld [vmem:[#allocation2 + $0x240] sm:$0xff]  ;;  %v762_v45 = vpack.c.bf16 %v745_v58, %v1380_v12  ;;  %v1165_v39 = vpack.c.bf16 %v1148_v32, %v1147_v47 }
 0x29f   : > { %v1616_v37 = vld [vmem:[#allocation2 + $0x241] sm:$0xff] }
 0x2a0   : > { %1103 = vmatmul.bf16.gmra.mxu1 %v761_v8  ;;  %1305 = vmatmul.bf16.gmra.mxu2 %v1164_v49  ;;  %v4658_v48 = vadd.f32 %v1731_v15, %v1564_v44  ;;  %v1615_v15 = vld [vmem:[#allocation2 + $0x231] sm:$0xff]  ;;  %v1399_v44 = vpack.c.bf16 %v1382_v13, %v745_v58  ;;  %v1149_v32 = vld [vmem:[#allocation2 + $0x242] sm:$0xff] }
 0x2a1   : > { %1539 = vmatmul.bf16.gmra.mxu3 %v1398_v11  ;;  %1773 = vmatmul.bf16.gmra.mxu0 %v1632_v21  ;;  %v747_v58 = vld [vmem:[#allocation2 + $0x250] sm:$0xff] }
 0x2a3   : > { %v1266_v14 = vpop.f32.mrf.mxu2 }
 0x2a4   : > { %v1331_v0 = vadd.f32 %v1266_v14, %v1065_v19  ;;  %v1500_v34 = vpop.f32.mrf.mxu3  ;;  %v1633_v19 = vpack.c.bf16 %v1616_v37, %v1615_v15  ;;  %v1150_v15 = vld [vmem:[#allocation2 + $0x252] sm:$0xff] }
 0x2a5   : > { %v1066_v2 = vpop.f32.mrf.mxu1 }
 0x2a6   : > { %v1565_v6 = vadd.f32 %v1500_v34, %v1331_v0  ;;  %v1736_v1 = vpop.f32.mrf.mxu0  ;;  %v1067_v22 = vadd.f32 %v1066_v2, %v4525_v10 }
 0x2a8   : > { %v4661_v51 = vadd.f32 %v1734_v42, %v1565_v6 }
 0x2ab   : > { %v1268_v8 = vpop.f32.mrf.mxu2 }
 0x2ac   : > { %v1332_v49 = vadd.f32 %v1268_v8, %v1067_v22  ;;  %v1502_v11 = vpop.f32.mrf.mxu3 }
 0x2ad   : > { %v1069_v21 = vpop.f32.mrf.mxu1 }
 0x2ae   : > { %v1566_v14 = vadd.f32 %v1502_v11, %v1332_v49  ;;  %v1739_v0 = vpop.f32.mrf.mxu0  ;;  %v1070_v10 = vadd.f32 %v1069_v21, %v4533_v4  ;;  %v1384_v49 = vld [vmem:[#allocation2 + $0x260] sm:$0xff]  ;;  %v763_v4 = vpack.c.bf16 %v747_v58, %v1382_v13  ;;  %v1166_v21 = vpack.c.bf16 %v1150_v15, %v1149_v32  ;;  %v1821_v32 = vld [vmem:[#allocation2 + $0x12] sm:$0xff] }
 0x2b0   : > { %1108 = vmatmul.bf16.gmra.mxu1 %v762_v45  ;;  %1310 = vmatmul.bf16.gmra.mxu2 %v1165_v39  ;;  %v4664_v42 = vadd.f32 %v1736_v1, %v1566_v14  ;;  %v4670_v1 = vld [vmem:[#allocation2 + $0x251] sm:$0xff] }
 0x2b1   : > { %1544 = vmatmul.bf16.gmra.mxu3 %v1399_v44  ;;  %1778 = vmatmul.bf16.gmra.mxu0 %v1633_v19  ;;  %v1400_v19 = vpack.c.bf16 %v1384_v49, %v747_v58  ;;  %v1634_v14 = vpack.c.bf16 %v682_v33, %v4670_v1  ;;  %v2057_v33 = vld [vmem:[#allocation2 + $0x30] sm:$0xff] }
 0x2b3   : > { %v1271_v34 = vpop.f32.mrf.mxu2 }
 0x2b4   : > { %v1333_v2 = vadd.f32 %v1271_v34, %v1070_v10  ;;  %v1505_v6 = vpop.f32.mrf.mxu3 }
 0x2b5   : > { %v1071_v22 = vpop.f32.mrf.mxu1 }
 0x2b6   : > { %v1567_v8 = vadd.f32 %v1505_v6, %v1333_v2  ;;  %v1741_v12 = vpop.f32.mrf.mxu0  ;;  %v1072_v37 = vadd.f32 %v1071_v22, %v4545_v43 }
 0x2b8   : > { %v4667_v47 = vadd.f32 %v1739_v0, %v1567_v8 }
 0x2bb   : > { %v1273_v11 = vpop.f32.mrf.mxu2 }
 0x2bc   : > { %v1334_v45 = vadd.f32 %v1273_v11, %v1072_v37  ;;  %v1507_v39 = vpop.f32.mrf.mxu3  ;;  %v2290_v37 = vld [vmem:[#allocation2 + $0x21] sm:$0xff] }
 0x2bd   : > { %v1074_v44 = vpop.f32.mrf.mxu1  ;;  %v2524_v11 = vld [vmem:[#allocation2 + $0x22] sm:$0xff] }
 0x2be   : > { %v1568_v0 = vadd.f32 %v1507_v39, %v1334_v45  ;;  %v1744_v10 = vpop.f32.mrf.mxu0  ;;  %v1075_v43 = vadd.f32 %v1074_v44, %v4555_v36  ;;  %v2525_v45 = vld [vmem:[#allocation2 + $0x32] sm:$0xff]  ;;  %v2088_v44 = vpack.c.bf16 %v2057_v33, %v2056_v28  ;;  %v1824_v28 = vld [vmem:[#allocation2 + $0x42] sm:$0xff] }
 0x2bf   : > { %v2058_v33 = vld [vmem:[#allocation2 + $0x40] sm:$0xff] }
 0x2c0   : > { %1113 = vmatmul.bf16.gmra.mxu1 %v763_v4  ;;  %1315 = vmatmul.bf16.gmra.mxu2 %v1166_v21  ;;  %v4675_v34 = vadd.f32 %v1741_v12, %v1568_v0  ;;  %v2291_v12 = vld [vmem:[#allocation2 + $0x31] sm:$0xff]  ;;  %v1853_v21 = vpack.c.bf16 %v4477_v50, %v1821_v32  ;;  %v2556_v0 = vpack.c.bf16 %v2525_v45, %v2524_v11  ;;  %v2292_v11 = vld [vmem:[#allocation2 + $0x41] sm:$0xff] }
 0x2c1   : > { %1549 = vmatmul.bf16.gmra.mxu3 %v1400_v19  ;;  %1783 = vmatmul.bf16.gmra.mxu0 %v1634_v14  ;;  %v2322_v14 = vpack.c.bf16 %v2291_v12, %v2290_v37  ;;  %v2059_v37 = vld [vmem:[#allocation2 + $0x50] sm:$0xff] }
 0x2c3   : > { %v1276_v2 = vpop.f32.mrf.mxu2 }
 0x2c4   : > { %v1335_v6 = vadd.f32 %v1276_v2, %v1075_v43  ;;  %v1510_v13 = vpop.f32.mrf.mxu3 }
 0x2c5   : > { %v1076_v22 = vpop.f32.mrf.mxu1 }
 0x2c6   : > { %v1569_v8 = vadd.f32 %v1510_v13, %v1335_v6  ;;  %v1746_v58 = vpop.f32.mrf.mxu0  ;;  %v1077_v49 = vadd.f32 %v1076_v22, %v4566_v23 }
 0x2c8   : > { %v4678_v15 = vadd.f32 %v1744_v10, %v1569_v8 }
 0x2cb   : > { %v1278_v39 = vpop.f32.mrf.mxu2 }
 0x2cc   : > { %v1336_v4 = vadd.f32 %v1278_v39, %v1077_v49  ;;  %v1512_v36 = vpop.f32.mrf.mxu3  ;;  %v2527_v39 = vld [vmem:[#allocation2 + $0x52] sm:$0xff] }
 0x2cd   : > { %v1079_v19 = vpop.f32.mrf.mxu1 }
 0x2ce   : > { %v1570_v43 = vadd.f32 %v1512_v36, %v1336_v4  ;;  %v1749_v10 = vpop.f32.mrf.mxu0  ;;  %v1080_v23 = vadd.f32 %v1079_v19, %v4495_v40  ;;  %v1854_v40 = vpack.c.bf16 %v1824_v28, %v2525_v45 }
 0x2d0   : > { %1942 = vmatmul.bf16.vlgmr.msra.gmra.mxu1 %v1853_v21  ;;  %2177 = vmatmul.bf16.vlgmr.msra.gmra.mxu2 %v2088_v44  ;;  %v4682_v2 = vadd.f32 %v1746_v58, %v1570_v43  ;;  %v2293_v58 = vld [vmem:[#allocation2 + $0x51] sm:$0xff]  ;;  %v2089_v44 = vpack.c.bf16 %v2059_v37, %v2058_v33  ;;  %v1826_v37 = vld [vmem:[#allocation2 + $0x62] sm:$0xff] }
 0x2d1   : > { %2411 = vmatmul.bf16.vlgmr.msra.gmra.mxu3 %v2322_v14  ;;  %2645 = vmatmul.bf16.vlgmr.msra.gmra.mxu0 %v2556_v0  ;;  %v2323_v14 = vpack.c.bf16 %v2293_v58, %v2292_v11  ;;  %v2557_v0 = vpack.c.bf16 %v2527_v39, %v1824_v28  ;;  %v2060_v28 = vld [vmem:[#allocation2 + $0x60] sm:$0xff] }
 0x2d2   : > { %v2294_v58 = vld [vmem:[#allocation2 + $0x61] sm:$0xff] }
 0x2d3   : > { %v1281_v6 = vpop.f32.mrf.mxu2 }
 0x2d4   : > { %v1337_v13 = vadd.f32 %v1281_v6, %v1080_v23  ;;  %v1515_v22 = vpop.f32.mrf.mxu3 }
 0x2d5   : > { %v1081_v8 = vpop.f32.mrf.mxu1 }
 0x2d6   : > { %v1571_v49 = vadd.f32 %v1515_v22, %v1337_v13  ;;  %v1751_v50 = vpop.f32.mrf.mxu0  ;;  %v1082_v12 = vadd.f32 %v1081_v8, %v4511_v38 }
 0x2d8   : > { %v4685_v32 = vadd.f32 %v1749_v10, %v1571_v49 }
 0x2db   : > { %v1283_v4 = vpop.f32.mrf.mxu2 }
 0x2dc   : > { %v1338_v36 = vadd.f32 %v1283_v4, %v1082_v12  ;;  %v1517_v21 = vpop.f32.mrf.mxu3  ;;  %v2061_v12 = vld [vmem:[#allocation2 + $0x70] sm:$0xff] }
 0x2dd   : > { %v1084_v19 = vpop.f32.mrf.mxu1  ;;  %v2529_v4 = vld [vmem:[#allocation2 + $0x72] sm:$0xff] }
 0x2de   : > { %v1572_v43 = vadd.f32 %v1517_v21, %v1338_v36  ;;  %v1754_v23 = vpop.f32.mrf.mxu0  ;;  %v1085_v38 = vadd.f32 %v1084_v19, %v4521_v59  ;;  %v1855_v59 = vpack.c.bf16 %v1826_v37, %v2527_v39 }
 0x2e0   : > { %1947 = vmatmul.bf16.gmra.mxu1 %v1854_v40  ;;  %2182 = vmatmul.bf16.gmra.mxu2 %v2089_v44  ;;  %v4688_v10 = vadd.f32 %v1751_v50, %v1572_v43  ;;  %v2295_v50 = vld [vmem:[#allocation2 + $0x71] sm:$0xff]  ;;  %v2090_v44 = vpack.c.bf16 %v2061_v12, %v2060_v28  ;;  %v1828_v12 = vld [vmem:[#allocation2 + $0x82] sm:$0xff] }
 0x2e1   : > { %2416 = vmatmul.bf16.gmra.mxu3 %v2323_v14  ;;  %2650 = vmatmul.bf16.gmra.mxu0 %v2557_v0  ;;  %v2324_v14 = vpack.c.bf16 %v2295_v50, %v2294_v58  ;;  %v2558_v0 = vpack.c.bf16 %v2529_v4, %v1826_v37  ;;  %v2062_v37 = vld [vmem:[#allocation2 + $0x80] sm:$0xff] }
 0x2e2   : > { %v2296_v50 = vld [vmem:[#allocation2 + $0x81] sm:$0xff] }
 0x2e3   : > { %v1286_v6 = vpop.f32.mrf.mxu2 }
 0x2e4   : > { %v1339_v13 = vadd.f32 %v1286_v6, %v1085_v38  ;;  %v1520_v22 = vpop.f32.mrf.mxu3 }
 0x2e5   : > { %v1086_v8 = vpop.f32.mrf.mxu1 }
 0x2e6   : > { %v1573_v49 = vadd.f32 %v1520_v22, %v1339_v13  ;;  %v1756_v45 = vpop.f32.mrf.mxu0  ;;  %v1087_v11 = vadd.f32 %v1086_v8, %v4529_v61 }
 0x2e8   : > { %v4691_v33 = vadd.f32 %v1754_v23, %v1573_v49 }
 0x2eb   : > { %v1288_v36 = vpop.f32.mrf.mxu2 }
 0x2ec   : > { %v1340_v21 = vadd.f32 %v1288_v36, %v1087_v11  ;;  %v1522_v40 = vpop.f32.mrf.mxu3  ;;  %v2063_v11 = vld [vmem:[#allocation2 + $0x90] sm:$0xff] }
 0x2ed   : > { %v1089_v19 = vpop.f32.mrf.mxu1  ;;  %v2531_v36 = vld [vmem:[#allocation2 + $0x92] sm:$0xff] }
 0x2ee   : > { %v1574_v43 = vadd.f32 %v1522_v40, %v1340_v21  ;;  %v1759_v38 = vpop.f32.mrf.mxu0  ;;  %v1090_v61 = vadd.f32 %v1089_v19, %v4541_v7  ;;  %v1856_v7 = vpack.c.bf16 %v1828_v12, %v2529_v4 }
 0x2f0   : > { %1952 = vmatmul.bf16.gmra.mxu1 %v1855_v59  ;;  %2187 = vmatmul.bf16.gmra.mxu2 %v2090_v44  ;;  %v4694_v23 = vadd.f32 %v1756_v45, %v1574_v43  ;;  %v2297_v45 = vld [vmem:[#allocation2 + $0x91] sm:$0xff]  ;;  %v2091_v44 = vpack.c.bf16 %v2063_v11, %v2062_v37 }
 0x2f1   : > { %2421 = vmatmul.bf16.gmra.mxu3 %v2324_v14  ;;  %2655 = vmatmul.bf16.gmra.mxu0 %v2558_v0  ;;  %v2325_v14 = vpack.c.bf16 %v2297_v45, %v2296_v50  ;;  %v2559_v0 = vpack.c.bf16 %v2531_v36, %v1828_v12  ;;  %v1829_v37 = vld [vmem:[#allocation2 + $0xb2] sm:$0xff]  ;;  %v1830_v12 = vld [vmem:[#allocation2 + $0xc2] sm:$0xff] }
 0x2f2   : > { %v2065_v50 = vld [vmem:[#allocation2 + $0xd0] sm:$0xff] }
 0x2f3   : > { %v1291_v6 = vpop.f32.mrf.mxu2  ;;  %v2299_v36 = vld [vmem:[#allocation2 + $0xd1] sm:$0xff] }
 0x2f4   : > { %v1341_v13 = vadd.f32 %v1291_v6, %v1090_v61  ;;  %v1525_v22 = vpop.f32.mrf.mxu3 }
 0x2f5   : > { %v1091_v8 = vpop.f32.mrf.mxu1 }
 0x2f6   : > { %v1575_v49 = vadd.f32 %v1525_v22, %v1341_v13  ;;  %v1761_v39 = vpop.f32.mrf.mxu0  ;;  %v1092_v58 = vadd.f32 %v1091_v8, %v4551_v63 }
 0x2f8   : > { %v4697_v28 = vadd.f32 %v1759_v38, %v1575_v49 }
 0x2fb   : > { %v1293_v21 = vpop.f32.mrf.mxu2 }
 0x2fc   : > { %v1342_v40 = vadd.f32 %v1293_v21, %v1092_v58  ;;  %v1527_v59 = vpop.f32.mrf.mxu3  ;;  %v2064_v58 = vld [vmem:[#allocation2 + $0xc0] sm:$0xff]  ;;  %v2533_v21 = vld [vmem:[#allocation2 + $0xd2] sm:$0xff] }
 0x2fd   : > { %v1094_v19 = vpop.f32.mrf.mxu1 }
 0x2fe   : > { %v1576_v43 = vadd.f32 %v1527_v59, %v1342_v40  ;;  %v1764_v61 = vpop.f32.mrf.mxu0  ;;  %v1095_v63 = vadd.f32 %v1094_v19, %v4562_v3 }
 0x300   : > { %1957 = vmatmul.bf16.gmra.mxu1 %v1856_v7  ;;  %2192 = vmatmul.bf16.gmra.mxu2 %v2091_v44  ;;  %v4700_v38 = vadd.f32 %v1761_v39, %v1576_v43  ;;  %v2298_v39 = vld [vmem:[#allocation2 + $0xc1] sm:$0xff]  ;;  %v1857_v7 = vpack.c.bf16 %v1830_v12, %v1829_v37  ;;  %v2092_v44 = vpack.c.bf16 %v2065_v50, %v2064_v58 }
 0x301   : > { %2426 = vmatmul.bf16.gmra.mxu3 %v2325_v14  ;;  %2660 = vmatmul.bf16.gmra.mxu0 %v2559_v0  ;;  %v2326_v14 = vpack.c.bf16 %v2299_v36, %v2298_v39  ;;  %v2560_v0 = vpack.c.bf16 %v2533_v21, %v1830_v12  ;;  %v1832_v50 = vld [vmem:[#allocation2 + $0xe2] sm:$0xff] }
 0x302   : > { %v2066_v12 = vld [vmem:[#allocation2 + $0xe0] sm:$0xff] }
 0x303   : > { %v1296_v6 = vpop.f32.mrf.mxu2  ;;  %v2300_v36 = vld [vmem:[#allocation2 + $0xe1] sm:$0xff] }
 0x304   : > { %v1343_v13 = vadd.f32 %v1296_v6, %v1095_v63  ;;  %v1530_v22 = vpop.f32.mrf.mxu3 }
 0x305   : > { %v1096_v8 = vpop.f32.mrf.mxu1 }
 0x306   : > { %v1577_v49 = vadd.f32 %v1530_v22, %v1343_v13  ;;  %v1766_v4 = vpop.f32.mrf.mxu0  ;;  %v1097_v45 = vadd.f32 %v1096_v8, %v4570_v24 }
 0x308   : > { %v4703_v11 = vadd.f32 %v1764_v61, %v1577_v49 }
 0x30b   : > { %v1298_v40 = vpop.f32.mrf.mxu2 }
 0x30c   : > { %v1344_v59 = vadd.f32 %v1298_v40, %v1097_v45  ;;  %v1532_v3 = vpop.f32.mrf.mxu3  ;;  %v2067_v45 = vld [vmem:[#allocation2 + $0xf0] sm:$0xff] }
 0x30d   : > { %v1099_v19 = vpop.f32.mrf.mxu1  ;;  %v2535_v40 = vld [vmem:[#allocation2 + $0xf2] sm:$0xff] }
 0x30e   : > { %v1578_v43 = vadd.f32 %v1532_v3, %v1344_v59  ;;  %v1769_v63 = vpop.f32.mrf.mxu0  ;;  %v1100_v24 = vadd.f32 %v1099_v19, %v4500_v62  ;;  %v1858_v62 = vpack.c.bf16 %v1832_v50, %v2533_v21 }
 0x310   : > { %1962 = vmatmul.bf16.gmra.mxu1 %v1857_v7  ;;  %2197 = vmatmul.bf16.gmra.mxu2 %v2092_v44  ;;  %v4706_v61 = vadd.f32 %v1766_v4, %v1578_v43  ;;  %v2301_v4 = vld [vmem:[#allocation2 + $0xf1] sm:$0xff]  ;;  %v2093_v44 = vpack.c.bf16 %v2067_v45, %v2066_v12  ;;  %v1834_v45 = vld [vmem:[#allocation2 + $0x102] sm:$0xff] }
 0x311   : > { %2431 = vmatmul.bf16.gmra.mxu3 %v2326_v14  ;;  %2665 = vmatmul.bf16.gmra.mxu0 %v2560_v0  ;;  %v2327_v14 = vpack.c.bf16 %v2301_v4, %v2300_v36  ;;  %v2561_v0 = vpack.c.bf16 %v2535_v40, %v1832_v50  ;;  %v2068_v50 = vld [vmem:[#allocation2 + $0x100] sm:$0xff] }
 0x312   : > { %v2302_v4 = vld [vmem:[#allocation2 + $0x101] sm:$0xff] }
 0x313   : > { %v1301_v6 = vpop.f32.mrf.mxu2 }
 0x314   : > { %v1345_v13 = vadd.f32 %v1301_v6, %v1100_v24  ;;  %v1535_v22 = vpop.f32.mrf.mxu3 }
 0x315   : > { %v1101_v8 = vpop.f32.mrf.mxu1 }
 0x316   : > { %v1579_v49 = vadd.f32 %v1535_v22, %v1345_v13  ;;  %v1771_v37 = vpop.f32.mrf.mxu0  ;;  %v1102_v39 = vadd.f32 %v1101_v8, %v4513_v41 }
 0x318   : > { %v4709_v58 = vadd.f32 %v1769_v63, %v1579_v49 }
 0x31b   : > { %v1303_v59 = vpop.f32.mrf.mxu2 }
 0x31c   : > { %v1346_v3 = vadd.f32 %v1303_v59, %v1102_v39  ;;  %v1537_v7 = vpop.f32.mrf.mxu3  ;;  %v2069_v39 = vld [vmem:[#allocation2 + $0x110] sm:$0xff] }
 0x31d   : > { %v1104_v19 = vpop.f32.mrf.mxu1  ;;  %v2537_v59 = vld [vmem:[#allocation2 + $0x112] sm:$0xff] }
 0x31e   : > { %v1580_v43 = vadd.f32 %v1537_v7, %v1346_v3  ;;  %v1774_v24 = vpop.f32.mrf.mxu0  ;;  %v1105_v41 = vadd.f32 %v1104_v19, %v4523_v30  ;;  %v1859_v30 = vpack.c.bf16 %v1834_v45, %v2535_v40 }
 0x320   : > { %1967 = vmatmul.bf16.gmra.mxu1 %v1858_v62  ;;  %2202 = vmatmul.bf16.gmra.mxu2 %v2093_v44  ;;  %v4712_v63 = vadd.f32 %v1771_v37, %v1580_v43  ;;  %v2303_v37 = vld [vmem:[#allocation2 + $0x111] sm:$0xff]  ;;  %v2094_v44 = vpack.c.bf16 %v2069_v39, %v2068_v50  ;;  %v1836_v39 = vld [vmem:[#allocation2 + $0x122] sm:$0xff] }
 0x321   : > { %2436 = vmatmul.bf16.gmra.mxu3 %v2327_v14  ;;  %2670 = vmatmul.bf16.gmra.mxu0 %v2561_v0  ;;  %v2328_v14 = vpack.c.bf16 %v2303_v37, %v2302_v4  ;;  %v2562_v0 = vpack.c.bf16 %v2537_v59, %v1834_v45  ;;  %v2070_v45 = vld [vmem:[#allocation2 + $0x120] sm:$0xff] }
 0x322   : > { %v2304_v37 = vld [vmem:[#allocation2 + $0x121] sm:$0xff] }
 0x323   : > { %v1306_v6 = vpop.f32.mrf.mxu2 }
 0x324   : > { %v1347_v13 = vadd.f32 %v1306_v6, %v1105_v41  ;;  %v1540_v22 = vpop.f32.mrf.mxu3 }
 0x325   : > { %v1106_v8 = vpop.f32.mrf.mxu1 }
 0x326   : > { %v1581_v49 = vadd.f32 %v1540_v22, %v1347_v13  ;;  %v1776_v21 = vpop.f32.mrf.mxu0  ;;  %v1107_v36 = vadd.f32 %v1106_v8, %v4531_v56 }
 0x328   : > { %v4715_v12 = vadd.f32 %v1774_v24, %v1581_v49 }
 0x32b   : > { %v1308_v3 = vpop.f32.mrf.mxu2 }
 0x32c   : > { %v1348_v7 = vadd.f32 %v1308_v3, %v1107_v36  ;;  %v1542_v62 = vpop.f32.mrf.mxu3  ;;  %v2071_v36 = vld [vmem:[#allocation2 + $0x130] sm:$0xff] }
 0x32d   : > { %v1109_v19 = vpop.f32.mrf.mxu1  ;;  %v2539_v3 = vld [vmem:[#allocation2 + $0x132] sm:$0xff] }
 0x32e   : > { %v1582_v43 = vadd.f32 %v1542_v62, %v1348_v7  ;;  %v1779_v41 = vpop.f32.mrf.mxu0  ;;  %v1110_v56 = vadd.f32 %v1109_v19, %v4543_v9  ;;  %v1860_v9 = vpack.c.bf16 %v1836_v39, %v2537_v59 }
 0x330   : > { %1972 = vmatmul.bf16.gmra.mxu1 %v1859_v30  ;;  %2207 = vmatmul.bf16.gmra.mxu2 %v2094_v44  ;;  %v4718_v24 = vadd.f32 %v1776_v21, %v1582_v43  ;;  %v2305_v21 = vld [vmem:[#allocation2 + $0x131] sm:$0xff]  ;;  %v2095_v44 = vpack.c.bf16 %v2071_v36, %v2070_v45 }
 0x331   : > { %2441 = vmatmul.bf16.gmra.mxu3 %v2328_v14  ;;  %2675 = vmatmul.bf16.gmra.mxu0 %v2562_v0  ;;  %v2329_v14 = vpack.c.bf16 %v2305_v21, %v2304_v37  ;;  %v2563_v0 = vpack.c.bf16 %v2539_v3, %v1836_v39  ;;  %v1837_v36 = vld [vmem:[#allocation2 + $0x152] sm:$0xff]  ;;  %v2072_v39 = vld [vmem:[#allocation2 + $0x160] sm:$0xff] }
 0x332   : > { %v2306_v37 = vld [vmem:[#allocation2 + $0x161] sm:$0xff] }
 0x333   : > { %v1311_v6 = vpop.f32.mrf.mxu2  ;;  %v2540_v21 = vld [vmem:[#allocation2 + $0x162] sm:$0xff] }
 0x334   : > { %v1349_v13 = vadd.f32 %v1311_v6, %v1110_v56  ;;  %v1545_v22 = vpop.f32.mrf.mxu3 }
 0x335   : > { %v1111_v8 = vpop.f32.mrf.mxu1 }
 0x336   : > { %v1583_v49 = vadd.f32 %v1545_v22, %v1349_v13  ;;  %v1781_v40 = vpop.f32.mrf.mxu0  ;;  %v1112_v4 = vadd.f32 %v1111_v8, %v4553_v18 }
 0x338   : > { %v4721_v50 = vadd.f32 %v1779_v41, %v1583_v49 }
 0x33b   : > { %v1313_v7 = vpop.f32.mrf.mxu2 }
 0x33c   : > { %v1350_v62 = vadd.f32 %v1313_v7, %v1112_v4  ;;  %v1547_v30 = vpop.f32.mrf.mxu3 }
 0x33d   : > { %v1114_v19 = vpop.f32.mrf.mxu1 }
 0x33e   : > { %v1584_v43 = vadd.f32 %v1547_v30, %v1350_v62  ;;  %v1784_v56 = vpop.f32.mrf.mxu0  ;;  %v1115_v18 = vadd.f32 %v1114_v19, %v4564_v35  ;;  %v1861_v35 = vpack.c.bf16 %v4593_v55, %v1837_v36  ;;  %v2096_v30 = vpack.c.bf16 %v4591_v52, %v2072_v39 }
 0x340   : > { %1977 = vmatmul.bf16.gmra.mxu1 %v1860_v9  ;;  %2212 = vmatmul.bf16.gmra.mxu2 %v2095_v44  ;;  %v4724_v41 = vadd.f32 %v1781_v40, %v1584_v43  ;;  %v2541_v40 = vld [vmem:[#allocation2 + $0x172] sm:$0xff]  ;;  %v2330_v44 = vpack.c.bf16 %v4595_v60, %v2306_v37  ;;  %v4741_v60 = vld [vmem:[%s273_s27] ss:$0 sm:$0xff] }
 0x341   : > { %2446 = vmatmul.bf16.gmra.mxu3 %v2329_v14  ;;  %2680 = vmatmul.bf16.gmra.mxu0 %v2563_v0  ;;  %v2564_v19 = vpack.c.bf16 %v2541_v40, %v2540_v21  ;;  %v2309_v37 = vld [vmem:[#allocation2 + $0x191] sm:$0xff] }
 0x342   : > { %v2543_v21 = vld [vmem:[#allocation2 + $0x192] sm:$0xff] }
 0x343   : > { %v1316_v6 = vpop.f32.mrf.mxu2 }
 0x344   : > { %v1351_v13 = vadd.f32 %v1316_v6, %v1115_v18  ;;  %v1550_v22 = vpop.f32.mrf.mxu3 }
 0x345   : > { %v1116_v8 = vpop.f32.mrf.mxu1 }
 0x346   : > { %v1585_v49 = vadd.f32 %v1550_v22, %v1351_v13  ;;  %v1786_v59 = vpop.f32.mrf.mxu0  ;;  %v1117_v4 = vadd.f32 %v1116_v8, %v4572_v25  ;;  %v1840_v8 = vld [vmem:[#allocation2 + $0x182] sm:$0xff] }
 0x348   : > { %v4727_v45 = vadd.f32 %v1784_v56, %v1585_v49  ;;  %v2074_v49 = vld [vmem:[#allocation2 + $0x180] sm:$0xff] }
 0x34b   : > { %v1318_v3 = vpop.f32.mrf.mxu2 }
 0x34c   : > { %v1352_v7 = vadd.f32 %v1318_v3, %v1117_v4  ;;  %v1552_v62 = vpop.f32.mrf.mxu3  ;;  %v2308_v4 = vld [vmem:[#allocation2 + $0x181] sm:$0xff] }
 0x34d   : > { %v1943_v9 = vpop.f32.mrf.mxu1 }
 0x34e   : > { %v1586_v14 = vadd.f32 %v1552_v62, %v1352_v7  ;;  %v2646_v0 = vpop.f32.mrf.mxu0  ;;  %v2023_v43 = vadd.f32 %v1943_v9, %v4589_v5  ;;  %v3493_v5 = vld [vmem:[%s5020_s5] sm:$0xff] }
 0x350   : > { %1982 = vmatmul.bf16.gmra.mxu1 %v1861_v35  ;;  %2217 = vmatmul.bf16.gmra.mxu2 %v2096_v30  ;;  %v4733_v25 = vadd.f32 %v1786_v59, %v1586_v14  ;;  %v2075_v59 = vld [vmem:[#allocation2 + $0x190] sm:$0xff]  ;;  %v1862_v30 = vpack.c.bf16 %v1840_v8, %v2541_v40  ;;  %v2565_v14 = vpack.c.bf16 %v2543_v21, %v1840_v8 }
 0x351   : > { %2451 = vmatmul.bf16.gmra.mxu3 %v2330_v44  ;;  %2685 = vmatmul.bf16.gmra.mxu0 %v2564_v19  ;;  %v2097_v9 = vpack.c.bf16 %v2075_v59, %v2074_v49  ;;  %v2331_v19 = vpack.c.bf16 %v2309_v37, %v2308_v4 }
 0x353   : > { %v2178_v56 = vpop.f32.mrf.mxu2 }
 0x354   : > { %v2258_v18 = vadd.f32 %v2178_v56, %v2023_v43  ;;  %v2412_v55 = vpop.f32.mrf.mxu3  ;;  %v3494_v56 = vld [vmem:[%s5020_s5 + $0x8] sm:$0xff] }
 0x355   : > { %v1945_v6 = vpop.f32.mrf.mxu1 }
 0x356   : > { %v2492_v52 = vadd.f32 %v2412_v55, %v2258_v18  ;;  %v2648_v13 = vpop.f32.mrf.mxu0  ;;  %v2024_v39 = vadd.f32 %v1945_v6, %v4603_v20 }
 0x358   : > { %v2726_v22 = vadd.f32 %v2646_v0, %v2492_v52 }
 0x35a   : > { %v2758_v36 = vadd.f32 %v3493_v5, %v2726_v22  ;;  %v2076_v5 = vld [vmem:[#allocation2 + $0x1a0] sm:$0xff] }
 0x35b   : > { %v2180_v3 = vpop.f32.mrf.mxu2 }
 0x35c   : > { %v2794_v7 = vadd.f32 %v4741_v60, %v2758_v36  ;;  %v2259_v62 = vadd.f32 %v2180_v3, %v2024_v39  ;;  %v2414_v35 = vpop.f32.mrf.mxu3  ;;  %v2077_v36 = vld [vmem:[#allocation2 + $0x1b0] sm:$0xff]  ;;  %v2310_v39 = vld [vmem:[#allocation2 + $0x1a1] sm:$0xff] }
 0x35d   : > { %v1948_v44 = vpop.f32.mrf.mxu1  ;;  %v2311_v3 = vld [vmem:[#allocation2 + $0x1b1] sm:$0xff] }
 0x35e   : > { %2826 = vst [vmem:[%s5020_s5] sm:$0xff] %v2794_v7  ;;  %v2493_v0 = vadd.f32 %v2414_v35, %v2259_v62  ;;  %v2651_v43 = vpop.f32.mrf.mxu0  ;;  %v2025_v18 = vadd.f32 %v1948_v44, %v4606_v31  ;;  %v3495_v31 = vld [vmem:[%s5020_s5 + $0x10] sm:$0xff]  ;;  %v2544_v7 = vld [vmem:[#allocation2 + $0x1a2] sm:$0xff] }
 0x35f   : > { %v2545_v62 = vld [vmem:[#allocation2 + $0x1b2] sm:$0xff] }
 0x360   : > { %v2727_v20 = vadd.f32 %v2648_v13, %v2493_v0  ;;  %1987 = vmatmul.bf16.gmra.mxu1 %v1862_v30  ;;  %2222 = vmatmul.bf16.gmra.mxu2 %v2097_v9 }
 0x361   : > { %2456 = vmatmul.bf16.gmra.mxu3 %v2331_v19  ;;  %2690 = vmatmul.bf16.gmra.mxu0 %v2565_v14  ;;  %v1863_v19 = vpack.c.bf16 %v4620_v26, %v2543_v21  ;;  %v2098_v14 = vpack.c.bf16 %v2077_v36, %v2076_v5  ;;  %v1844_v5 = vld [vmem:[#allocation2 + $0x1c2] sm:$0xff] }
 0x362   : > { %v2759_v40 = vadd.f32 %v3494_v56, %v2727_v20  ;;  %v2566_v20 = vpack.c.bf16 %v2545_v62, %v2544_v7  ;;  %v2078_v36 = vld [vmem:[#allocation2 + $0x1c0] sm:$0xff]  ;;  %v2547_v7 = vld [vmem:[#allocation2 + $0x1d2] sm:$0xff] }
 0x363   : > { %v2183_v55 = vpop.f32.mrf.mxu2 }
 0x364   : > { %v2795_v6 = vadd.f32 %v4741_v60, %v2759_v40  ;;  %v2260_v52 = vadd.f32 %v2183_v55, %v2025_v18  ;;  %v2417_v22 = vpop.f32.mrf.mxu3  ;;  %v3496_v18 = vld [vmem:[%s5020_s5 + $0x18] sm:$0xff] }
 0x365   : > { %v1950_v8 = vpop.f32.mrf.mxu1 }
 0x366   : > { %2827 = vst [vmem:[%s5020_s5 + $0x8] sm:$0xff] %v2795_v6  ;;  %v2494_v13 = vadd.f32 %v2417_v22, %v2260_v52  ;;  %v2653_v49 = vpop.f32.mrf.mxu0  ;;  %v2026_v37 = vadd.f32 %v1950_v8, %v4611_v46 }
 0x368   : > { %v2728_v59 = vadd.f32 %v2651_v43, %v2494_v13  ;;  %v2332_v43 = vpack.c.bf16 %v2311_v3, %v2310_v39  ;;  %v2079_v39 = vld [vmem:[#allocation2 + $0x1d0] sm:$0xff] }
 0x369   : > { %v2313_v3 = vld [vmem:[#allocation2 + $0x1d1] sm:$0xff] }
 0x36a   : > { %v2760_v4 = vadd.f32 %v3495_v31, %v2728_v59 }
 0x36b   : > { %v2185_v35 = vpop.f32.mrf.mxu2 }
 0x36c   : > { %v2796_v30 = vadd.f32 %v4741_v60, %v2760_v4  ;;  %v2261_v9 = vadd.f32 %v2185_v35, %v2026_v37  ;;  %v2419_v44 = vpop.f32.mrf.mxu3  ;;  %v2312_v37 = vld [vmem:[#allocation2 + $0x1c1] sm:$0xff] }
 0x36d   : > { %v1953_v0 = vpop.f32.mrf.mxu1 }
 0x36e   : > { %2828 = vst [vmem:[%s5020_s5 + $0x10] sm:$0xff] %v2796_v30  ;;  %v2495_v56 = vadd.f32 %v2419_v44, %v2261_v9  ;;  %v2656_v46 = vpop.f32.mrf.mxu0  ;;  %v2027_v21 = vadd.f32 %v1953_v0, %v4618_v57  ;;  %v3497_v57 = vld [vmem:[%s5020_s5 + $0x20] sm:$0xff] }
 0x370   : > { %v2729_v40 = vadd.f32 %v2653_v49, %v2495_v56  ;;  %1992 = vmatmul.bf16.gmra.mxu1 %v1863_v19  ;;  %2227 = vmatmul.bf16.gmra.mxu2 %v2098_v14  ;;  %v1864_v19 = vpack.c.bf16 %v1844_v5, %v2545_v62  ;;  %v2099_v14 = vpack.c.bf16 %v2079_v39, %v2078_v36 }
 0x371   : > { %2461 = vmatmul.bf16.gmra.mxu3 %v2332_v43  ;;  %2695 = vmatmul.bf16.gmra.mxu0 %v2566_v20  ;;  %v2333_v43 = vpack.c.bf16 %v2313_v3, %v2312_v37  ;;  %v2567_v20 = vpack.c.bf16 %v2547_v7, %v1844_v5  ;;  %v2081_v5 = vld [vmem:[#allocation2 + $0x210] sm:$0xff] }
 0x372   : > { %v2761_v26 = vadd.f32 %v3496_v18, %v2729_v40  ;;  %v3498_v40 = vld [vmem:[%s5020_s5 + $0x28] sm:$0xff] }
 0x373   : > { %v2188_v55 = vpop.f32.mrf.mxu2 }
 0x374   : > { %v2797_v6 = vadd.f32 %v4741_v60, %v2761_v26  ;;  %v2262_v52 = vadd.f32 %v2188_v55, %v2027_v21  ;;  %v2422_v22 = vpop.f32.mrf.mxu3 }
 0x375   : > { %v1955_v8 = vpop.f32.mrf.mxu1 }
 0x376   : > { %2829 = vst [vmem:[%s5020_s5 + $0x18] sm:$0xff] %v2797_v6  ;;  %v2496_v13 = vadd.f32 %v2422_v22, %v2262_v52  ;;  %v2658_v49 = vpop.f32.mrf.mxu0  ;;  %v2028_v4 = vadd.f32 %v1955_v8, %v4627_v54 }
 0x378   : > { %v2730_v59 = vadd.f32 %v2656_v46, %v2496_v13 }
 0x37a   : > { %v2762_v31 = vadd.f32 %v3497_v57, %v2730_v59  ;;  %v2080_v59 = vld [vmem:[#allocation2 + $0x200] sm:$0xff] }
 0x37b   : > { %v2190_v35 = vpop.f32.mrf.mxu2  ;;  %v2314_v57 = vld [vmem:[#allocation2 + $0x201] sm:$0xff] }
 0x37c   : > { %v2798_v30 = vadd.f32 %v4741_v60, %v2762_v31  ;;  %v2263_v9 = vadd.f32 %v2190_v35, %v2028_v4  ;;  %v2424_v44 = vpop.f32.mrf.mxu3  ;;  %v2548_v31 = vld [vmem:[#allocation2 + $0x202] sm:$0xff]  ;;  %v2549_v4 = vld [vmem:[#allocation2 + $0x212] sm:$0xff] }
 0x37d   : > { %v1958_v0 = vpop.f32.mrf.mxu1 }
 0x37e   : > { %2830 = vst [vmem:[%s5020_s5 + $0x20] sm:$0xff] %v2798_v30  ;;  %v2497_v56 = vadd.f32 %v2424_v44, %v2263_v9  ;;  %v2661_v46 = vpop.f32.mrf.mxu0  ;;  %v2029_v18 = vadd.f32 %v1958_v0, %v4630_v29  ;;  %v3499_v29 = vld [vmem:[%s5020_s5 + $0x30] sm:$0xff]  ;;  %v2100_v9 = vpack.c.bf16 %v2081_v5, %v2080_v59 }
 0x37f   : > { %v2551_v59 = vld [vmem:[#allocation2 + $0x232] sm:$0xff] }
 0x380   : > { %v2731_v54 = vadd.f32 %v2658_v49, %v2497_v56  ;;  %1997 = vmatmul.bf16.gmra.mxu1 %v1864_v19  ;;  %2232 = vmatmul.bf16.gmra.mxu2 %v2099_v14  ;;  %v1845_v49 = vld [vmem:[#allocation2 + $0x1f2] sm:$0xff]  ;;  %v2334_v19 = vpack.c.bf16 %v4654_v53, %v2314_v57  ;;  %v2568_v14 = vpack.c.bf16 %v2549_v4, %v2548_v31 }
 0x381   : > { %2466 = vmatmul.bf16.gmra.mxu3 %v2333_v43  ;;  %2700 = vmatmul.bf16.gmra.mxu0 %v2567_v20  ;;  %v1865_v30 = vpack.c.bf16 %v4651_v17, %v1845_v49  ;;  %v3500_v17 = vld [vmem:[%s5020_s5 + $0x38] sm:$0xff] }
 0x382   : > { %v2763_v62 = vadd.f32 %v3498_v40, %v2731_v54  ;;  %v2317_v49 = vld [vmem:[#allocation2 + $0x231] sm:$0xff] }
 0x383   : > { %v2193_v26 = vpop.f32.mrf.mxu2 }
 0x384   : > { %v2799_v21 = vadd.f32 %v4741_v60, %v2763_v62  ;;  %v2264_v55 = vadd.f32 %v2193_v26, %v2029_v18  ;;  %v2427_v6 = vpop.f32.mrf.mxu3 }
 0x385   : > { %v1960_v52 = vpop.f32.mrf.mxu1 }
 0x386   : > { %2831 = vst [vmem:[%s5020_s5 + $0x28] sm:$0xff] %v2799_v21  ;;  %v2498_v22 = vadd.f32 %v2427_v6, %v2264_v55  ;;  %v2663_v8 = vpop.f32.mrf.mxu0  ;;  %v2030_v39 = vadd.f32 %v1960_v52, %v4632_v16  ;;  %v1848_v55 = vld [vmem:[#allocation2 + $0x222] sm:$0xff]  ;;  %v2083_v52 = vld [vmem:[#allocation2 + $0x230] sm:$0xff] }
 0x387   : > { %v2082_v6 = vld [vmem:[#allocation2 + $0x220] sm:$0xff]  ;;  %v1866_v57 = vpack.c.bf16 %v1848_v55, %v2549_v4 }
 0x388   : > { %v2732_v13 = vadd.f32 %v2661_v46, %v2498_v22  ;;  %v2101_v31 = vpack.c.bf16 %v2083_v52, %v2082_v6 }
 0x38a   : > { %v2764_v36 = vadd.f32 %v3499_v29, %v2732_v13  ;;  %v2316_v13 = vld [vmem:[#allocation2 + $0x221] sm:$0xff] }
 0x38b   : > { %v2195_v37 = vpop.f32.mrf.mxu2 }
 0x38c   : > { %v2800_v3 = vadd.f32 %v4741_v60, %v2764_v36  ;;  %v2265_v7 = vadd.f32 %v2195_v37, %v2030_v39  ;;  %v2429_v35 = vpop.f32.mrf.mxu3 }
 0x38d   : > { %v1963_v44 = vpop.f32.mrf.mxu1 }
 0x38e   : > { %2832 = vst [vmem:[%s5020_s5 + $0x30] sm:$0xff] %v2800_v3  ;;  %v2499_v16 = vadd.f32 %v2429_v35, %v2265_v7  ;;  %v2666_v0 = vpop.f32.mrf.mxu0  ;;  %v2031_v56 = vadd.f32 %v1963_v44, %v4649_v27  ;;  %v3501_v27 = vld [vmem:[%s5020_s5 + $0x40] sm:$0xff]  ;;  %v2335_v3 = vpack.c.bf16 %v2317_v49, %v2316_v13  ;;  %v2569_v7 = vpack.c.bf16 %v2551_v59, %v1848_v55 }
 0x390   : > { %v2733_v43 = vadd.f32 %v2663_v8, %v2499_v16  ;;  %2002 = vmatmul.bf16.gmra.mxu1 %v1865_v30  ;;  %2237 = vmatmul.bf16.gmra.mxu2 %v2100_v9  ;;  %v3502_v9 = vld [vmem:[%s5020_s5 + $0x48] sm:$0xff] }
 0x391   : > { %2471 = vmatmul.bf16.gmra.mxu3 %v2334_v19  ;;  %2705 = vmatmul.bf16.gmra.mxu0 %v2568_v14 }
 0x392   : > { %v2765_v20 = vadd.f32 %v3500_v17, %v2733_v43 }
 0x393   : > { %v2198_v53 = vpop.f32.mrf.mxu2 }
 0x394   : > { %v2801_v46 = vadd.f32 %v4741_v60, %v2765_v20  ;;  %v2266_v54 = vadd.f32 %v2198_v53, %v2031_v56  ;;  %v2432_v40 = vpop.f32.mrf.mxu3  ;;  %v1850_v53 = vld [vmem:[#allocation2 + $0x242] sm:$0xff] }
 0x395   : > { %v1965_v62 = vpop.f32.mrf.mxu1 }
 0x396   : > { %2833 = vst [vmem:[%s5020_s5 + $0x38] sm:$0xff] %v2801_v46  ;;  %v2500_v18 = vadd.f32 %v2432_v40, %v2266_v54  ;;  %v2668_v26 = vpop.f32.mrf.mxu0  ;;  %v2032_v8 = vadd.f32 %v1965_v62, %v4658_v48  ;;  %v2084_v46 = vld [vmem:[#allocation2 + $0x240] sm:$0xff]  ;;  %v2085_v54 = vld [vmem:[#allocation2 + $0x250] sm:$0xff] }
 0x398   : > { %v2734_v21 = vadd.f32 %v2666_v0, %v2500_v18  ;;  %v2318_v18 = vld [vmem:[#allocation2 + $0x241] sm:$0xff] }
 0x399   : > { %v2336_v13 = vpack.c.bf16 %v4670_v1, %v2318_v18 }
 0x39a   : > { %v2766_v22 = vadd.f32 %v3501_v27, %v2734_v21  ;;  %v1867_v27 = vpack.c.bf16 %v1850_v53, %v2551_v59  ;;  %v3504_v59 = vld [vmem:[%s5020_s5 + $0x58] sm:$0xff] }
 0x39b   : > { %v2200_v5 = vpop.f32.mrf.mxu2 }
 0x39c   : > { %v2802_v29 = vadd.f32 %v4741_v60, %v2766_v22  ;;  %v2267_v36 = vadd.f32 %v2200_v5, %v2032_v8  ;;  %v2434_v39 = vpop.f32.mrf.mxu3  ;;  %v2102_v22 = vpack.c.bf16 %v2085_v54, %v2084_v46 }
 0x39d   : > { %v1968_v37 = vpop.f32.mrf.mxu1 }
 0x39e   : > { %2834 = vst [vmem:[%s5020_s5 + $0x40] sm:$0xff] %v2802_v29  ;;  %v2501_v35 = vadd.f32 %v2434_v39, %v2267_v36  ;;  %v2671_v30 = vpop.f32.mrf.mxu0  ;;  %v2033_v44 = vadd.f32 %v1968_v37, %v4661_v51  ;;  %v3503_v51 = vld [vmem:[%s5020_s5 + $0x50] sm:$0xff] }
 0x3a0   : > { %v2735_v48 = vadd.f32 %v2668_v26, %v2501_v35  ;;  %2007 = vmatmul.bf16.gmra.mxu1 %v1866_v57  ;;  %2242 = vmatmul.bf16.gmra.mxu2 %v2101_v31  ;;  %v2553_v26 = vld [vmem:[#allocation2 + $0x252] sm:$0xff] }
 0x3a1   : > { %2476 = vmatmul.bf16.gmra.mxu3 %v2335_v3  ;;  %2710 = vmatmul.bf16.gmra.mxu0 %v2569_v7  ;;  %v2570_v49 = vpack.c.bf16 %v2553_v26, %v1850_v53 }
 0x3a2   : > { %v2767_v4 = vadd.f32 %v3502_v9, %v2735_v48  ;;  %v1852_v48 = vld [vmem:[#allocation2 + $0x262] sm:$0xff] }
 0x3a3   : > { %v2203_v19 = vpop.f32.mrf.mxu2  ;;  %v2086_v9 = vld [vmem:[#allocation2 + $0x260] sm:$0xff]  ;;  %v1868_v53 = vpack.c.bf16 %v1852_v48, %v2553_v26 }
 0x3a4   : > { %v2803_v14 = vadd.f32 %v4741_v60, %v2767_v4  ;;  %v2268_v16 = vadd.f32 %v2203_v19, %v2033_v44  ;;  %v2437_v0 = vpop.f32.mrf.mxu3  ;;  %v2087_v4 = vld [vmem:[#allocation2 + $0x270] sm:$0xff] }
 0x3a5   : > { %v1970_v43 = vpop.f32.mrf.mxu1  ;;  %v2103_v46 = vpack.c.bf16 %v2087_v4, %v2086_v9 }
 0x3a6   : > { %2835 = vst [vmem:[%s5020_s5 + $0x48] sm:$0xff] %v2803_v14  ;;  %v2502_v17 = vadd.f32 %v2437_v0, %v2268_v16  ;;  %v2673_v20 = vpop.f32.mrf.mxu0  ;;  %v2034_v62 = vadd.f32 %v1970_v43, %v4664_v42  ;;  %v2320_v14 = vld [vmem:[#allocation2 + $0x261] sm:$0xff]  ;;  %v2321_v16 = vld [vmem:[#allocation2 + $0x271] sm:$0xff] }
 0x3a7   : > { %v2555_v0 = vld [vmem:[#allocation2 + $0x272] sm:$0xff] }
 0x3a8   : > { %v2736_v56 = vadd.f32 %v2671_v30, %v2502_v17 }
 0x3aa   : > { %v2768_v40 = vadd.f32 %v3503_v51, %v2736_v56  ;;  %v2337_v51 = vpack.c.bf16 %v2321_v16, %v2320_v14  ;;  %v3509_v16 = vld [vmem:[%s5020_s5 + $0x80] sm:$0xff] }
 0x3ab   : > { %v2205_v21 = vpop.f32.mrf.mxu2 }
 0x3ac   : > { %v2804_v55 = vadd.f32 %v4741_v60, %v2768_v40  ;;  %v2269_v6 = vadd.f32 %v2205_v21, %v2034_v62  ;;  %v2439_v52 = vpop.f32.mrf.mxu3  ;;  %v2571_v40 = vpack.c.bf16 %v2555_v0, %v1852_v48  ;;  %v3506_v21 = vld [vmem:[%s5020_s5 + $0x68] sm:$0xff] }
 0x3ad   : > { %v1973_v8 = vpop.f32.mrf.mxu1 }
 0x3ae   : > { %2836 = vst [vmem:[%s5020_s5 + $0x50] sm:$0xff] %v2804_v55  ;;  %v2503_v5 = vadd.f32 %v2439_v52, %v2269_v6  ;;  %v2676_v29 = vpop.f32.mrf.mxu0  ;;  %v2035_v39 = vadd.f32 %v1973_v8, %v4667_v47  ;;  %v3505_v47 = vld [vmem:[%s5020_s5 + $0x60] sm:$0xff] }
 0x3b0   : > { %v2737_v42 = vadd.f32 %v2673_v20, %v2503_v5  ;;  %2012 = vmatmul.bf16.gmra.mxu1 %v1867_v27  ;;  %2247 = vmatmul.bf16.gmra.mxu2 %v2102_v22 }
 0x3b1   : > { %2481 = vmatmul.bf16.gmra.mxu3 %v2336_v13  ;;  %2715 = vmatmul.bf16.gmra.mxu0 %v2570_v49 }
 0x3b2   : > { %v2769_v36 = vadd.f32 %v3504_v59, %v2737_v42 }
 0x3b3   : > { %v2208_v1 = vpop.f32.mrf.mxu2 }
 0x3b4   : > { %v2805_v57 = vadd.f32 %v4741_v60, %v2769_v36  ;;  %v2270_v31 = vadd.f32 %v2208_v1, %v2035_v39  ;;  %v2442_v37 = vpop.f32.mrf.mxu3 }
 0x3b5   : > { %v1975_v3 = vpop.f32.mrf.mxu1 }
 0x3b6   : > { %2837 = vst [vmem:[%s5020_s5 + $0x58] sm:$0xff] %v2805_v57  ;;  %v2504_v7 = vadd.f32 %v2442_v37, %v2270_v31  ;;  %v2678_v35 = vpop.f32.mrf.mxu0  ;;  %v2036_v19 = vadd.f32 %v1975_v3, %v4675_v34 }
 0x3b8   : > { %v2738_v30 = vadd.f32 %v2676_v29, %v2504_v7  ;;  %v3507_v29 = vld [vmem:[%s5020_s5 + $0x70] sm:$0xff]  ;;  %v3508_v7 = vld [vmem:[%s5020_s5 + $0x78] sm:$0xff] }
 0x3ba   : > { %v2770_v44 = vadd.f32 %v3505_v47, %v2738_v30 }
 0x3bb   : > { %v2210_v43 = vpop.f32.mrf.mxu2 }
 0x3bc   : > { %v2806_v17 = vadd.f32 %v4741_v60, %v2770_v44  ;;  %v2271_v20 = vadd.f32 %v2210_v43, %v2036_v19  ;;  %v2444_v56 = vpop.f32.mrf.mxu3 }
 0x3bd   : > { %v1978_v54 = vpop.f32.mrf.mxu1 }
 0x3be   : > { %2838 = vst [vmem:[%s5020_s5 + $0x60] sm:$0xff] %v2806_v17  ;;  %v2505_v62 = vadd.f32 %v2444_v56, %v2271_v20  ;;  %v2681_v18 = vpop.f32.mrf.mxu0  ;;  %v2037_v55 = vadd.f32 %v1978_v54, %v4678_v15 }
 0x3c0   : > { %v2739_v34 = vadd.f32 %v2678_v35, %v2505_v62  ;;  %2017 = vmatmul.bf16.gmra.mxu1 %v1868_v53  ;;  %2252 = vmatmul.bf16.gmra.mxu2 %v2103_v46 }
 0x3c1   : > { %2486 = vmatmul.bf16.gmra.mxu3 %v2337_v51  ;;  %2720 = vmatmul.bf16.gmra.mxu0 %v2571_v40  ;;  %v3510_v40 = vld [vmem:[%s5020_s5 + $0x88] sm:$0xff] }
 0x3c2   : > { %v2771_v26 = vadd.f32 %v3506_v21, %v2739_v34 }
 0x3c3   : > { %v2213_v6 = vpop.f32.mrf.mxu2 }
 0x3c4   : > { %v2807_v52 = vadd.f32 %v4741_v60, %v2771_v26  ;;  %v2272_v27 = vadd.f32 %v2213_v6, %v2037_v55  ;;  %v2447_v22 = vpop.f32.mrf.mxu3 }
 0x3c5   : > { %v1980_v8 = vpop.f32.mrf.mxu1 }
 0x3c6   : > { %2839 = vst [vmem:[%s5020_s5 + $0x68] sm:$0xff] %v2807_v52  ;;  %v2506_v13 = vadd.f32 %v2447_v22, %v2272_v27  ;;  %v2683_v49 = vpop.f32.mrf.mxu0  ;;  %v2038_v15 = vadd.f32 %v1980_v8, %v4682_v2  ;;  %v3511_v22 = vld [vmem:[%s5020_s5 + $0x90] sm:$0xff] }
 0x3c8   : > { %v2740_v5 = vadd.f32 %v2681_v18, %v2506_v13 }
 0x3ca   : > { %v2772_v42 = vadd.f32 %v3507_v29, %v2740_v5 }
 0x3cb   : > { %v2215_v59 = vpop.f32.mrf.mxu2 }
 0x3cc   : > { %v2808_v36 = vadd.f32 %v4741_v60, %v2772_v42  ;;  %v2273_v39 = vadd.f32 %v2215_v59, %v2038_v15  ;;  %v2449_v1 = vpop.f32.mrf.mxu3 }
 0x3cd   : > { %v1983_v57 = vpop.f32.mrf.mxu1 }
 0x3ce   : > { %2840 = vst [vmem:[%s5020_s5 + $0x70] sm:$0xff] %v2808_v36  ;;  %v2507_v31 = vadd.f32 %v2449_v1, %v2273_v39  ;;  %v2686_v37 = vpop.f32.mrf.mxu0  ;;  %v2039_v2 = vadd.f32 %v1983_v57, %v4685_v32  ;;  %v3512_v39 = vld [vmem:[%s5020_s5 + $0x98] sm:$0xff] }
 0x3d0   : > { %v2741_v3 = vadd.f32 %v2683_v49, %v2507_v31 }
 0x3d2   : > { %v2773_v35 = vadd.f32 %v3508_v7, %v2741_v3 }
 0x3d3   : > { %v2218_v30 = vpop.f32.mrf.mxu2 }
 0x3d4   : > { %v2809_v48 = vadd.f32 %v4741_v60, %v2773_v35  ;;  %v2274_v9 = vadd.f32 %v2218_v30, %v2039_v2  ;;  %v2452_v4 = vpop.f32.mrf.mxu3 }
 0x3d5   : > { %v1985_v47 = vpop.f32.mrf.mxu1 }
 0x3d6   : > { %2841 = vst [vmem:[%s5020_s5 + $0x78] sm:$0xff] %v2809_v48  ;;  %v2508_v44 = vadd.f32 %v2452_v4, %v2274_v9  ;;  %v2688_v19 = vpop.f32.mrf.mxu0  ;;  %v2040_v32 = vadd.f32 %v1985_v47, %v4688_v10  ;;  %v3513_v48 = vld [vmem:[%s5020_s5 + $0xa0] sm:$0xff] }
 0x3d8   : > { %v2742_v14 = vadd.f32 %v2686_v37, %v2508_v44 }
 0x3da   : > { %v2774_v0 = vadd.f32 %v3509_v16, %v2742_v14 }
 0x3db   : > { %v2220_v43 = vpop.f32.mrf.mxu2 }
 0x3dc   : > { %v2810_v17 = vadd.f32 %v4741_v60, %v2774_v0  ;;  %v2275_v20 = vadd.f32 %v2220_v43, %v2040_v32  ;;  %v2454_v56 = vpop.f32.mrf.mxu3  ;;  %v3514_v43 = vld [vmem:[%s5020_s5 + $0xa8] sm:$0xff] }
 0x3dd   : > { %v1988_v53 = vpop.f32.mrf.mxu1 }
 0x3de   : > { %2842 = vst [vmem:[%s5020_s5 + $0x80] sm:$0xff] %v2810_v17  ;;  %v2509_v46 = vadd.f32 %v2454_v56, %v2275_v20  ;;  %v2691_v54 = vpop.f32.mrf.mxu0  ;;  %v2041_v10 = vadd.f32 %v1988_v53, %v4691_v33 }
 0x3e0   : > { %v2743_v51 = vadd.f32 %v2688_v19, %v2509_v46 }
 0x3e2   : > { %v2775_v62 = vadd.f32 %v3510_v40, %v2743_v51 }
 0x3e3   : > { %v2223_v18 = vpop.f32.mrf.mxu2 }
 0x3e4   : > { %v2811_v34 = vadd.f32 %v4741_v60, %v2775_v62  ;;  %v2276_v21 = vadd.f32 %v2223_v18, %v2041_v10  ;;  %v2457_v26 = vpop.f32.mrf.mxu3  ;;  %v3515_v10 = vld [vmem:[%s5020_s5 + $0xb0] sm:$0xff] }
 0x3e5   : > { %v1990_v55 = vpop.f32.mrf.mxu1 }
 0x3e6   : > { %2843 = vst [vmem:[%s5020_s5 + $0x88] sm:$0xff] %v2811_v34  ;;  %v2510_v6 = vadd.f32 %v2457_v26, %v2276_v21  ;;  %v2693_v52 = vpop.f32.mrf.mxu0  ;;  %v2042_v33 = vadd.f32 %v1990_v55, %v4694_v23 }
 0x3e8   : > { %v2744_v27 = vadd.f32 %v2691_v54, %v2510_v6 }
 0x3ea   : > { %v2776_v8 = vadd.f32 %v3511_v22, %v2744_v27 }
 0x3eb   : > { %v2225_v13 = vpop.f32.mrf.mxu2 }
 0x3ec   : > { %v2812_v49 = vadd.f32 %v4741_v60, %v2776_v8  ;;  %v2277_v5 = vadd.f32 %v2225_v13, %v2042_v33  ;;  %v2459_v29 = vpop.f32.mrf.mxu3  ;;  %v3516_v8 = vld [vmem:[%s5020_s5 + $0xb8] sm:$0xff] }
 0x3ed   : > { %v1993_v42 = vpop.f32.mrf.mxu1 }
 0x3ee   : > { %2844 = vst [vmem:[%s5020_s5 + $0x90] sm:$0xff] %v2812_v49  ;;  %v2511_v15 = vadd.f32 %v2459_v29, %v2277_v5  ;;  %v2696_v59 = vpop.f32.mrf.mxu0  ;;  %v2043_v23 = vadd.f32 %v1993_v42, %v4697_v28 }
 0x3f0   : > { %v2745_v36 = vadd.f32 %v2693_v52, %v2511_v15 }
 0x3f2   : > { %v2777_v1 = vadd.f32 %v3512_v39, %v2745_v36  ;;  %v3517_v39 = vld [vmem:[%s5020_s5 + $0xc0] sm:$0xff] }
 0x3f3   : > { %v2228_v57 = vpop.f32.mrf.mxu2 }
 0x3f4   : > { %v2813_v31 = vadd.f32 %v4741_v60, %v2777_v1  ;;  %v2278_v37 = vadd.f32 %v2228_v57, %v2043_v23  ;;  %v2462_v3 = vpop.f32.mrf.mxu3 }
 0x3f5   : > { %v1995_v7 = vpop.f32.mrf.mxu1 }
 0x3f6   : > { %2845 = vst [vmem:[%s5020_s5 + $0x98] sm:$0xff] %v2813_v31  ;;  %v2512_v35 = vadd.f32 %v2462_v3, %v2278_v37  ;;  %v2698_v2 = vpop.f32.mrf.mxu0  ;;  %v2044_v28 = vadd.f32 %v1995_v7, %v4700_v38 }
 0x3f8   : > { %v2746_v30 = vadd.f32 %v2696_v59, %v2512_v35 }
 0x3fa   : > { %v2778_v9 = vadd.f32 %v3513_v48, %v2746_v30  ;;  %v3518_v30 = vld [vmem:[%s5020_s5 + $0xc8] sm:$0xff] }
 0x3fb   : > { %v2230_v4 = vpop.f32.mrf.mxu2 }
 0x3fc   : > { %v2814_v47 = vadd.f32 %v4741_v60, %v2778_v9  ;;  %v2279_v44 = vadd.f32 %v2230_v4, %v2044_v28  ;;  %v2464_v19 = vpop.f32.mrf.mxu3 }
 0x3fd   : > { %v1998_v14 = vpop.f32.mrf.mxu1 }
 0x3fe   : > { %2846 = vst [vmem:[%s5020_s5 + $0xa0] sm:$0xff] %v2814_v47  ;;  %v2513_v16 = vadd.f32 %v2464_v19, %v2279_v44  ;;  %v2701_v0 = vpop.f32.mrf.mxu0  ;;  %v2045_v38 = vadd.f32 %v1998_v14, %v4703_v11 }
 0x400   : > { %v2747_v32 = vadd.f32 %v2698_v2, %v2513_v16 }
 0x402   : > { %v2779_v17 = vadd.f32 %v3514_v43, %v2747_v32 }
 0x403   : > { %v2233_v20 = vpop.f32.mrf.mxu2 }
 0x404   : > { %v2815_v56 = vadd.f32 %v4741_v60, %v2779_v17  ;;  %v2280_v53 = vadd.f32 %v2233_v20, %v2045_v38  ;;  %v2467_v46 = vpop.f32.mrf.mxu3 }
 0x405   : > { %v2000_v54 = vpop.f32.mrf.mxu1 }
 0x406   : > { %2847 = vst [vmem:[%s5020_s5 + $0xa8] sm:$0xff] %v2815_v56  ;;  %v2514_v51 = vadd.f32 %v2467_v46, %v2280_v53  ;;  %v2703_v40 = vpop.f32.mrf.mxu0  ;;  %v2046_v11 = vadd.f32 %v2000_v54, %v4706_v61 }
 0x408   : > { %v2748_v62 = vadd.f32 %v2701_v0, %v2514_v51  ;;  %v3519_v0 = vld [vmem:[%s5020_s5 + $0xd0] sm:$0xff]  ;;  %v3520_v51 = vld [vmem:[%s5020_s5 + $0xd8] sm:$0xff] }
 0x40a   : > { %v2780_v18 = vadd.f32 %v3515_v10, %v2748_v62 }
 0x40b   : > { %v2235_v34 = vpop.f32.mrf.mxu2 }
 0x40c   : > { %v2816_v21 = vadd.f32 %v4741_v60, %v2780_v18  ;;  %v2281_v26 = vadd.f32 %v2235_v34, %v2046_v11  ;;  %v2469_v55 = vpop.f32.mrf.mxu3 }
 0x40d   : > { %v2003_v6 = vpop.f32.mrf.mxu1 }
 0x40e   : > { %2848 = vst [vmem:[%s5020_s5 + $0xb0] sm:$0xff] %v2816_v21  ;;  %v2515_v52 = vadd.f32 %v2469_v55, %v2281_v26  ;;  %v2706_v27 = vpop.f32.mrf.mxu0  ;;  %v2047_v61 = vadd.f32 %v2003_v6, %v4709_v58  ;;  %v3521_v55 = vld [vmem:[%s5020_s5 + $0xe0] sm:$0xff] }
 0x410   : > { %v2749_v22 = vadd.f32 %v2703_v40, %v2515_v52 }
 0x412   : > { %v2781_v33 = vadd.f32 %v3516_v8, %v2749_v22 }
 0x413   : > { %v2238_v13 = vpop.f32.mrf.mxu2 }
 0x414   : > { %v2817_v49 = vadd.f32 %v4741_v60, %v2781_v33  ;;  %v2282_v5 = vadd.f32 %v2238_v13, %v2047_v61  ;;  %v2472_v29 = vpop.f32.mrf.mxu3 }
 0x415   : > { %v2005_v42 = vpop.f32.mrf.mxu1 }
 0x416   : > { %2849 = vst [vmem:[%s5020_s5 + $0xb8] sm:$0xff] %v2817_v49  ;;  %v2516_v15 = vadd.f32 %v2472_v29, %v2282_v5  ;;  %v2708_v59 = vpop.f32.mrf.mxu0  ;;  %v2048_v58 = vadd.f32 %v2005_v42, %v4712_v63  ;;  %v3522_v5 = vld [vmem:[%s5020_s5 + $0xe8] sm:$0xff] }
 0x418   : > { %v2750_v36 = vadd.f32 %v2706_v27, %v2516_v15 }
 0x41a   : > { %v2782_v1 = vadd.f32 %v3517_v39, %v2750_v36 }
 0x41b   : > { %v2240_v23 = vpop.f32.mrf.mxu2 }
 0x41c   : > { %v2818_v57 = vadd.f32 %v4741_v60, %v2782_v1  ;;  %v2283_v31 = vadd.f32 %v2240_v23, %v2048_v58  ;;  %v2474_v37 = vpop.f32.mrf.mxu3 }
 0x41d   : > { %v2008_v3 = vpop.f32.mrf.mxu1 }
 0x41e   : > { %2850 = vst [vmem:[%s5020_s5 + $0xc0] sm:$0xff] %v2818_v57  ;;  %v2517_v7 = vadd.f32 %v2474_v37, %v2283_v31  ;;  %v2711_v35 = vpop.f32.mrf.mxu0  ;;  %v2049_v63 = vadd.f32 %v2008_v3, %v4715_v12  ;;  %v3523_v57 = vld [vmem:[%s5020_s5 + $0xf0] sm:$0xff] }
 0x420   : > { %v2751_v2 = vadd.f32 %v2708_v59, %v2517_v7 }
 0x422   : > { %v2783_v48 = vadd.f32 %v3518_v30, %v2751_v2 }
 0x423   : > { %v2243_v9 = vpop.f32.mrf.mxu2 }
 0x424   : > { %v2819_v28 = vadd.f32 %v4741_v60, %v2783_v48  ;;  %v2284_v4 = vadd.f32 %v2243_v9, %v2049_v63  ;;  %v2477_v47 = vpop.f32.mrf.mxu3  ;;  %v3524_v63 = vld [vmem:[%s5020_s5 + $0xf8] sm:$0xff] }
 0x425   : > { %v2010_v44 = vpop.f32.mrf.mxu1 }
 0x426   : > { %2851 = vst [vmem:[%s5020_s5 + $0xc8] sm:$0xff] %v2819_v28  ;;  %v2518_v19 = vadd.f32 %v2477_v47, %v2284_v4  ;;  %v2713_v14 = vpop.f32.mrf.mxu0  ;;  %v2050_v12 = vadd.f32 %v2010_v44, %v4718_v24 }
 0x428   : > { %v2752_v16 = vadd.f32 %v2711_v35, %v2518_v19 }
 0x42a   : > { %v2784_v32 = vadd.f32 %v3519_v0, %v2752_v16 }
 0x42b   : > { %v2245_v43 = vpop.f32.mrf.mxu2 }
 0x42c   : > { %v2820_v17 = vadd.f32 %v4741_v60, %v2784_v32  ;;  %v2285_v38 = vadd.f32 %v2245_v43, %v2050_v12  ;;  %v2479_v20 = vpop.f32.mrf.mxu3 }
 0x42d   : > { %v2013_v56 = vpop.f32.mrf.mxu1 }
 0x42e   : > { %2852 = vst [vmem:[%s5020_s5 + $0xd0] sm:$0xff] %v2820_v17  ;;  %v2519_v53 = vadd.f32 %v2479_v20, %v2285_v38  ;;  %v2716_v54 = vpop.f32.mrf.mxu0  ;;  %v2051_v24 = vadd.f32 %v2013_v56, %v4721_v50 }
 0x430   : > { %v2753_v46 = vadd.f32 %v2713_v14, %v2519_v53 }
 0x432   : > { %v2785_v40 = vadd.f32 %v3520_v51, %v2753_v46 }
 0x433   : > { %v2248_v62 = vpop.f32.mrf.mxu2 }
 0x434   : > { %v2821_v10 = vadd.f32 %v4741_v60, %v2785_v40  ;;  %v2286_v18 = vadd.f32 %v2248_v62, %v2051_v24  ;;  %v2482_v11 = vpop.f32.mrf.mxu3 }
 0x435   : > { %v2015_v34 = vpop.f32.mrf.mxu1 }
 0x436   : > { %2853 = vst [vmem:[%s5020_s5 + $0xd8] sm:$0xff] %v2821_v10  ;;  %v2520_v21 = vadd.f32 %v2482_v11, %v2286_v18  ;;  %v2052_v52 = vadd.f32 %v2015_v34, %v4724_v41  ;;  %v2718_v50 = vpop.f32.mrf.mxu0 }
 0x438   : > { %v2754_v26 = vadd.f32 %v2716_v54, %v2520_v21 }
 0x43a   : > { %v2786_v6 = vadd.f32 %v3521_v55, %v2754_v26 }
 0x43b   : > { %v2250_v27 = vpop.f32.mrf.mxu2 }
 0x43c   : > { %v2822_v22 = vadd.f32 %v4741_v60, %v2786_v6  ;;  %v2287_v8 = vadd.f32 %v2250_v27, %v2052_v52  ;;  %v2484_v33 = vpop.f32.mrf.mxu3 }
 0x43d   : > { %v2018_v61 = vpop.f32.mrf.mxu1 }
 0x43e   : > { %2854 = vst [vmem:[%s5020_s5 + $0xe0] sm:$0xff] %v2822_v22  ;;  %v2521_v13 = vadd.f32 %v2484_v33, %v2287_v8  ;;  %v2053_v41 = vadd.f32 %v2018_v61, %v4727_v45  ;;  %v2721_v39 = vpop.f32.mrf.mxu0 }
 0x440   : > { %v2755_v49 = vadd.f32 %v2718_v50, %v2521_v13 }
 0x442   : > { %v2787_v29 = vadd.f32 %v3522_v5, %v2755_v49 }
 0x443   : > { %v2253_v42 = vpop.f32.mrf.mxu2 }
 0x444   : > { %v2823_v15 = vadd.f32 %v4741_v60, %v2787_v29  ;;  %v2288_v59 = vadd.f32 %v2253_v42, %v2053_v41  ;;  %v2487_v36 = vpop.f32.mrf.mxu3 }
 0x445   : > { %v2020_v58 = vpop.f32.mrf.mxu1 }
 0x446   : > { %2855 = vst [vmem:[%s5020_s5 + $0xe8] sm:$0xff] %v2823_v15  ;;  %v2522_v1 = vadd.f32 %v2487_v36, %v2288_v59  ;;  %v2054_v45 = vadd.f32 %v2020_v58, %v4733_v25  ;;  %v2723_v30 = vpop.f32.mrf.mxu0 }
 0x448   : > { %v2756_v23 = vadd.f32 %v2721_v39, %v2522_v1 }
 0x44a   : > { %v2788_v31 = vadd.f32 %v3523_v57, %v2756_v23 }
 0x44b   : > { %v2255_v37 = vpop.f32.mrf.mxu2 }
 0x44c   : > { %v2824_v3 = vadd.f32 %v4741_v60, %v2788_v31  ;;  %v2289_v7 = vadd.f32 %v2255_v37, %v2054_v45  ;;  %v2489_v35 = vpop.f32.mrf.mxu3 }
 0x44e   : > { %2856 = vst [vmem:[%s5020_s5 + $0xf0] sm:$0xff] %v2824_v3  ;;  %v2523_v2 = vadd.f32 %v2489_v35, %v2289_v7 }
 0x450   : > { %v2757_v48 = vadd.f32 %v2723_v30, %v2523_v2 }
 0x452   : > { %v2789_v9 = vadd.f32 %v3524_v63, %v2757_v48 }
 0x454   : > { %v2825_v28 = vadd.f32 %v4741_v60, %v2789_v9 }
 0x456   : > { %2857 = vst [vmem:[%s5020_s5 + $0xf8] sm:$0xff] %v2825_v28 }
 0x457 PF: > { %p15_p8 = scmp.ge.s32.totalorder %s3646_s23, 4   ;;  %s5023_s18 = smov %s3581_s19 }
 0x458   : > { %s5024_s19 = smov %s3585_s20  ;;  %s5025_s20 = smov %s3656_s26 }
 0x459   : > { %s5026_s21 = smov %s3646_s23  ;;  %17 = sbr.rel (!%p15_p8) target bundleno = 3 (0x3), region = 99 }
 0x45e   :  { %2869 = vsyncpa [#allocation4], 1 }
 0x45f   :  { %2871 = vsyncpa [#allocation4 + $0x1], 1 }

</bundles_post_ra>
